<compile_context>
chip_gen: v7x
topology: tpu7x:2x2x1
jax: 0.10.0
libtpu: 0.0.40
codegen_flags: <defaults>
</compile_context>

<pallas_src>
import functools

import jax
import jax.numpy as jnp
import numpy as np
from jax import lax
from jax.experimental import pallas as pl
from jax.experimental.pallas import tpu as pltpu


def _layernorm(x, g, b, eps):
    m = jnp.mean(x, axis=-1, keepdims=True)
    v = jnp.mean((x - m) ** 2, axis=-1, keepdims=True)
    return (x - m) * lax.rsqrt(v + eps) * g + b


def _bf16(x):
    return x.astype(jnp.bfloat16)


def transformer_layer_kernel(
        x_ref, emb_w_ref, emb_b_ref,
        wqkv_ref, bqkv_ref, wo_ref, bo_ref,
        g1_ref, be1_ref, g2_ref, be2_ref,
        w1_ref, b1_ref, w2_ref, b2_ref,
        ow_ref, ob_ref,
        o_ref,
        h_ref, ctx_ref,
        *, S, H, nH, eps):
    """One encoder layer per grid step; h_ref carries the residual stream."""
    l = pl.program_id(0)
    num_layers = pl.num_programs(0)
    dH = H // nH
    scale = 1.0 / float(dH) ** 0.5

    # ---- embedding (first grid step only) ----
    @pl.when(l == 0)
    def _():
        h_ref[...] = (jnp.dot(_bf16(x_ref[...]), emb_w_ref[...],
                              preferred_element_type=jnp.float32)
                      + emb_b_ref[...])

    h = h_ref[...]                      # (S, H) f32 residual stream
    h_bf = _bf16(h)

    # ---- multi-head self-attention (post-norm encoder layer) ----
    qkv = (jnp.dot(h_bf, wqkv_ref[0], preferred_element_type=jnp.float32)
           + bqkv_ref[0])               # (S, 3H) f32

    for hh in range(nH):                # nH small & static -> unrolled
        c0 = hh * dH
        q = _bf16(qkv[:, c0:c0 + dH] * scale)             # (S, dH)
        k = _bf16(qkv[:, H + c0:H + c0 + dH])             # (S, dH)
        v = _bf16(qkv[:, 2 * H + c0:2 * H + c0 + dH])     # (S, dH)
        # scores = q @ k^T expressed as a dot_general (no explicit transpose)
        s = lax.dot_general(q, k, (((1,), (1,)), ((), ())),
                            preferred_element_type=jnp.float32)   # (S, S)
        s = s - jnp.max(s, axis=-1, keepdims=True)
        p = jnp.exp(s)                                    # unnormalized probs
        ctx = jnp.dot(_bf16(p), v, preferred_element_type=jnp.float32)
        inv = pl.reciprocal(jnp.sum(p, axis=-1, keepdims=True), approx=True)
        ctx_ref[:, c0:c0 + dH] = ctx * inv                # (S, dH) context

    attn = (jnp.dot(_bf16(ctx_ref[...]), wo_ref[0],
                    preferred_element_type=jnp.float32) + bo_ref[0])
    # TODO(synk): dropout layers are identity here (inference semantics).
    h = _layernorm(h + attn, g1_ref[0], be1_ref[0], eps)

    # ---- feed-forward ----
    ff = jnp.maximum(
        jnp.dot(_bf16(h), w1_ref[0], preferred_element_type=jnp.float32)
        + b1_ref[0], 0.0)
    ff = (jnp.dot(_bf16(ff), w2_ref[0], preferred_element_type=jnp.float32)
          + b2_ref[0])
    h = _layernorm(h + ff, g2_ref[0], be2_ref[0], eps)
    h_ref[...] = h

    # ---- classifier head (last grid step only), lane-dense (padded) output ----
    @pl.when(l == num_layers - 1)
    def _():
        o_ref[...] = (jnp.dot(_bf16(h), ow_ref[...],
                              preferred_element_type=jnp.float32)
                      + ob_ref[...])


def transformer_classifier_forward(x, params, *, num_heads):
    """Pallas forward.  x: (B, S, input_dim) f32 -> (S, num_classes) f32."""
    B, S, Din = x.shape
    H = params["emb_w"].shape[1]
    L = params["wqkv"].shape[0]
    F = params["w1"].shape[2]
    C = params["out_w"].shape[1]
    Cp = pl.cdiv(C, 128) * 128          # pad classes to a full lane tile

    # Only the last batch element feeds transformer_output[:, -1, :].
    x_last = x[B - 1]                   # (S, Din)

    out_w_p = jnp.pad(params["out_w"], ((0, 0), (0, Cp - C)))
    out_b_p = jnp.pad(params["out_b"], ((0, 0), (0, Cp - C)))

    # Matmul weights in bf16 (half the weight streaming); biases/LN in f32.
    args = (x_last,
            _bf16(params["emb_w"]), params["emb_b"],
            _bf16(params["wqkv"]), params["bqkv"],
            _bf16(params["wo"]), params["bo"],
            params["g1"], params["be1"], params["g2"], params["be2"],
            _bf16(params["w1"]), params["b1"],
            _bf16(params["w2"]), params["b2"],
            _bf16(out_w_p), out_b_p)

    def resident(*blk):                 # fetched once, stays resident
        return pl.BlockSpec(blk, lambda l: (0,) * len(blk))

    def layer(*blk):                    # streamed per grid step l
        return pl.BlockSpec((1,) + blk, lambda l: (l, 0, 0))

    in_specs = [
        resident(S, Din),               # x (last batch element)
        resident(Din, H),               # emb_w
        resident(1, H),                 # emb_b
        layer(H, 3 * H),                # wqkv
        layer(1, 3 * H),                # bqkv
        layer(H, H),                    # wo
        layer(1, H),                    # bo
        layer(1, H),                    # g1
        layer(1, H),                    # be1
        layer(1, H),                    # g2
        layer(1, H),                    # be2
        layer(H, F),                    # w1
        layer(1, F),                    # b1
        layer(F, H),                    # w2
        layer(1, H),                    # b2
        resident(H, Cp),                # out_w (padded, bf16)
        resident(1, Cp),                # out_b (padded)
    ]

    # VMEM budget: double-buffered per-layer weights + resident tensors +
    # output + scratch, with headroom for compiler-internal buffers.
    def nbytes(a):
        return int(a.size) * a.dtype.itemsize
    per_layer_bytes = sum(nbytes(a) // L for a in args[3:15])
    resident_bytes = sum(nbytes(a) for a in
                         (args[0], args[1], args[2], args[15], args[16]))
    out_bytes = S * Cp * 4
    scratch_bytes = 2 * S * H * 4
    vmem_limit = int(2 * (per_layer_bytes + resident_bytes + out_bytes)
                     + scratch_bytes + (8 << 20))

    kernel = functools.partial(transformer_layer_kernel,
                               S=S, H=H, nH=num_heads, eps=1e-5)
    out = pl.pallas_call(
        kernel,
        out_shape=jax.ShapeDtypeStruct((S, Cp), jnp.float32),
        grid_spec=pltpu.PrefetchScalarGridSpec(
            num_scalar_prefetch=0,
            grid=(L,),
            in_specs=in_specs,
            out_specs=pl.BlockSpec((S, Cp), lambda l: (0, 0)),
            scratch_shapes=[pltpu.VMEM((S, H), jnp.float32),    # residual h
                            pltpu.VMEM((S, H), jnp.float32)],   # attn context
        ),
        # Layers are sequentially dependent through h -> "arbitrary".
        # TODO(synk): for long sequences a leading "parallel" row-tile axis
        # over S could engage v7x's second TensorCore; at S=8 it cannot.
        compiler_params=pltpu.CompilerParams(
            dimension_semantics=("arbitrary",),
            vmem_limit_bytes=vmem_limit),
    )(*args)
    return out[:, :C]


def init_params(key, input_dim, hidden_dim, num_layers, num_classes,
                ffn_dim=2048):
    H, L, F = hidden_dim, num_layers, ffn_dim
    ks = jax.random.split(key, 12)

    def w(k, shape, scale=0.02):
        return (scale * jax.random.normal(k, shape)).astype(jnp.float32)

    return dict(
        emb_w=w(ks[0], (input_dim, H)),
        emb_b=w(ks[1], (1, H)),
        wqkv=w(ks[2], (L, H, 3 * H)),
        bqkv=w(ks[3], (L, 1, 3 * H)),
        wo=w(ks[4], (L, H, H)),
        bo=w(ks[5], (L, 1, H)),
        g1=jnp.ones((L, 1, H), jnp.float32),
        be1=jnp.zeros((L, 1, H), jnp.float32),
        g2=jnp.ones((L, 1, H), jnp.float32),
        be2=jnp.zeros((L, 1, H), jnp.float32),
        w1=w(ks[6], (L, H, F)),
        b1=w(ks[7], (L, 1, F)),
        w2=w(ks[8], (L, F, H)),
        b2=w(ks[9], (L, 1, H)),
        out_w=w(ks[10], (H, num_classes)),
        out_b=w(ks[11], (1, num_classes)),
    )


def reference_forward(x, params, *, num_heads, eps=1e-5):
    """Pure-JAX reference (full batch, same bf16 matmul rounding points)."""
    B, S, Din = x.shape
    H = params["emb_w"].shape[1]
    nH, dH = num_heads, H // num_heads
    L = params["wqkv"].shape[0]
    scale = 1.0 / float(dH) ** 0.5

    def bdot(a, b):
        return jnp.dot(_bf16(a), _bf16(b), preferred_element_type=jnp.float32)

    h = bdot(x.reshape(B * S, Din), params["emb_w"]) + params["emb_b"]
    for l in range(L):
        qkv = bdot(h, params["wqkv"][l]) + params["bqkv"][l]
        q, k, v = jnp.split(qkv, 3, axis=-1)
        q = (q * scale).reshape(B, S, nH, dH).transpose(0, 2, 1, 3)
        k = k.reshape(B, S, nH, dH).transpose(0, 2, 1, 3)
        v = v.reshape(B, S, nH, dH).transpose(0, 2, 1, 3)
        s = jnp.einsum("bhqd,bhkd->bhqk", _bf16(q), _bf16(k),
                       preferred_element_type=jnp.float32)
        s = s - jnp.max(s, axis=-1, keepdims=True)
        p = jnp.exp(s)
        ctx = jnp.einsum("bhqk,bhkd->bhqd", _bf16(p), _bf16(v),
                         preferred_element_type=jnp.float32)
        ctx = ctx / jnp.sum(p, axis=-1, keepdims=True)
        ctx = ctx.transpose(0, 2, 1, 3).reshape(B * S, H)
        attn = bdot(ctx, params["wo"][l]) + params["bo"][l]
        h = _layernorm(h + attn, params["g1"][l], params["be1"][l], eps)
        ff = jnp.maximum(bdot(h, params["w1"][l]) + params["b1"][l], 0.0)
        ff = bdot(ff, params["w2"][l]) + params["b2"][l]
        h = _layernorm(h + ff, params["g2"][l], params["be2"][l], eps)
    last = h[(B - 1) * S:B * S]                     # == output[:, -1, :] rows
    return bdot(last, params["out_w"]) + params["out_b"]


if __name__ == "__main__":
    # Small shapes consistent with the module's forward:
    # src: (batch=2, seq=8, input_dim=16); hidden=128, heads=4, layers=2,
    # classes=5, ffn=2048 (PyTorch TransformerEncoderLayer default).
    B, S = 2, 8
    input_dim, hidden_dim, num_layers, num_heads, num_classes = 16, 128, 2, 4, 5

    key = jax.random.PRNGKey(0)
    kx, kp = jax.random.split(key)
    x = jax.random.normal(kx, (B, S, input_dim), dtype=jnp.float32)
    params = init_params(kp, input_dim, hidden_dim, num_layers, num_classes)

    out = transformer_classifier_forward(x, params, num_heads=num_heads)
    out = jax.block_until_ready(out)
    assert out.shape == (S, num_classes)

    ref = reference_forward(x, params, num_heads=num_heads)
    # bf16 matmul rounding is matched in the reference; residual slack covers
    # the approximate softmax reciprocal and accumulation-order differences.
    np.testing.assert_allclose(np.asarray(out), np.asarray(ref),
                               rtol=1e-2, atol=1e-3)
    print("KERNEL_OK")
</pallas_src>

<mosaic_0001>
module attributes {stable_mosaic.version = 11 : i64} {
  func.func @transformer_layer_kernel(%arg0: i32, %arg1: memref<8x16xf32, #tpu.memory_space<vmem>>, %arg2: memref<16x128xbf16, #tpu.memory_space<vmem>>, %arg3: memref<1x128xf32, #tpu.memory_space<vmem>>, %arg4: memref<1x128x384xbf16, #tpu.memory_space<vmem>>, %arg5: memref<1x1x384xf32, #tpu.memory_space<vmem>>, %arg6: memref<1x128x128xbf16, #tpu.memory_space<vmem>>, %arg7: memref<1x1x128xf32, #tpu.memory_space<vmem>>, %arg8: memref<1x1x128xf32, #tpu.memory_space<vmem>>, %arg9: memref<1x1x128xf32, #tpu.memory_space<vmem>>, %arg10: memref<1x1x128xf32, #tpu.memory_space<vmem>>, %arg11: memref<1x1x128xf32, #tpu.memory_space<vmem>>, %arg12: memref<1x128x2048xbf16, #tpu.memory_space<vmem>>, %arg13: memref<1x1x2048xf32, #tpu.memory_space<vmem>>, %arg14: memref<1x2048x128xbf16, #tpu.memory_space<vmem>>, %arg15: memref<1x1x128xf32, #tpu.memory_space<vmem>>, %arg16: memref<128x128xbf16, #tpu.memory_space<vmem>>, %arg17: memref<1x128xf32, #tpu.memory_space<vmem>>, %arg18: memref<8x128xf32, #tpu.memory_space<vmem>>, %arg19: memref<8x128xf32, #tpu.memory_space<vmem>>, %arg20: memref<8x128xf32, #tpu.memory_space<vmem>>) attributes {dimension_semantics = [#tpu.dimension_semantics<arbitrary>], iteration_bounds = array<i64: 2>, scalar_prefetch = 0 : i64, scratch_operands = 2 : i64, tpu.core_type = #tpu.core_type<tc>, window_params = [{pipeline_mode = #tpu.pipeline_mode<synchronous>, transform_indices = @transform_0, window_bounds = array<i64: 8, 16>}, {pipeline_mode = #tpu.pipeline_mode<synchronous>, transform_indices = @transform_1, window_bounds = array<i64: 16, 128>}, {pipeline_mode = #tpu.pipeline_mode<synchronous>, transform_indices = @transform_2, window_bounds = array<i64: 1, 128>}, {transform_indices = @transform_3, window_bounds = array<i64: 1, 128, 384>}, {transform_indices = @transform_4, window_bounds = array<i64: 1, 1, 384>}, {transform_indices = @transform_5, window_bounds = array<i64: 1, 128, 128>}, {transform_indices = @transform_6, window_bounds = array<i64: 1, 1, 128>}, {transform_indices = @transform_7, window_bounds = array<i64: 1, 1, 128>}, {transform_indices = @transform_8, window_bounds = array<i64: 1, 1, 128>}, {transform_indices = @transform_9, window_bounds = array<i64: 1, 1, 128>}, {transform_indices = @transform_10, window_bounds = array<i64: 1, 1, 128>}, {transform_indices = @transform_11, window_bounds = array<i64: 1, 128, 2048>}, {transform_indices = @transform_12, window_bounds = array<i64: 1, 1, 2048>}, {transform_indices = @transform_13, window_bounds = array<i64: 1, 2048, 128>}, {transform_indices = @transform_14, window_bounds = array<i64: 1, 1, 128>}, {pipeline_mode = #tpu.pipeline_mode<synchronous>, transform_indices = @transform_15, window_bounds = array<i64: 128, 128>}, {pipeline_mode = #tpu.pipeline_mode<synchronous>, transform_indices = @transform_16, window_bounds = array<i64: 1, 128>}, {pipeline_mode = #tpu.pipeline_mode<synchronous>, transform_indices = @transform_17, window_bounds = array<i64: 8, 128>}]} {
    %c0_i32 = arith.constant 0 : i32
    %0 = arith.cmpi eq, %arg0, %c0_i32 : i32
    %1 = arith.extui %0 : i1 to i32
    %c0_i32_0 = arith.constant 0 : i32
    %2 = arith.cmpi ne, %1, %c0_i32_0 : i32
    scf.if %2 {
      %c0_82 = arith.constant 0 : index
      %c0_83 = arith.constant 0 : index
      %185 = vector.load %arg1[%c0_82, %c0_83] : memref<8x16xf32, #tpu.memory_space<vmem>>, vector<8x16xf32>
      %186 = arith.truncf %185 : vector<8x16xf32> to vector<8x16xbf16>
      %c0_84 = arith.constant 0 : index
      %c0_85 = arith.constant 0 : index
      %187 = vector.load %arg2[%c0_84, %c0_85] : memref<16x128xbf16, #tpu.memory_space<vmem>>, vector<16x128xbf16>
      %cst_86 = arith.constant dense<0.000000e+00> : vector<8x128xf32>
      %188 = tpu.matmul %186, %187, %cst_86 {dimension_numbers = #tpu.dot_dimension_numbers<[1], [0], [0], [1], [0, 0, 1, 1], [], []>} : vector<8x16xbf16>, vector<16x128xbf16>, vector<8x128xf32> -> vector<8x128xf32>
      %c0_87 = arith.constant 0 : index
      %c0_88 = arith.constant 0 : index
      %189 = vector.load %arg3[%c0_87, %c0_88] : memref<1x128xf32, #tpu.memory_space<vmem>>, vector<1x128xf32>
      %190 = vector.broadcast %189 : vector<1x128xf32> to vector<8x128xf32>
      %191 = arith.addf %188, %190 : vector<8x128xf32>
      %c0_89 = arith.constant 0 : index
      %c0_90 = arith.constant 0 : index
      %192 = vector.load %arg19[%c0_89, %c0_90] : memref<8x128xf32, #tpu.memory_space<vmem>>, vector<8x128xf32>
      tpu.vector_store %arg19[%c0_89, %c0_90], %191 {strides = array<i32>} : memref<8x128xf32, #tpu.memory_space<vmem>>, vector<8x128xf32>,
    } else {
    }
    %c0 = arith.constant 0 : index
    %c0_1 = arith.constant 0 : index
    %3 = vector.load %arg19[%c0, %c0_1] : memref<8x128xf32, #tpu.memory_space<vmem>>, vector<8x128xf32>
    %4 = arith.truncf %3 : vector<8x128xf32> to vector<8x128xbf16>
    %c0_2 = arith.constant 0 : index
    %c0_3 = arith.constant 0 : index
    %c0_4 = arith.constant 0 : index
    %5 = vector.load %arg4[%c0_2, %c0_3, %c0_4] : memref<1x128x384xbf16, #tpu.memory_space<vmem>>, vector<1x128x384xbf16>
    %6 = vector.shape_cast %5 : vector<1x128x384xbf16> to vector<128x384xbf16>
    %cst = arith.constant dense<0.000000e+00> : vector<8x384xf32>
    %7 = tpu.matmul %4, %6, %cst {dimension_numbers = #tpu.dot_dimension_numbers<[1], [0], [0], [1], [0, 0, 1, 1], [], []>} : vector<8x128xbf16>, vector<128x384xbf16>, vector<8x384xf32> -> vector<8x384xf32>
    %c0_5 = arith.constant 0 : index
    %c0_6 = arith.constant 0 : index
    %c0_7 = arith.constant 0 : index
    %8 = vector.load %arg5[%c0_5, %c0_6, %c0_7] : memref<1x1x384xf32, #tpu.memory_space<vmem>>, vector<1x1x384xf32>
    %9 = vector.shape_cast %8 : vector<1x1x384xf32> to vector<1x384xf32>
    %10 = vector.broadcast %9 : vector<1x384xf32> to vector<8x384xf32>
    %11 = arith.addf %7, %10 : vector<8x384xf32>
    %12 = vector.extract_strided_slice %11 {offsets = [0, 0], sizes = [8, 32], strides = [1, 1]} : vector<8x384xf32> to vector<8x32xf32>
    %cst_8 = arith.constant 0.176776692 : f32
    %13 = vector.broadcast %cst_8 : f32 to vector<8x32xf32>
    %14 = arith.mulf %12, %13 : vector<8x32xf32>
    %15 = arith.truncf %14 : vector<8x32xf32> to vector<8x32xbf16>
    %16 = vector.extract_strided_slice %11 {offsets = [0, 128], sizes = [8, 32], strides = [1, 1]} : vector<8x384xf32> to vector<8x32xf32>
    %17 = arith.truncf %16 : vector<8x32xf32> to vector<8x32xbf16>
    %18 = vector.extract_strided_slice %11 {offsets = [0, 256], sizes = [8, 32], strides = [1, 1]} : vector<8x384xf32> to vector<8x32xf32>
    %19 = arith.truncf %18 : vector<8x32xf32> to vector<8x32xbf16>
    %cst_9 = arith.constant dense<0.000000e+00> : vector<8x8xf32>
    %20 = tpu.matmul %15, %17, %cst_9 {dimension_numbers = #tpu.dot_dimension_numbers<[1], [1], [0], [0], [0, 0, 1, 0], [], []>} : vector<8x32xbf16>, vector<8x32xbf16>, vector<8x8xf32> -> vector<8x8xf32>
    %cst_10 = arith.constant dense<0xFF800000> : vector<8xf32>
    %21 = vector.multi_reduction <maximumf>, %20, %cst_10 [1] : vector<8x8xf32> to vector<8xf32>
    %22 = vector.shape_cast %21 : vector<8xf32> to vector<8x1xf32>
    %23 = vector.broadcast %22 : vector<8x1xf32> to vector<8x8xf32>
    %24 = arith.subf %20, %23 : vector<8x8xf32>
    %25 = math.exp %24 : vector<8x8xf32>
    %26 = arith.truncf %25 : vector<8x8xf32> to vector<8x8xbf16>
    %cst_11 = arith.constant dense<0.000000e+00> : vector<8x32xf32>
    %27 = tpu.matmul %26, %19, %cst_11 {dimension_numbers = #tpu.dot_dimension_numbers<[1], [0], [0], [1], [0, 0, 1, 1], [], []>} : vector<8x8xbf16>, vector<8x32xbf16>, vector<8x32xf32> -> vector<8x32xf32>
    %cst_12 = arith.constant dense<0.000000e+00> : vector<8xf32>
    %28 = vector.multi_reduction <add>, %25, %cst_12 [1] : vector<8x8xf32> to vector<8xf32>
    %29 = vector.shape_cast %28 : vector<8xf32> to vector<8x1xf32>
    %30 = tpu.reciprocal %29 {approx = true} : vector<8x1xf32> -> vector<8x1xf32>
    %31 = vector.broadcast %30 : vector<8x1xf32> to vector<8x32xf32>
    %32 = arith.mulf %27, %31 : vector<8x32xf32>
    %c0_13 = arith.constant 0 : index
    %c0_14 = arith.constant 0 : index
    %33 = vector.load %arg20[%c0_13, %c0_14] : memref<8x128xf32, #tpu.memory_space<vmem>>, vector<8x32xf32>
    tpu.vector_store %arg20[%c0_13, %c0_14], %32 {strides = array<i32>} : memref<8x128xf32, #tpu.memory_space<vmem>>, vector<8x32xf32>,
    %34 = vector.extract_strided_slice %11 {offsets = [0, 32], sizes = [8, 32], strides = [1, 1]} : vector<8x384xf32> to vector<8x32xf32>
    %cst_15 = arith.constant 0.176776692 : f32
    %35 = vector.broadcast %cst_15 : f32 to vector<8x32xf32>
    %36 = arith.mulf %34, %35 : vector<8x32xf32>
    %37 = arith.truncf %36 : vector<8x32xf32> to vector<8x32xbf16>
    %38 = vector.extract_strided_slice %11 {offsets = [0, 160], sizes = [8, 32], strides = [1, 1]} : vector<8x384xf32> to vector<8x32xf32>
    %39 = arith.truncf %38 : vector<8x32xf32> to vector<8x32xbf16>
    %40 = vector.extract_strided_slice %11 {offsets = [0, 288], sizes = [8, 32], strides = [1, 1]} : vector<8x384xf32> to vector<8x32xf32>
    %41 = arith.truncf %40 : vector<8x32xf32> to vector<8x32xbf16>
    %cst_16 = arith.constant dense<0.000000e+00> : vector<8x8xf32>
    %42 = tpu.matmul %37, %39, %cst_16 {dimension_numbers = #tpu.dot_dimension_numbers<[1], [1], [0], [0], [0, 0, 1, 0], [], []>} : vector<8x32xbf16>, vector<8x32xbf16>, vector<8x8xf32> -> vector<8x8xf32>
    %cst_17 = arith.constant dense<0xFF800000> : vector<8xf32>
    %43 = vector.multi_reduction <maximumf>, %42, %cst_17 [1] : vector<8x8xf32> to vector<8xf32>
    %44 = vector.shape_cast %43 : vector<8xf32> to vector<8x1xf32>
    %45 = vector.broadcast %44 : vector<8x1xf32> to vector<8x8xf32>
    %46 = arith.subf %42, %45 : vector<8x8xf32>
    %47 = math.exp %46 : vector<8x8xf32>
    %48 = arith.truncf %47 : vector<8x8xf32> to vector<8x8xbf16>
    %cst_18 = arith.constant dense<0.000000e+00> : vector<8x32xf32>
    %49 = tpu.matmul %48, %41, %cst_18 {dimension_numbers = #tpu.dot_dimension_numbers<[1], [0], [0], [1], [0, 0, 1, 1], [], []>} : vector<8x8xbf16>, vector<8x32xbf16>, vector<8x32xf32> -> vector<8x32xf32>
    %cst_19 = arith.constant dense<0.000000e+00> : vector<8xf32>
    %50 = vector.multi_reduction <add>, %47, %cst_19 [1] : vector<8x8xf32> to vector<8xf32>
    %51 = vector.shape_cast %50 : vector<8xf32> to vector<8x1xf32>
    %52 = tpu.reciprocal %51 {approx = true} : vector<8x1xf32> -> vector<8x1xf32>
    %53 = vector.broadcast %52 : vector<8x1xf32> to vector<8x32xf32>
    %54 = arith.mulf %49, %53 : vector<8x32xf32>
    %c0_20 = arith.constant 0 : index
    %c32 = arith.constant 32 : index
    %55 = vector.load %arg20[%c0_20, %c32] : memref<8x128xf32, #tpu.memory_space<vmem>>, vector<8x32xf32>
    tpu.vector_store %arg20[%c0_20, %c32], %54 {strides = array<i32>} : memref<8x128xf32, #tpu.memory_space<vmem>>, vector<8x32xf32>,
    %56 = vector.extract_strided_slice %11 {offsets = [0, 64], sizes = [8, 32], strides = [1, 1]} : vector<8x384xf32> to vector<8x32xf32>
    %cst_21 = arith.constant 0.176776692 : f32
    %57 = vector.broadcast %cst_21 : f32 to vector<8x32xf32>
    %58 = arith.mulf %56, %57 : vector<8x32xf32>
    %59 = arith.truncf %58 : vector<8x32xf32> to vector<8x32xbf16>
    %60 = vector.extract_strided_slice %11 {offsets = [0, 192], sizes = [8, 32], strides = [1, 1]} : vector<8x384xf32> to vector<8x32xf32>
    %61 = arith.truncf %60 : vector<8x32xf32> to vector<8x32xbf16>
    %62 = vector.extract_strided_slice %11 {offsets = [0, 320], sizes = [8, 32], strides = [1, 1]} : vector<8x384xf32> to vector<8x32xf32>
    %63 = arith.truncf %62 : vector<8x32xf32> to vector<8x32xbf16>
    %cst_22 = arith.constant dense<0.000000e+00> : vector<8x8xf32>
    %64 = tpu.matmul %59, %61, %cst_22 {dimension_numbers = #tpu.dot_dimension_numbers<[1], [1], [0], [0], [0, 0, 1, 0], [], []>} : vector<8x32xbf16>, vector<8x32xbf16>, vector<8x8xf32> -> vector<8x8xf32>
    %cst_23 = arith.constant dense<0xFF800000> : vector<8xf32>
    %65 = vector.multi_reduction <maximumf>, %64, %cst_23 [1] : vector<8x8xf32> to vector<8xf32>
    %66 = vector.shape_cast %65 : vector<8xf32> to vector<8x1xf32>
    %67 = vector.broadcast %66 : vector<8x1xf32> to vector<8x8xf32>
    %68 = arith.subf %64, %67 : vector<8x8xf32>
    %69 = math.exp %68 : vector<8x8xf32>
    %70 = arith.truncf %69 : vector<8x8xf32> to vector<8x8xbf16>
    %cst_24 = arith.constant dense<0.000000e+00> : vector<8x32xf32>
    %71 = tpu.matmul %70, %63, %cst_24 {dimension_numbers = #tpu.dot_dimension_numbers<[1], [0], [0], [1], [0, 0, 1, 1], [], []>} : vector<8x8xbf16>, vector<8x32xbf16>, vector<8x32xf32> -> vector<8x32xf32>
    %cst_25 = arith.constant dense<0.000000e+00> : vector<8xf32>
    %72 = vector.multi_reduction <add>, %69, %cst_25 [1] : vector<8x8xf32> to vector<8xf32>
    %73 = vector.shape_cast %72 : vector<8xf32> to vector<8x1xf32>
    %74 = tpu.reciprocal %73 {approx = true} : vector<8x1xf32> -> vector<8x1xf32>
    %75 = vector.broadcast %74 : vector<8x1xf32> to vector<8x32xf32>
    %76 = arith.mulf %71, %75 : vector<8x32xf32>
    %c0_26 = arith.constant 0 : index
    %c64 = arith.constant 64 : index
    %77 = vector.load %arg20[%c0_26, %c64] : memref<8x128xf32, #tpu.memory_space<vmem>>, vector<8x32xf32>
    tpu.vector_store %arg20[%c0_26, %c64], %76 {strides = array<i32>} : memref<8x128xf32, #tpu.memory_space<vmem>>, vector<8x32xf32>,
    %78 = vector.extract_strided_slice %11 {offsets = [0, 96], sizes = [8, 32], strides = [1, 1]} : vector<8x384xf32> to vector<8x32xf32>
    %cst_27 = arith.constant 0.176776692 : f32
    %79 = vector.broadcast %cst_27 : f32 to vector<8x32xf32>
    %80 = arith.mulf %78, %79 : vector<8x32xf32>
    %81 = arith.truncf %80 : vector<8x32xf32> to vector<8x32xbf16>
    %82 = vector.extract_strided_slice %11 {offsets = [0, 224], sizes = [8, 32], strides = [1, 1]} : vector<8x384xf32> to vector<8x32xf32>
    %83 = arith.truncf %82 : vector<8x32xf32> to vector<8x32xbf16>
    %84 = vector.extract_strided_slice %11 {offsets = [0, 352], sizes = [8, 32], strides = [1, 1]} : vector<8x384xf32> to vector<8x32xf32>
    %85 = arith.truncf %84 : vector<8x32xf32> to vector<8x32xbf16>
    %cst_28 = arith.constant dense<0.000000e+00> : vector<8x8xf32>
    %86 = tpu.matmul %81, %83, %cst_28 {dimension_numbers = #tpu.dot_dimension_numbers<[1], [1], [0], [0], [0, 0, 1, 0], [], []>} : vector<8x32xbf16>, vector<8x32xbf16>, vector<8x8xf32> -> vector<8x8xf32>
    %cst_29 = arith.constant dense<0xFF800000> : vector<8xf32>
    %87 = vector.multi_reduction <maximumf>, %86, %cst_29 [1] : vector<8x8xf32> to vector<8xf32>
    %88 = vector.shape_cast %87 : vector<8xf32> to vector<8x1xf32>
    %89 = vector.broadcast %88 : vector<8x1xf32> to vector<8x8xf32>
    %90 = arith.subf %86, %89 : vector<8x8xf32>
    %91 = math.exp %90 : vector<8x8xf32>
    %92 = arith.truncf %91 : vector<8x8xf32> to vector<8x8xbf16>
    %cst_30 = arith.constant dense<0.000000e+00> : vector<8x32xf32>
    %93 = tpu.matmul %92, %85, %cst_30 {dimension_numbers = #tpu.dot_dimension_numbers<[1], [0], [0], [1], [0, 0, 1, 1], [], []>} : vector<8x8xbf16>, vector<8x32xbf16>, vector<8x32xf32> -> vector<8x32xf32>
    %cst_31 = arith.constant dense<0.000000e+00> : vector<8xf32>
    %94 = vector.multi_reduction <add>, %91, %cst_31 [1] : vector<8x8xf32> to vector<8xf32>
    %95 = vector.shape_cast %94 : vector<8xf32> to vector<8x1xf32>
    %96 = tpu.reciprocal %95 {approx = true} : vector<8x1xf32> -> vector<8x1xf32>
    %97 = vector.broadcast %96 : vector<8x1xf32> to vector<8x32xf32>
    %98 = arith.mulf %93, %97 : vector<8x32xf32>
    %c0_32 = arith.constant 0 : index
    %c96 = arith.constant 96 : index
    %99 = vector.load %arg20[%c0_32, %c96] : memref<8x128xf32, #tpu.memory_space<vmem>>, vector<8x32xf32>
    tpu.vector_store %arg20[%c0_32, %c96], %98 {strides = array<i32>} : memref<8x128xf32, #tpu.memory_space<vmem>>, vector<8x32xf32>,
    %c0_33 = arith.constant 0 : index
    %c0_34 = arith.constant 0 : index
    %100 = vector.load %arg20[%c0_33, %c0_34] : memref<8x128xf32, #tpu.memory_space<vmem>>, vector<8x128xf32>
    %101 = arith.truncf %100 : vector<8x128xf32> to vector<8x128xbf16>
    %c0_35 = arith.constant 0 : index
    %c0_36 = arith.constant 0 : index
    %c0_37 = arith.constant 0 : index
    %102 = vector.load %arg6[%c0_35, %c0_36, %c0_37] : memref<1x128x128xbf16, #tpu.memory_space<vmem>>, vector<1x128x128xbf16>
    %103 = vector.shape_cast %102 : vector<1x128x128xbf16> to vector<128x128xbf16>
    %cst_38 = arith.constant dense<0.000000e+00> : vector<8x128xf32>
    %104 = tpu.matmul %101, %103, %cst_38 {dimension_numbers = #tpu.dot_dimension_numbers<[1], [0], [0], [1], [0, 0, 1, 1], [], []>} : vector<8x128xbf16>, vector<128x128xbf16>, vector<8x128xf32> -> vector<8x128xf32>
    %c0_39 = arith.constant 0 : index
    %c0_40 = arith.constant 0 : index
    %c0_41 = arith.constant 0 : index
    %105 = vector.load %arg7[%c0_39, %c0_40, %c0_41] : memref<1x1x128xf32, #tpu.memory_space<vmem>>, vector<1x1x128xf32>
    %106 = vector.shape_cast %105 : vector<1x1x128xf32> to vector<1x128xf32>
    %107 = vector.broadcast %106 : vector<1x128xf32> to vector<8x128xf32>
    %108 = arith.addf %104, %107 : vector<8x128xf32>
    %109 = arith.addf %3, %108 : vector<8x128xf32>
    %c0_42 = arith.constant 0 : index
    %c0_43 = arith.constant 0 : index
    %c0_44 = arith.constant 0 : index
    %110 = vector.load %arg8[%c0_42, %c0_43, %c0_44] : memref<1x1x128xf32, #tpu.memory_space<vmem>>, vector<1x1x128xf32>
    %111 = vector.shape_cast %110 : vector<1x1x128xf32> to vector<1x128xf32>
    %c0_45 = arith.constant 0 : index
    %c0_46 = arith.constant 0 : index
    %c0_47 = arith.constant 0 : index
    %112 = vector.load %arg9[%c0_45, %c0_46, %c0_47] : memref<1x1x128xf32, #tpu.memory_space<vmem>>, vector<1x1x128xf32>
    %113 = vector.shape_cast %112 : vector<1x1x128xf32> to vector<1x128xf32>
    %cst_48 = arith.constant dense<0.000000e+00> : vector<8xf32>
    %114 = vector.multi_reduction <add>, %109, %cst_48 [1] : vector<8x128xf32> to vector<8xf32>
    %115 = vector.shape_cast %114 : vector<8xf32> to vector<8x1xf32>
    %cst_49 = arith.constant 1.280000e+02 : f32
    %116 = vector.broadcast %cst_49 : f32 to vector<8x1xf32>
    %117 = arith.divf %115, %116 : vector<8x1xf32>
    %118 = vector.broadcast %117 : vector<8x1xf32> to vector<8x128xf32>
    %119 = arith.subf %109, %118 : vector<8x128xf32>
    %120 = arith.mulf %119, %119 : vector<8x128xf32>
    %cst_50 = arith.constant dense<0.000000e+00> : vector<8xf32>
    %121 = vector.multi_reduction <add>, %120, %cst_50 [1] : vector<8x128xf32> to vector<8xf32>
    %122 = vector.shape_cast %121 : vector<8xf32> to vector<8x1xf32>
    %cst_51 = arith.constant 1.280000e+02 : f32
    %123 = vector.broadcast %cst_51 : f32 to vector<8x1xf32>
    %124 = arith.divf %122, %123 : vector<8x1xf32>
    %125 = vector.broadcast %117 : vector<8x1xf32> to vector<8x128xf32>
    %126 = arith.subf %109, %125 : vector<8x128xf32>
    %cst_52 = arith.constant 9.99999974E-6 : f32
    %127 = vector.broadcast %cst_52 : f32 to vector<8x1xf32>
    %128 = arith.addf %124, %127 : vector<8x1xf32>
    %129 = math.rsqrt %128 : vector<8x1xf32>
    %130 = vector.broadcast %129 : vector<8x1xf32> to vector<8x128xf32>
    %131 = arith.mulf %126, %130 : vector<8x128xf32>
    %132 = vector.broadcast %111 : vector<1x128xf32> to vector<8x128xf32>
    %133 = arith.mulf %131, %132 : vector<8x128xf32>
    %134 = vector.broadcast %113 : vector<1x128xf32> to vector<8x128xf32>
    %135 = arith.addf %133, %134 : vector<8x128xf32>
    %136 = arith.truncf %135 : vector<8x128xf32> to vector<8x128xbf16>
    %c0_53 = arith.constant 0 : index
    %c0_54 = arith.constant 0 : index
    %c0_55 = arith.constant 0 : index
    %137 = vector.load %arg12[%c0_53, %c0_54, %c0_55] : memref<1x128x2048xbf16, #tpu.memory_space<vmem>>, vector<1x128x2048xbf16>
    %138 = vector.shape_cast %137 : vector<1x128x2048xbf16> to vector<128x2048xbf16>
    %cst_56 = arith.constant dense<0.000000e+00> : vector<8x2048xf32>
    %139 = tpu.matmul %136, %138, %cst_56 {dimension_numbers = #tpu.dot_dimension_numbers<[1], [0], [0], [1], [0, 0, 1, 1], [], []>} : vector<8x128xbf16>, vector<128x2048xbf16>, vector<8x2048xf32> -> vector<8x2048xf32>
    %c0_57 = arith.constant 0 : index
    %c0_58 = arith.constant 0 : index
    %c0_59 = arith.constant 0 : index
    %140 = vector.load %arg13[%c0_57, %c0_58, %c0_59] : memref<1x1x2048xf32, #tpu.memory_space<vmem>>, vector<1x1x2048xf32>
    %141 = vector.shape_cast %140 : vector<1x1x2048xf32> to vector<1x2048xf32>
    %142 = vector.broadcast %141 : vector<1x2048xf32> to vector<8x2048xf32>
    %143 = arith.addf %139, %142 : vector<8x2048xf32>
    %cst_60 = arith.constant 0.000000e+00 : f32
    %144 = vector.broadcast %cst_60 : f32 to vector<8x2048xf32>
    %145 = arith.maximumf %143, %144 : vector<8x2048xf32>
    %146 = arith.truncf %145 : vector<8x2048xf32> to vector<8x2048xbf16>
    %c0_61 = arith.constant 0 : index
    %c0_62 = arith.constant 0 : index
    %c0_63 = arith.constant 0 : index
    %147 = vector.load %arg14[%c0_61, %c0_62, %c0_63] : memref<1x2048x128xbf16, #tpu.memory_space<vmem>>, vector<1x2048x128xbf16>
    %148 = vector.shape_cast %147 : vector<1x2048x128xbf16> to vector<2048x128xbf16>
    %cst_64 = arith.constant dense<0.000000e+00> : vector<8x128xf32>
    %149 = tpu.matmul %146, %148, %cst_64 {dimension_numbers = #tpu.dot_dimension_numbers<[1], [0], [0], [1], [0, 0, 1, 1], [], []>} : vector<8x2048xbf16>, vector<2048x128xbf16>, vector<8x128xf32> -> vector<8x128xf32>
    %c0_65 = arith.constant 0 : index
    %c0_66 = arith.constant 0 : index
    %c0_67 = arith.constant 0 : index
    %150 = vector.load %arg15[%c0_65, %c0_66, %c0_67] : memref<1x1x128xf32, #tpu.memory_space<vmem>>, vector<1x1x128xf32>
    %151 = vector.shape_cast %150 : vector<1x1x128xf32> to vector<1x128xf32>
    %152 = vector.broadcast %151 : vector<1x128xf32> to vector<8x128xf32>
    %153 = arith.addf %149, %152 : vector<8x128xf32>
    %154 = arith.addf %135, %153 : vector<8x128xf32>
    %c0_68 = arith.constant 0 : index
    %c0_69 = arith.constant 0 : index
    %c0_70 = arith.constant 0 : index
    %155 = vector.load %arg10[%c0_68, %c0_69, %c0_70] : memref<1x1x128xf32, #tpu.memory_space<vmem>>, vector<1x1x128xf32>
    %156 = vector.shape_cast %155 : vector<1x1x128xf32> to vector<1x128xf32>
    %c0_71 = arith.constant 0 : index
    %c0_72 = arith.constant 0 : index
    %c0_73 = arith.constant 0 : index
    %157 = vector.load %arg11[%c0_71, %c0_72, %c0_73] : memref<1x1x128xf32, #tpu.memory_space<vmem>>, vector<1x1x128xf32>
    %158 = vector.shape_cast %157 : vector<1x1x128xf32> to vector<1x128xf32>
    %cst_74 = arith.constant dense<0.000000e+00> : vector<8xf32>
    %159 = vector.multi_reduction <add>, %154, %cst_74 [1] : vector<8x128xf32> to vector<8xf32>
    %160 = vector.shape_cast %159 : vector<8xf32> to vector<8x1xf32>
    %cst_75 = arith.constant 1.280000e+02 : f32
    %161 = vector.broadcast %cst_75 : f32 to vector<8x1xf32>
    %162 = arith.divf %160, %161 : vector<8x1xf32>
    %163 = vector.broadcast %162 : vector<8x1xf32> to vector<8x128xf32>
    %164 = arith.subf %154, %163 : vector<8x128xf32>
    %165 = arith.mulf %164, %164 : vector<8x128xf32>
    %cst_76 = arith.constant dense<0.000000e+00> : vector<8xf32>
    %166 = vector.multi_reduction <add>, %165, %cst_76 [1] : vector<8x128xf32> to vector<8xf32>
    %167 = vector.shape_cast %166 : vector<8xf32> to vector<8x1xf32>
    %cst_77 = arith.constant 1.280000e+02 : f32
    %168 = vector.broadcast %cst_77 : f32 to vector<8x1xf32>
    %169 = arith.divf %167, %168 : vector<8x1xf32>
    %170 = vector.broadcast %162 : vector<8x1xf32> to vector<8x128xf32>
    %171 = arith.subf %154, %170 : vector<8x128xf32>
    %cst_78 = arith.constant 9.99999974E-6 : f32
    %172 = vector.broadcast %cst_78 : f32 to vector<8x1xf32>
    %173 = arith.addf %169, %172 : vector<8x1xf32>
    %174 = math.rsqrt %173 : vector<8x1xf32>
    %175 = vector.broadcast %174 : vector<8x1xf32> to vector<8x128xf32>
    %176 = arith.mulf %171, %175 : vector<8x128xf32>
    %177 = vector.broadcast %156 : vector<1x128xf32> to vector<8x128xf32>
    %178 = arith.mulf %176, %177 : vector<8x128xf32>
    %179 = vector.broadcast %158 : vector<1x128xf32> to vector<8x128xf32>
    %180 = arith.addf %178, %179 : vector<8x128xf32>
    %c0_79 = arith.constant 0 : index
    %c0_80 = arith.constant 0 : index
    %181 = vector.load %arg19[%c0_79, %c0_80] : memref<8x128xf32, #tpu.memory_space<vmem>>, vector<8x128xf32>
    tpu.vector_store %arg19[%c0_79, %c0_80], %180 {strides = array<i32>} : memref<8x128xf32, #tpu.memory_space<vmem>>, vector<8x128xf32>,
    %c1_i32 = arith.constant 1 : i32
    %182 = arith.cmpi eq, %arg0, %c1_i32 : i32
    %183 = arith.extui %182 : i1 to i32
    %c0_i32_81 = arith.constant 0 : i32
    %184 = arith.cmpi ne, %183, %c0_i32_81 : i32
    scf.if %184 {
      %185 = arith.truncf %180 : vector<8x128xf32> to vector<8x128xbf16>
      %c0_82 = arith.constant 0 : index
      %c0_83 = arith.constant 0 : index
      %186 = vector.load %arg16[%c0_82, %c0_83] : memref<128x128xbf16, #tpu.memory_space<vmem>>, vector<128x128xbf16>
      %cst_84 = arith.constant dense<0.000000e+00> : vector<8x128xf32>
      %187 = tpu.matmul %185, %186, %cst_84 {dimension_numbers = #tpu.dot_dimension_numbers<[1], [0], [0], [1], [0, 0, 1, 1], [], []>} : vector<8x128xbf16>, vector<128x128xbf16>, vector<8x128xf32> -> vector<8x128xf32>
      %c0_85 = arith.constant 0 : index
      %c0_86 = arith.constant 0 : index
      %188 = vector.load %arg17[%c0_85, %c0_86] : memref<1x128xf32, #tpu.memory_space<vmem>>, vector<1x128xf32>
      %189 = vector.broadcast %188 : vector<1x128xf32> to vector<8x128xf32>
      %190 = arith.addf %187, %189 : vector<8x128xf32>
      %c0_87 = arith.constant 0 : index
      %c0_88 = arith.constant 0 : index
      %191 = vector.load %arg18[%c0_87, %c0_88] : memref<8x128xf32, #tpu.memory_space<vmem>>, vector<8x128xf32>
      tpu.vector_store %arg18[%c0_87, %c0_88], %190 {strides = array<i32>} : memref<8x128xf32, #tpu.memory_space<vmem>>, vector<8x128xf32>,
    } else {
    }
    return
  }
  func.func @transform_0(%arg0: i32) -> (i32, i32) {
    %c0_i32 = arith.constant 0 : i32
    %c0_i32_0 = arith.constant 0 : i32
    %c0_i32_1 = arith.constant 0 : i32
    return %c0_i32, %c0_i32_0 : i32, i32
  }
  func.func @transform_1(%arg0: i32) -> (i32, i32) {
    %c0_i32 = arith.constant 0 : i32
    %c0_i32_0 = arith.constant 0 : i32
    %c0_i32_1 = arith.constant 0 : i32
    return %c0_i32, %c0_i32_0 : i32, i32
  }
  func.func @transform_2(%arg0: i32) -> (i32, i32) {
    %c0_i32 = arith.constant 0 : i32
    %c0_i32_0 = arith.constant 0 : i32
    %c0_i32_1 = arith.constant 0 : i32
    return %c0_i32, %c0_i32_0 : i32, i32
  }
  func.func @transform_3(%arg0: i32) -> (i32, i32, i32) {
    %c0_i32 = arith.constant 0 : i32
    %c0_i32_0 = arith.constant 0 : i32
    %c0_i32_1 = arith.constant 0 : i32
    return %arg0, %c0_i32, %c0_i32_0 : i32, i32, i32
  }
  func.func @transform_4(%arg0: i32) -> (i32, i32, i32) {
    %c0_i32 = arith.constant 0 : i32
    %c0_i32_0 = arith.constant 0 : i32
    %c0_i32_1 = arith.constant 0 : i32
    return %arg0, %c0_i32, %c0_i32_0 : i32, i32, i32
  }
  func.func @transform_5(%arg0: i32) -> (i32, i32, i32) {
    %c0_i32 = arith.constant 0 : i32
    %c0_i32_0 = arith.constant 0 : i32
    %c0_i32_1 = arith.constant 0 : i32
    return %arg0, %c0_i32, %c0_i32_0 : i32, i32, i32
  }
  func.func @transform_6(%arg0: i32) -> (i32, i32, i32) {
    %c0_i32 = arith.constant 0 : i32
    %c0_i32_0 = arith.constant 0 : i32
    %c0_i32_1 = arith.constant 0 : i32
    return %arg0, %c0_i32, %c0_i32_0 : i32, i32, i32
  }
  func.func @transform_7(%arg0: i32) -> (i32, i32, i32) {
    %c0_i32 = arith.constant 0 : i32
    %c0_i32_0 = arith.constant 0 : i32
    %c0_i32_1 = arith.constant 0 : i32
    return %arg0, %c0_i32, %c0_i32_0 : i32, i32, i32
  }
  func.func @transform_8(%arg0: i32) -> (i32, i32, i32) {
    %c0_i32 = arith.constant 0 : i32
    %c0_i32_0 = arith.constant 0 : i32
    %c0_i32_1 = arith.constant 0 : i32
    return %arg0, %c0_i32, %c0_i32_0 : i32, i32, i32
  }
  func.func @transform_9(%arg0: i32) -> (i32, i32, i32) {
    %c0_i32 = arith.constant 0 : i32
    %c0_i32_0 = arith.constant 0 : i32
    %c0_i32_1 = arith.constant 0 : i32
    return %arg0, %c0_i32, %c0_i32_0 : i32, i32, i32
  }
  func.func @transform_10(%arg0: i32) -> (i32, i32, i32) {
    %c0_i32 = arith.constant 0 : i32
    %c0_i32_0 = arith.constant 0 : i32
    %c0_i32_1 = arith.constant 0 : i32
    return %arg0, %c0_i32, %c0_i32_0 : i32, i32, i32
  }
  func.func @transform_11(%arg0: i32) -> (i32, i32, i32) {
    %c0_i32 = arith.constant 0 : i32
    %c0_i32_0 = arith.constant 0 : i32
    %c0_i32_1 = arith.constant 0 : i32
    return %arg0, %c0_i32, %c0_i32_0 : i32, i32, i32
  }
  func.func @transform_12(%arg0: i32) -> (i32, i32, i32) {
    %c0_i32 = arith.constant 0 : i32
    %c0_i32_0 = arith.constant 0 : i32
    %c0_i32_1 = arith.constant 0 : i32
    return %arg0, %c0_i32, %c0_i32_0 : i32, i32, i32
  }
  func.func @transform_13(%arg0: i32) -> (i32, i32, i32) {
    %c0_i32 = arith.constant 0 : i32
    %c0_i32_0 = arith.constant 0 : i32
    %c0_i32_1 = arith.constant 0 : i32
    return %arg0, %c0_i32, %c0_i32_0 : i32, i32, i32
  }
  func.func @transform_14(%arg0: i32) -> (i32, i32, i32) {
    %c0_i32 = arith.constant 0 : i32
    %c0_i32_0 = arith.constant 0 : i32
    %c0_i32_1 = arith.constant 0 : i32
    return %arg0, %c0_i32, %c0_i32_0 : i32, i32, i32
  }
  func.func @transform_15(%arg0: i32) -> (i32, i32) {
    %c0_i32 = arith.constant 0 : i32
    %c0_i32_0 = arith.constant 0 : i32
    %c0_i32_1 = arith.constant 0 : i32
    return %c0_i32, %c0_i32_0 : i32, i32
  }
  func.func @transform_16(%arg0: i32) -> (i32, i32) {
    %c0_i32 = arith.constant 0 : i32
    %c0_i32_0 = arith.constant 0 : i32
    %c0_i32_1 = arith.constant 0 : i32
    return %c0_i32, %c0_i32_0 : i32, i32
  }
  func.func @transform_17(%arg0: i32) -> (i32, i32) {
    %c0_i32 = arith.constant 0 : i32
    %c0_i32_0 = arith.constant 0 : i32
    %c0_i32_1 = arith.constant 0 : i32
    return %c0_i32, %c0_i32_0 : i32, i32
  }
}

</mosaic_0001>

<bundles_post_ra>
// kernel: tpu_custom_call.1
= control target key start
LH: loop header
LB: loop body
LE: loop exit
PB: predicated region body
PF: predicated region fallthrough
CT: control target
= control target key end

     0   :  { %s7145_s0 = inlined_call_operand.hbm [shape: f32[8,16], index: 0, kind: input, shape index: {}]   ;;  %s7146_s1 = inlined_call_operand.hbm [shape: bf16[16,128], index: 1, kind: input, shape index: {}]   ;;  %s7147_s2 = inlined_call_operand.vmem [shape: f32[1,128], index: 2, kind: input, shape index: {}]   ;;  %s7148_s3 = inlined_call_operand.hbm [shape: bf16[2,128,384], index: 3, kind: input, shape index: {}]   ;;  %s7149_s4 = inlined_call_operand.vmem [shape: f32[2,1,384], index: 4, kind: input, shape index: {}]   ;;  %s7150_s5 = inlined_call_operand.hbm [shape: bf16[2,128,128], index: 5, kind: input, shape index: {}]   ;;  %s7151_s6 = inlined_call_operand.vmem [shape: f32[2,1,128], index: 6, kind: input, shape index: {}]   ;;  %s7152_s7 = inlined_call_operand.vmem [shape: f32[2,1,128], index: 7, kind: input, shape index: {}]   ;;  %s7153_s8 = inlined_call_operand.vmem [shape: f32[2,1,128], index: 8, kind: input, shape index: {}]   ;;  %s7154_s9 = inlined_call_operand.hbm [shape: f32[2,1,128], index: 9, kind: input, shape index: {}]   ;;  %s7155_s10 = inlined_call_operand.hbm [shape: f32[2,1,128], index: 10, kind: input, shape index: {}]   ;;  %s7156_s11 = inlined_call_operand.hbm [shape: bf16[2,128,2048], index: 11, kind: input, shape index: {}]   ;;  %s7157_s12 = inlined_call_operand.vmem [shape: f32[2,1,2048], index: 12, kind: input, shape index: {}]   ;;  %s7158_s13 = inlined_call_operand.hbm [shape: bf16[2,2048,128], index: 13, kind: input, shape index: {}]   ;;  %s7159_s14 = inlined_call_operand.vmem [shape: f32[2,1,128], index: 14, kind: input, shape index: {}]   ;;  %s7160_s15 = inlined_call_operand.hbm [shape: bf16[128,128], index: 15, kind: input, shape index: {}]   ;;  %s7161_s16 = inlined_call_operand.vmem [shape: f32[1,128], index: 16, kind: input, shape index: {}]   ;;  %s7162_s17 = inlined_call_operand.hbm [shape: f32[8,128], index: 17, kind: output, shape index: {}]  }
   0x1   :  { %7185 = sst [smem:[#allocation25_spill]] %s7145_s0 }
   0x2   :  { %7186 = sst [smem:[#allocation26_spill]] %s7146_s1 }
   0x3   :  { %7187 = sst [smem:[#allocation27_spill]] %s7147_s2 }
   0x4   :  { %7188 = sst [smem:[#allocation28_spill]] %s7148_s3 }
   0x5   :  { %7189 = sst [smem:[#allocation29_spill]] %s7149_s4 }
   0x6   :  { %7190 = sst [smem:[#allocation30_spill]] %s7150_s5 }
   0x7   :  { %7191 = sst [smem:[#allocation31_spill]] %s7152_s7 }
   0x8   :  { %7192 = sst [smem:[#allocation32_spill]] %s7153_s8 }
   0x9   :  { %7193 = sst [smem:[#allocation33_spill]] %s7154_s9 }
   0xa   :  { %7194 = sst [smem:[#allocation34_spill]] %s7155_s10 }
   0xb   :  { %7195 = sst [smem:[#allocation35_spill]] %s7156_s11 }
   0xc   :  { %7196 = sst [smem:[#allocation36_spill]] %s7157_s12 }
   0xd   :  { %7197 = sst [smem:[#allocation37_spill]] %s7158_s13 }
   0xe   :  { %7198 = sst [smem:[#allocation38_spill]] %s7159_s14 }
   0xf   :  { %7199 = sst [smem:[#allocation39_spill]] %s7161_s16 }
  0x10   :  { %7200 = sst [smem:[#allocation40_spill]] %s7162_s17 }
  0x11   :  { %22 = vsyncpa [#allocation5], 0 }
  0x12   :  { %23 = vsyncpa [#allocation8], 0 }
  0x13   :  { %24 = vsyncpa [#allocation6], 0  ;;  %s6197_s24 = smov 0   ;;  %s6199_s25 = smov 0  }
  0x14   :  { %s6201_s26 = smov 0   ;;  %s6203_s27 = smov 0  }
  0x15 LB: > { %7201 = sst [smem:[#allocation22_spill]] %s6076_s26  ;;  %s6216_s28 = sadd.s32 4294967295, %s6080_s27   ;;  %s6080_s27 = sphi %s6203_s27, %s7253_s27   ;;  %s6076_s26 = sphi %s6201_s26, %s7255_s26   ;;  %s6072_s25 = sphi %s6199_s25, %s7257_s25   ;;  %s6068_s24 = sphi %s6197_s24, %s7256_s24  }
  0x16   : > { %s6219_s29 = sadd.s32 1, %s6080_s27   ;;  %s100_s30 = sadd.s32 1, %s6076_s26 }
  0x17   : > { %7202 = sst [smem:[#allocation23_spill]] %s6219_s29  ;;  %s97_s0 = ssub.s32 %s6080_s27, %s6219_s29 }
  0x18   : > { %p98_p0 = scmp.eq.s32.totalorder %s97_s0, 0  ;;  %p107_p1 = scmp.ne.s32.totalorder %s6076_s26, %s6072_s25 }
  0x19   : > { %p108_p2 = scmp.eq.s32.totalorder %s6080_s27, 0  ;;  %p113_p3 = scmp.ne.s32.totalorder %s6072_s25, %s6068_s24 }
  0x1a   : > { %s6229_s18 = scalar_select %p98_p0, %s6076_s26, %s100_s30  }
  0x1b   : > { %p6231_p4 = por %p108_p2, %p107_p1  ;;  %p7169_p5 = scmp.eq.s32.totalorder %s6216_s28, 0 }
  0x1c   : > { %7203 = sst [smem:[#allocation24_spill]] %s6229_s18  ;;  %p4739_p6 = scmp.ge.s32.totalorder %s6080_s27, 1 }
  0x1d   : > { %p473_p7 = scmp.lt.s32.totalorder %s6080_s27, 3  ;;  %p6240_p8 = por %p7169_p5, %p113_p3 }
  0x1e   : > { %s6082_s21 = smov [#allocation4]   ;;  %p5486_p12 = scmp.lt.s32.totalorder %s6080_s27, 2 }
  0x1f   : > { %s7205_s1 = scalar_select %p6240_p8, 1, 0 }
  0x20   : > { %p6245_p10 = pnand %p4739_p6, %p473_p7  ;;  %s486_s22 = sshll.u32 %s6082_s21, 4  ;;  %s487_s22 = int_to_ptr.vmem [resolvable:$true] %s486_s22 }
  0x21   : > { %s529_s23 = sand.u32 1, %s6080_s27   ;;  %p6261_p0 = pnand %p5486_p12, %p6231_p4 }
  0x22   : > { %s7206_s20 = scalar_select %p6245_p10, 1, 0 }
  0x23   : > { %p5454_p11 = pneg %p6245_p10  ;;  %s6266_s30 = sand.u32 1, %s6076_s26  }
  0x24   : > { %s7208_s0 = scalar_select %p6261_p0, 1, 0 }
  0x25   : > { %p6255_p13 = pnand %p5454_p11, %p7169_p5  ;;  %s5422_s21 = smul.u32 192, %s6266_s30 }
  0x26   : > { %s7209_s17 = sld [smem:[#allocation25_spill]] }
  0x27   : > { %s7207_s24 = scalar_select %p6255_p13, 1, 0 }
  0x28   : > { %p6277_p2 = pneg %p6255_p13 }
  0x2a   : > { %s7210_s19 = scalar_select %p6277_p2, 1, 0 }
  0x2c   : > { %s5740_s16 = scalar_lea.hbm %s7209_s17, 128 }
  0x2d   : > { %p5741_p1 = scmp.ne.s32.totalorder %s7209_s17, %s5740_s16  ;;  %p5747_p6 = scmp.lt.u32.totalorder %s5740_s16, %s7209_s17 }
  0x2f   : > { %p5743_p3 = pnand %p6277_p2, %p5741_p1 }
  0x31   : > { %p5744_p4 = pneg %p5743_p3 }
  0x33   : > { %p5749_p7 = pnand %p5747_p6, %p5744_p4 }
  0x35   : > { %5752 = shalt.err (!%p5749_p7)
}
  0x36   : > { %s5753_s29 = scalar_lea.vmem %s487_s22, 128  ;;  %p5761_p5 = scmp.lt.s32.totalorder %s487_s22, %s487_s22 }
  0x37   : > { %p5754_p11 = scmp.ne.s32.totalorder %s487_s22, %s5753_s29  ;;  %p5762_p8 = scmp.lt.s32.totalorder %s5753_s29, %s5753_s29 }
  0x39   : > { %p5756_p12 = pnand %p5754_p11, %p6277_p2  ;;  %p5763_p10 = por %p5762_p8, %p5761_p5 }
  0x3b   : > { %p5757_p9 = pneg %p5756_p12 }
  0x3d   : > { %p5764_p0 = pnand %p5763_p10, %p5757_p9 }
  0x3f   : > { %5767 = shalt.err (!%p5764_p0)
}
  0x40   : > { %5457 = dma.hbm_to_vmem [thread:$0]  (!%p6255_p13), %s7209_s17, 128, %s487_s22, [#allocation5]  }
  0x41   : > { %s5423_s12 = smul.u32 3072, %s6080_s27  ;;  %s533_s16 = scalar_lea.vmem [#allocation9], %s5422_s21 }
  0x42   : > { %s540_s26 = sshll.u32 %s533_s16, 4  ;;  %s7211_s3 = sld [smem:[#allocation28_spill]]  ;;  %s6294_s26 = int_to_ptr.vmem [resolvable:$true] %s540_s26 }
  0x43   : > { %s6301_s8 = scalar_lea.sflag [#allocation5], %s529_s23  ;;  %p7212_p8 = scmp.ne.s32.totalorder %s7208_s0, 0 }
  0x45   : > { %p6307_p9 = pneg %p7212_p8 }
  0x48   : > { %s6299_s29 = scalar_lea.hbm %s7211_s3, %s5423_s12  ;;  %s5773_s14 = scalar_lea.hbm %s7211_s3, 6144 }
  0x49   : > { %s5768_s2 = scalar_lea.hbm %s6299_s29, 3072  ;;  %p5774_p1 = scmp.lt.u32.totalorder %s6299_s29, %s7211_s3 }
  0x4a   : > { %p5769_p5 = scmp.ne.s32.totalorder %s6299_s29, %s5768_s2  ;;  %p5775_p3 = scmp.lt.u32.totalorder %s5773_s14, %s5768_s2 }
  0x4b   : > { %p5777_p6 = scmp.lt.u32.totalorder %s5768_s2, %s6299_s29 }
  0x4c   : > { %p5771_p10 = pnand %p6307_p9, %p5769_p5  ;;  %p5776_p4 = por %p5775_p3, %p5774_p1 }
  0x4e   : > { %p5772_p0 = pneg %p5771_p10  ;;  %p5778_p7 = por %p5777_p6, %p5776_p4 }
  0x50   : > { %p5779_p11 = pnand %p5778_p7, %p5772_p0 }
  0x52   : > { %5782 = shalt.err (!%p5779_p11)
}
  0x53   : > { %s5783_s23 = scalar_lea.vmem %s6294_s26, 3072  ;;  %s6083_s18 = smov [#allocation9]  }
  0x54   : > { %p5784_p12 = scmp.ne.s32.totalorder %s6294_s26, %s5783_s23  ;;  %s5788_s4 = sshll.u32 %s6083_s18, 4  ;;  %s5789_s4 = int_to_ptr.vmem [resolvable:$false] %s5788_s4 }
  0x55   : > { %s5790_s21 = scalar_lea.vmem %s5789_s4, 6144  ;;  %p5791_p13 = scmp.lt.s32.totalorder %s6294_s26, %s5789_s4 }
  0x56   : > { %p5786_p5 = pnand %p5784_p12, %p6307_p9  ;;  %p5792_p2 = scmp.lt.s32.totalorder %s5790_s21, %s5783_s23 }
  0x58   : > { %p5787_p10 = pneg %p5786_p5  ;;  %p5793_p1 = por %p5792_p2, %p5791_p13 }
  0x5a   : > { %p5794_p3 = pnand %p5793_p1, %p5787_p10 }
  0x5c   : > { %5797 = shalt.err (!%p5794_p3)
}
  0x5d   : > { %s6084_s2 = smov 192   ;;  %s6085_s14 = smov 12  }
  0x5e   : > { %5467 = dma.hbm_to_vmem [thread:$0]  (!%p7212_p8), %s6299_s29, 3072, %s6294_s26, %s6301_s8, %s6084_s2, %s6084_s2, %s6085_s14  }
  0x5f   : > { %s4745_s12 = sshll.u32 %s6266_s30, 6  ;;  %s5084_s16 = sshll.u32 %s6080_s27, 10 }
  0x60   : > { %s7214_s5 = sld [smem:[#allocation30_spill]]  ;;  %s561_s21 = scalar_lea.vmem [#allocation10], %s4745_s12 }
  0x61   : > { %s568_s3 = sshll.u32 %s561_s21, 4  ;;  %s4748_s17 = sshll.u32 %s6080_s27, 4  ;;  %s6338_s3 = int_to_ptr.vmem [resolvable:$true] %s568_s3 }
  0x66   : > { %s6336_s23 = scalar_lea.hbm %s7214_s5, %s5084_s16  ;;  %s5803_s2 = scalar_lea.hbm %s7214_s5, 2048 }
  0x67   : > { %s5798_s7 = scalar_lea.hbm %s6336_s23, 1024  ;;  %p5804_p4 = scmp.lt.u32.totalorder %s6336_s23, %s7214_s5 }
  0x68   : > { %p5799_p13 = scmp.ne.s32.totalorder %s6336_s23, %s5798_s7  ;;  %p5805_p6 = scmp.lt.u32.totalorder %s5803_s2, %s5798_s7 }
  0x69   : > { %p5807_p11 = scmp.lt.u32.totalorder %s5798_s7, %s6336_s23 }
  0x6a   : > { %p5801_p2 = pnand %p5799_p13, %p6307_p9  ;;  %p5806_p7 = por %p5805_p6, %p5804_p4 }
  0x6c   : > { %p5802_p0 = pneg %p5801_p2  ;;  %p5808_p12 = por %p5807_p11, %p5806_p7 }
  0x6e   : > { %p5809_p5 = pnand %p5808_p12, %p5802_p0 }
  0x70   : > { %5812 = shalt.err (!%p5809_p5)
}
  0x71   : > { %s5813_s12 = scalar_lea.vmem %s6338_s3, 1024  ;;  %s6086_s18 = smov [#allocation10]  }
  0x72   : > { %p5814_p10 = scmp.ne.s32.totalorder %s6338_s3, %s5813_s12  ;;  %s5818_s4 = sshll.u32 %s6086_s18, 4  ;;  %s5819_s4 = int_to_ptr.vmem [resolvable:$false] %s5818_s4 }
  0x73   : > { %s5820_s21 = scalar_lea.vmem %s5819_s4, 2048  ;;  %p5821_p13 = scmp.lt.s32.totalorder %s6338_s3, %s5819_s4 }
  0x74   : > { %p5816_p1 = pnand %p5814_p10, %p6307_p9  ;;  %p5822_p2 = scmp.lt.s32.totalorder %s5820_s21, %s5813_s12 }
  0x76   : > { %p5817_p3 = pneg %p5816_p1  ;;  %p5823_p4 = por %p5822_p2, %p5821_p13 }
  0x78   : > { %p5824_p6 = pnand %p5823_p4, %p5817_p3 }
  0x7a   : > { %5827 = shalt.err (!%p5824_p6)
}
  0x7b   : > { %s7178_s7 = smov 64   ;;  %s7181_s26 = smov 4  }
  0x7c   : > { %5470 = dma.hbm_to_vmem [thread:$0]  (!%p7212_p8), %s6336_s23, 1024, %s6338_s3, %s6301_s8, %s7178_s7, %s7178_s7, %s7181_s26  }
  0x7d   : > { %s7215_s9 = sld [smem:[#allocation33_spill]]  ;;  %s599_s16 = scalar_lea.vmem [#allocation11], %s6266_s30 }
  0x7e   : > { %s606_s12 = sshll.u32 %s599_s16, 4  ;;  %s607_s12 = int_to_ptr.vmem [resolvable:$true] %s606_s12 }
  0x83   : > { %s6371_s14 = scalar_lea.hbm %s7215_s9, %s4748_s17  ;;  %s5833_s23 = scalar_lea.hbm %s7215_s9, 32 }
  0x84   : > { %s5828_s18 = scalar_lea.hbm %s6371_s14, 16  ;;  %p5834_p12 = scmp.lt.u32.totalorder %s6371_s14, %s7215_s9 }
  0x85   : > { %p5829_p0 = scmp.ne.s32.totalorder %s6371_s14, %s5828_s18  ;;  %p5835_p5 = scmp.lt.u32.totalorder %s5833_s23, %s5828_s18 }
  0x86   : > { %p5837_p1 = scmp.lt.u32.totalorder %s5828_s18, %s6371_s14 }
  0x87   : > { %p5831_p7 = pnand %p5829_p0, %p6307_p9  ;;  %p5836_p10 = por %p5835_p5, %p5834_p12 }
  0x89   : > { %p5832_p11 = pneg %p5831_p7  ;;  %p5838_p3 = por %p5837_p1, %p5836_p10 }
  0x8b   : > { %p5839_p13 = pnand %p5838_p3, %p5832_p11 }
  0x8d   : > { %5842 = shalt.err (!%p5839_p13)
}
  0x8e   : > { %s5843_s2 = scalar_lea.vmem %s607_s12, 16  ;;  %s6089_s16 = smov [#allocation11]  }
  0x8f   : > { %p5844_p2 = scmp.ne.s32.totalorder %s607_s12, %s5843_s2  ;;  %s5848_s7 = sshll.u32 %s6089_s16, 4  ;;  %s5849_s7 = int_to_ptr.vmem [resolvable:$false] %s5848_s7 }
  0x90   : > { %s5850_s4 = scalar_lea.vmem %s5849_s7, 32  ;;  %p5851_p0 = scmp.lt.s32.totalorder %s607_s12, %s5849_s7 }
  0x91   : > { %p5846_p4 = pnand %p5844_p2, %p6307_p9  ;;  %p5852_p7 = scmp.lt.s32.totalorder %s5850_s4, %s5843_s2 }
  0x93   : > { %p5847_p6 = pneg %p5846_p4  ;;  %p5853_p8 = por %p5852_p7, %p5851_p0 }
  0x95   : > { %p5854_p5 = pnand %p5853_p8, %p5847_p6 }
  0x97   : > { %5857 = shalt.err (!%p5854_p5)
}
  0x98   : > { %p7216_p12 = scmp.ne.s32.totalorder %s7208_s0, 0  ;;  %s7217_s10 = sld [smem:[#allocation34_spill]] }
  0x99   : > { %s616_s7 = scalar_lea.vmem [#allocation12], %s6266_s30 }
  0x9a   : > { %5473 = dma.hbm_to_vmem [thread:$0]  (!%p7216_p12), %s6371_s14, 16, %s607_s12, %s6301_s8  }
  0x9b   : > { %s623_s21 = sshll.u32 %s616_s7, 4  ;;  %s624_s21 = int_to_ptr.vmem [resolvable:$true] %s623_s21 }
  0x9e   : > { %s6397_s23 = scalar_lea.hbm %s7217_s10, %s4748_s17  ;;  %s5863_s12 = scalar_lea.hbm %s7217_s10, 32 }
  0x9f   : > { %s5858_s29 = scalar_lea.hbm %s6397_s23, 16  ;;  %p5864_p1 = scmp.lt.u32.totalorder %s6397_s23, %s7217_s10 }
  0xa0   : > { %p5859_p8 = scmp.ne.s32.totalorder %s6397_s23, %s5858_s29  ;;  %p5865_p3 = scmp.lt.u32.totalorder %s5863_s12, %s5858_s29 }
  0xa1   : > { %p5867_p2 = scmp.lt.u32.totalorder %s5858_s29, %s6397_s23 }
  0xa2   : > { %p5861_p11 = pnand %p5859_p8, %p6307_p9  ;;  %p5866_p13 = por %p5865_p3, %p5864_p1 }
  0xa4   : > { %p5862_p10 = pneg %p5861_p11  ;;  %p5868_p4 = por %p5867_p2, %p5866_p13 }
  0xa6   : > { %p5869_p6 = pnand %p5868_p4, %p5862_p10 }
  0xa8   : > { %5872 = shalt.err (!%p5869_p6)
}
  0xa9   : > { %s5873_s17 = scalar_lea.vmem %s624_s21, 16  ;;  %s6090_s18 = smov [#allocation12]  }
  0xaa   : > { %p5874_p0 = scmp.ne.s32.totalorder %s624_s21, %s5873_s17  ;;  %s5878_s3 = sshll.u32 %s6090_s18, 4  ;;  %s5879_s3 = int_to_ptr.vmem [resolvable:$false] %s5878_s3 }
  0xab   : > { %s5880_s7 = scalar_lea.vmem %s5879_s3, 32  ;;  %p5881_p8 = scmp.lt.s32.totalorder %s624_s21, %s5879_s3 }
  0xac   : > { %p5876_p7 = pnand %p5874_p0, %p6307_p9  ;;  %p5882_p11 = scmp.lt.s32.totalorder %s5880_s7, %s5873_s17 }
  0xae   : > { %p5877_p5 = pneg %p5876_p7  ;;  %p5883_p12 = por %p5882_p11, %p5881_p8 }
  0xb0   : > { %p5884_p1 = pnand %p5883_p12, %p5877_p5 }
  0xb2   : > { %5887 = shalt.err (!%p5884_p1)
}
  0xb3   : > { %p7218_p3 = scmp.ne.s32.totalorder %s7208_s0, 0  ;;  %s6091_s29 = smov [#allocation7]  }
  0xb4   : > { %s496_s2 = sshll.u32 %s6091_s29, 4  ;;  %s7183_s14 = sshll.u32 %s6266_s30, 10  ;;  %s497_s2 = int_to_ptr.vmem [resolvable:$true] %s496_s2 }
  0xb5   : > { %5476 = dma.hbm_to_vmem [thread:$0]  (!%p7218_p3), %s6397_s23, 16, %s624_s21, %s6301_s8  }
  0xb6   : > { %s7219_s4 = sld [smem:[#allocation26_spill]]  ;;  %p7220_p10 = scmp.ne.s32.totalorder %s7210_s19, 0 }
  0xbc   : > { %s5888_s18 = scalar_lea.hbm %s7219_s4, 128 }
  0xbd   : > { %p5889_p12 = scmp.ne.s32.totalorder %s7219_s4, %s5888_s18  ;;  %p5895_p4 = scmp.lt.u32.totalorder %s5888_s18, %s7219_s4 }
  0xbf   : > { %p5891_p13 = pnand %p5889_p12, %p7220_p10 }
  0xc1   : > { %p5892_p2 = pneg %p5891_p13 }
  0xc3   : > { %p5897_p6 = pnand %p5895_p4, %p5892_p2 }
  0xc5   : > { %5900 = shalt.err (!%p5897_p6)
}
  0xc6   : > { %s5901_s23 = scalar_lea.vmem %s497_s2, 128  ;;  %p5909_p8 = scmp.lt.s32.totalorder %s497_s2, %s497_s2 }
  0xc7   : > { %p5902_p0 = scmp.ne.s32.totalorder %s497_s2, %s5901_s23  ;;  %p5910_p11 = scmp.lt.s32.totalorder %s5901_s23, %s5901_s23 }
  0xc9   : > { %p5904_p7 = pnand %p5902_p0, %p7220_p10  ;;  %p5911_p1 = por %p5910_p11, %p5909_p8 }
  0xcb   : > { %p5905_p5 = pneg %p5904_p7 }
  0xcd   : > { %p5912_p3 = pnand %p5911_p1, %p5905_p5 }
  0xcf   : > { %5915 = shalt.err (!%p5912_p3)
}
  0xd0   : > { %p7221_p12 = scmp.ne.s32.totalorder %s7207_s24, 0  ;;  %s7222_s21 = smov 4  }
  0xd1   : > { %s7223_s29 = smov 64   ;;  %s5085_s16 = sshll.u32 %s6080_s27, 14 }
  0xd2   : > { %5460 = dma.hbm_to_vmem [thread:$0]  (!%p7221_p12), %s7219_s4, 128, %s497_s2, [#allocation8], %s7223_s29, %s7223_s29, %s7222_s21  }
  0xd3   : > { %s634_s18 = scalar_lea.vmem [#allocation13], %s7183_s14  ;;  %s7224_s11 = sld [smem:[#allocation35_spill]] }
  0xd4   : > { %s641_s3 = sshll.u32 %s634_s18, 4  ;;  %s6450_s3 = int_to_ptr.vmem [resolvable:$true] %s641_s3 }
  0xd9   : > { %s6448_s23 = scalar_lea.hbm %s7224_s11, %s5085_s16  ;;  %s5921_s18 = scalar_lea.hbm %s7224_s11, 32768 }
  0xda   : > { %s5916_s26 = scalar_lea.hbm %s6448_s23, 16384  ;;  %p5922_p4 = scmp.lt.u32.totalorder %s6448_s23, %s7224_s11 }
  0xdb   : > { %p5917_p3 = scmp.ne.s32.totalorder %s6448_s23, %s5916_s26  ;;  %p5923_p6 = scmp.lt.u32.totalorder %s5921_s18, %s5916_s26 }
  0xdc   : > { %p5925_p7 = scmp.lt.u32.totalorder %s5916_s26, %s6448_s23 }
  0xdd   : > { %p5919_p13 = pnand %p5917_p3, %p6307_p9  ;;  %p5924_p0 = por %p5923_p6, %p5922_p4 }
  0xdf   : > { %p5920_p2 = pneg %p5919_p13  ;;  %p5926_p5 = por %p5925_p7, %p5924_p0 }
  0xe1   : > { %p5927_p8 = pnand %p5926_p5, %p5920_p2 }
  0xe3   : > { %5930 = shalt.err (!%p5927_p8)
}
  0xe4   : > { %s5931_s17 = scalar_lea.vmem %s6450_s3, 16384  ;;  %s6092_s7 = smov [#allocation13]  }
  0xe5   : > { %p5932_p11 = scmp.ne.s32.totalorder %s6450_s3, %s5931_s17  ;;  %s5936_s2 = sshll.u32 %s6092_s7, 4  ;;  %s5937_s2 = int_to_ptr.vmem [resolvable:$false] %s5936_s2 }
  0xe6   : > { %s5938_s14 = scalar_lea.vmem %s5937_s2, 32768  ;;  %p5939_p13 = scmp.lt.s32.totalorder %s6450_s3, %s5937_s2 }
  0xe7   : > { %p5934_p1 = pnand %p5932_p11, %p6307_p9  ;;  %p5940_p12 = scmp.lt.s32.totalorder %s5938_s14, %s5931_s17 }
  0xe9   : > { %p5935_p3 = pneg %p5934_p1  ;;  %p5941_p4 = por %p5940_p12, %p5939_p13 }
  0xeb   : > { %p5942_p6 = pnand %p5941_p4, %p5935_p3 }
  0xed   : > { %5945 = shalt.err (!%p5942_p6)
}
  0xee   : > { %s6093_s4 = smov 1024   ;;  %p7225_p2 = scmp.ne.s32.totalorder %s7208_s0, 0 }
  0xef   : > { %s6094_s26 = smov [#allocation15]   ;;  %s7226_s13 = sld [smem:[#allocation37_spill]] }
  0xf0   : > { %5479 = dma.hbm_to_vmem [thread:$0]  (!%p7225_p2), %s6448_s23, 16384, %s6450_s3, %s6301_s8, %s6093_s4, %s6093_s4, %s7223_s29  }
  0xf1   : > { %s512_s12 = sshll.u32 %s6094_s26, 4  ;;  %s5946_s5 = scalar_lea.hbm %s7160_s15, 1024  ;;  %s513_s12 = int_to_ptr.vmem [resolvable:$true] %s512_s12 }
  0xf2   : > { %p5947_p12 = scmp.ne.s32.totalorder %s7160_s15, %s5946_s5  ;;  %p5953_p5 = scmp.lt.u32.totalorder %s5946_s5, %s7160_s15 }
  0xf4   : > { %p5949_p0 = pnand %p5947_p12, %p7220_p10 }
  0xf5   : > { %s6480_s17 = scalar_lea.hbm %s7226_s13, %s5085_s16 }
  0xf6   : > { %p5950_p7 = pneg %p5949_p0 }
  0xf8   : > { %p5955_p8 = pnand %p5953_p5, %p5950_p7 }
  0xfa   : > { %5958 = shalt.err (!%p5955_p8)
}
  0xfb   : > { %s5959_s27 = scalar_lea.vmem %s513_s12, 1024  ;;  %p5967_p13 = scmp.lt.s32.totalorder %s513_s12, %s513_s12 }
  0xfc   : > { %p5960_p11 = scmp.ne.s32.totalorder %s513_s12, %s5959_s27  ;;  %p5968_p4 = scmp.lt.s32.totalorder %s5959_s27, %s5959_s27 }
  0xfe   : > { %p5962_p1 = pnand %p5960_p11, %p7220_p10  ;;  %p5969_p6 = por %p5968_p4, %p5967_p13 }
 0x100   : > { %p5963_p3 = pneg %p5962_p1 }
 0x102   : > { %p5970_p2 = pnand %p5969_p6, %p5963_p3 }
 0x104   : > { %5973 = shalt.err (!%p5970_p2)
}
 0x105   : > { %p7227_p12 = scmp.ne.s32.totalorder %s7207_s24, 0  ;;  %s7228_s10 = sshll.u32 %s6266_s30, 10 }
 0x106   : > { %s662_s19 = scalar_lea.vmem [#allocation14], %s7228_s10  ;;  %s5974_s4 = scalar_lea.hbm %s6480_s17, 16384 }
 0x107   : > { %5463 = dma.hbm_to_vmem [thread:$0]  (!%p7227_p12), %s7160_s15, 1024, %s513_s12, [#allocation8], %s7223_s29, %s7223_s29, %s7222_s21  }
 0x108   : > { %s669_s16 = sshll.u32 %s662_s19, 4  ;;  %p5975_p10 = scmp.ne.s32.totalorder %s6480_s17, %s5974_s4  ;;  %s6505_s16 = int_to_ptr.vmem [resolvable:$true] %s669_s16 }
 0x109   : > { %s5979_s18 = scalar_lea.hbm %s7226_s13, 32768  ;;  %p5980_p7 = scmp.lt.u32.totalorder %s6480_s17, %s7226_s13 }
 0x10a   : > { %p5977_p2 = pnand %p5975_p10, %p6307_p9  ;;  %p5981_p5 = scmp.lt.u32.totalorder %s5979_s18, %s5974_s4 }
 0x10b   : > { %p5983_p11 = scmp.lt.u32.totalorder %s5974_s4, %s6480_s17 }
 0x10c   : > { %p5978_p0 = pneg %p5977_p2  ;;  %p5982_p8 = por %p5981_p5, %p5980_p7 }
 0x10e   : > { %p5984_p1 = por %p5983_p11, %p5982_p8 }
 0x110   : > { %p5985_p3 = pnand %p5984_p1, %p5978_p0 }
 0x112   : > { %5988 = shalt.err (!%p5985_p3)
}
 0x113   : > { %s5989_s30 = scalar_lea.vmem %s6505_s16, 16384  ;;  %s6095_s12 = smov [#allocation14]  }
 0x114   : > { %p5990_p13 = scmp.ne.s32.totalorder %s6505_s16, %s5989_s30  ;;  %s5994_s14 = sshll.u32 %s6095_s12, 4  ;;  %s5995_s14 = int_to_ptr.vmem [resolvable:$false] %s5994_s14 }
 0x115   : > { %s5996_s3 = scalar_lea.vmem %s5995_s14, 32768  ;;  %p5997_p12 = scmp.lt.s32.totalorder %s6505_s16, %s5995_s14 }
 0x116   : > { %p5992_p4 = pnand %p5990_p13, %p6307_p9  ;;  %p5998_p10 = scmp.lt.s32.totalorder %s5996_s3, %s5989_s30 }
 0x118   : > { %p5993_p6 = pneg %p5992_p4  ;;  %p5999_p2 = por %p5998_p10, %p5997_p12 }
 0x11a   : > { %p6000_p7 = pnand %p5999_p2, %p5993_p6 }
 0x11c   : > { %6003 = shalt.err (!%p6000_p7)
}
 0x11d   : > { %p7229_p0 = scmp.ne.s32.totalorder %s7208_s0, 0  ;;  %p7230_p9 = scmp.ne.s32.totalorder %s7206_s20, 0 }
 0x11e   : > { %p7231_p5 = scmp.eq.s32.totalorder (!%p7230_p9), %s6216_s28, 0 }
 0x11f   : > { %5482 = dma.hbm_to_vmem [thread:$0]  (!%p7229_p0), %s6480_s17, 16384, %s6505_s16, %s6301_s8, %s7223_s29, %s7223_s29, %s7222_s21  }
 0x120   : > { %687 = sbr.rel (%p7230_p9) target bundleno = 3526 (0xdc6), region = 88 }
 0x127   : > { %6047 = dma.done.wait (%p7231_p5), [#allocation5], 128   ;;  %p7232_p8 = pmov %p7231_p5 }
 0x128   : > { %p7233_p11 = pmov %p7231_p5 }
 0x129   : > { %6049 = vsyncadd (%p7232_p8), [#allocation5], 4294967168 }
 0x12a   : > { %6051 = dma.done.wait (%p7233_p11), [#allocation8], 128   ;;  %p7234_p1 = pmov %p7231_p5 }
 0x12b   : > { %s697_s0 = sand.u32 1, %s6216_s28   ;;  %s6544_s8 = sand.u32 1, %s6072_s25  }
 0x12c   : > { %6053 = vsyncadd (%p7234_p1), [#allocation8], 4294967168  ;;  %s5424_s20 = smul.u32 192, %s6544_s8  ;;  %s698_s22 = scalar_lea.sflag [#allocation5], %s697_s0 }
 0x12d   : > { %p7235_p3 = scmp.ne.s32.totalorder %s7205_s1, 0 }
 0x12e   : > { %s6547_s21 = scalar_lea.vmem [#allocation9], %s5424_s20 }
 0x12f   : > { %6055 = dma.done.wait (%p7235_p3), %s698_s22, 36896  }
 0x130   : > { %6057 = vsyncadd (%p7235_p3), %s698_s22, 4294930400  ;;  %s4759_s29 = sshll.u32 %s6544_s8, 6  ;;  %s4760_s17 = sshll.u32 %s6544_s8, 10 }
 0x131   : > { %s6555_s23 = scalar_lea.vmem [#allocation10], %s4759_s29  ;;  %s6559_s5 = scalar_lea.vmem [#allocation13], %s4760_s17 }
 0x132   : > { %s6561_s10 = scalar_lea.vmem [#allocation14], %s4760_s17  ;;  %p7236_p13 = pmov %p7234_p1 }
 0x133   : > { %p7237_p4 = pmov %p7234_p1 }
 0x134   : > { %6059 = dma.done.wait (%p7236_p13), [#allocation8], 1024  }
 0x135   : > { %6061 = vsyncadd (%p7237_p4), [#allocation8], 4294966272  ;;  %p837_p6 = scmp.lt.s32.totalorder %s6216_s28, 1  ;;  %s7238_s7 = sld [smem:[#allocation31_spill]] }
 0x136   : > { %s7239_s14 = sld [smem:[#allocation32_spill]]  ;;  %s7240_s22 = sld [smem:[#allocation29_spill]] }
 0x137   : > { %s6569_s1 = scalar_select %p837_p6, %s6216_s28, 1 }
 0x138   : > { %s7241_s11 = sld [smem:[#allocation36_spill]]  ;;  %s7242_s24 = sld [smem:[#allocation38_spill]] }
 0x139   : > { %s5425_s19 = smul.u32 3, %s6569_s1  ;;  %s4763_s17 = sshll.u32 %s6569_s1, 4 }
 0x13a   : > { %p7243_p12 = scmp.ne.s32.totalorder %s6216_s28, 0 }
 0x13b   : > { %s846_s2 = scalar_lea.vmem %s7238_s7, %s6569_s1  ;;  %v5543_v0 = vld [vmem:[#allocation7] sm:$0xff] (!%p7243_p12)   ;;  %v6096_v1 = vmov (!%p7243_p12), 0.0   ;;  %v862_v2 = vld [vmem:[#allocation4] sm:$0xff] (!%p7243_p12)  ;;  %vm6097_vm0 = vmmov (!%p7243_p12), 0   ;;  %vm879_vm1 = vcmask (!%p7243_p12), 130048   ;;  %s7244_s9 = sld [smem:[#allocation27_spill]] (!%p7243_p12) }
 0x13c   : > { %s849_s3 = scalar_lea.vmem %s7239_s14, %s6569_s1  ;;  %s6587_s29 = scalar_lea.vmem %s7240_s22, %s5425_s19  ;;  %5308 = vmatprep.subr.bf16.mxu0 (!%p7243_p12), %v6096_v1  ;;  %5310 = vmatprep.mubr.msk.bf16.mxu0 (!%p7243_p12), %vm6097_vm0, %v6096_v1  ;;  %v863_v3 = vpack.c.bf16 (!%p7243_p12), %v862_v2, %v862_v2 }
 0x13d   : > { %861 = sbr.rel (%p7243_p12) target bundleno = 535 (0x217), region = 128  ;;  %5309 = vmatpush3.bf16.msra.mxu0 (!%p7243_p12), %v5543_v0 }
 0x13e   : > { %s6593_s13 = scalar_lea.vmem %s7241_s11, %s4763_s17  ;;  %s856_s26 = scalar_lea.vmem %s7242_s24, %s6569_s1 }
 0x140   : > { %5311 = vmatmul.mubr.msk.bf16.vlgmr.msra.gmra.mrb[0].mxu0 (!%p7243_p12), %vm879_vm1, %v863_v3 }
 0x141   : > { %v4765_v4 = vld [vmem:[%s7244_s9] ss:$0 sm:$0xff] (!%p7243_p12) }
 0x213   : > { %v917_v5 = vpop.f32.mrb[0].mxu0 }
 0x214   : > { %v918_v6 = vadd.f32 %v4765_v4, %v917_v5  ;;  %v5312_v7 = vpop.f32.mrb[1].mxu0 }
 0x215   : > { %v920_v8 = vpop.f32.mrb[2].mxu0 }
 0x216   : > { %923 = vst [vmem:[#allocation2] sm:$0xff] %v918_v6  ;;  %v5313_v9 = vpop.f32.mrb[3].mxu0 }
 0x217 PF: > { %v5544_v10 = vld [vmem:[%s6547_s21 + $0x4] ss:$12 sps:$4 sm:$0xff]   ;;  %v5546_v11 = vld [vmem:[%s6547_s21] ss:$12 sps:$4 sm:$0xff]   ;;  %v6098_v12 = vmov 0   ;;  %v6099_v13 = vmov 0.0   ;;  %v960_v38 = vlaneseq  ;;  %s7245_s7 = scalar_lea.vmem %s7151_s6, %s6569_s1 }
 0x218   : > { %1135 = vmatprep.mubr.bf16.mxu0 %v6098_v12  ;;  %5314 = vmatprep.subr.bf16.mxu1 %v6099_v13  ;;  %v5547_v14 = vld [vmem:[%s6547_s21 + $0x1c] ss:$12 sps:$4 sm:$0xff]   ;;  %v5549_v15 = vld [vmem:[%s6547_s21 + $0x18] ss:$12 sps:$4 sm:$0xff]   ;;  %v5550_v16 = vld [vmem:[%s6547_s21 + $0x34] ss:$12 sps:$4 sm:$0xff]  }
 0x219   : > { %1103 = vmatprep.subr.bf16.mxu0 %v5544_v10  ;;  %v5552_v17 = vld [vmem:[%s6547_s21 + $0x30] ss:$12 sps:$4 sm:$0xff]   ;;  %v5553_v18 = vld [vmem:[%s6547_s21 + $0x4c] ss:$12 sps:$4 sm:$0xff]   ;;  %v5555_v19 = vld [vmem:[%s6547_s21 + $0x48] ss:$12 sps:$4 sm:$0xff]  }
 0x21a   : > { %1104 = vmatpush1.bf16.msra.mxu0 %v5546_v11  ;;  %v5568_v20 = vld [vmem:[%s6547_s21 + $0x8] ss:$12 sps:$4 sm:$0xff]   ;;  %v5556_v21 = vld [vmem:[%s6547_s21 + $0x64] ss:$12 sps:$4 sm:$0xff]   ;;  %v5569_v22 = vld [vmem:[%s6547_s21 + $0x20] ss:$12 sps:$4 sm:$0xff]  }
 0x21b   : > { %1105 = vmatprep.subr.bf16.mxu0 %v5547_v14  ;;  %5315 = vmatpush3.bf16.msra.mxu1 %v5568_v20  ;;  %v5558_v23 = vld [vmem:[%s6547_s21 + $0x60] ss:$12 sps:$4 sm:$0xff]   ;;  %v5559_v24 = vld [vmem:[%s6547_s21 + $0x7c] ss:$12 sps:$4 sm:$0xff]   ;;  %v5561_v25 = vld [vmem:[%s6547_s21 + $0x78] ss:$12 sps:$4 sm:$0xff]  }
 0x21c   : > { %5316 = vmatprep.subr.bf16.mxu1 %v6099_v13  ;;  %v5570_v26 = vld [vmem:[%s6547_s21 + $0x38] ss:$12 sps:$4 sm:$0xff]   ;;  %v5562_v27 = vld [vmem:[%s6547_s21 + $0x94] ss:$12 sps:$4 sm:$0xff]   ;;  %v5571_v28 = vld [vmem:[%s6547_s21 + $0x50] ss:$12 sps:$4 sm:$0xff]  }
 0x21d   : > { %v5564_v29 = vld [vmem:[%s6547_s21 + $0x90] ss:$12 sps:$4 sm:$0xff]   ;;  %v5565_v30 = vld [vmem:[%s6547_s21 + $0xac] ss:$12 sps:$4 sm:$0xff]   ;;  %v5572_v31 = vld [vmem:[%s6547_s21 + $0x68] ss:$12 sps:$4 sm:$0xff]  }
 0x21e   : > { %1106 = vmatpush1.bf16.msra.mxu0 %v5549_v15  ;;  %v5567_v32 = vld [vmem:[%s6547_s21 + $0xa8] ss:$12 sps:$4 sm:$0xff]   ;;  %v6630_v33 = vld [vmem:[#allocation2] sm:$0xff]  ;;  %v5575_v37 = vld [vmem:[%s6547_s21 + $0xb0] ss:$12 sps:$4 sm:$0xff]   ;;  %vm6100_vm2 = vmmov 0  }
 0x21f   : > { %1107 = vmatprep.subr.bf16.mxu0 %v5550_v16  ;;  %5317 = vmatpush3.bf16.msra.mxu1 %v5569_v22  ;;  %v5573_v34 = vld [vmem:[%s6547_s21 + $0x80] ss:$12 sps:$4 sm:$0xff]   ;;  %v925_v35 = vpack.c.bf16 %v6630_v33, %v6630_v33  ;;  %v5574_v36 = vld [vmem:[%s6547_s21 + $0x98] ss:$12 sps:$4 sm:$0xff]   ;;  %v6649_v39 = vshrl.u32 %v960_v38, 7  ;;  %vm1188_vm3 = vcmask 261120  }
 0x220   : > { %5318 = vmatprep.subr.bf16.mxu1 %v6099_v13  ;;  %5330 = vmatprep.mubr.msk.bf16.mxu1 %vm6100_vm2, %v6099_v13  ;;  %v958_v41 = vld [vmem:[%s6587_s29] sm:$0x7]  ;;  %s6101_s21 = smov 96   ;;  %s6102_s19 = smov 64   ;;  %vm1246_vm4 = vcmask 1043456   ;;  %vm1235_vm5 = vcmask 64512  }
 0x221   : > { %v6652_v40 = vsub.s32 0, %v6649_v39  ;;  %v6656_v42 = vsub.s32 1, %v6649_v39  ;;  %s6103_s24 = smov 32   ;;  %v6671_v55 = vsub.s32 2, %v6649_v39  ;;  %vm1413_vm6 = vcmask 523520   ;;  %s7249_s1 = scalar_lea.vmem [#allocation11], %s6544_s8 }
 0x222   : > { %1108 = vmatpush1.bf16.msra.mxu0 %v5552_v17  ;;  %vm1529_vm7 = vcmask 785920   ;;  %vm1645_vm8 = vcmask 1048320   ;;  %p5070_p10 = scmp.ne.s32.totalorder %s6216_s28, 1 }
 0x223   : > { %1109 = vmatprep.subr.bf16.mxu0 %v5553_v18  ;;  %5319 = vmatpush3.bf16.msra.mxu1 %v5570_v26  ;;  %v963_v43 = vrot.slane %v958_v41, %v6652_v40  ;;  %v967_v44 = vrot.slane %v958_v41, %v6656_v42  ;;  %v971_v56 = vrot.slane %v958_v41, %v6671_v55  ;;  %vm6105_vm9 = vmmov (!%p5070_p10), 0   ;;  %s7251_s29 = sld [smem:[#allocation39_spill]] (!%p5070_p10) }
 0x224   : > { %5320 = vmatprep.subr.bf16.mxu1 %v6099_v13 }
 0x226   : > { %1110 = vmatpush1.bf16.msra.mxu0 %v5555_v19 }
 0x227   : > { %1111 = vmatprep.subr.bf16.mxu0 %v5556_v21  ;;  %5321 = vmatpush3.bf16.msra.mxu1 %v5571_v28 }
 0x228   : > { %5322 = vmatprep.subr.bf16.mxu1 %v6099_v13 }
 0x22a   : > { %1112 = vmatpush1.bf16.msra.mxu0 %v5558_v23 }
 0x22b   : > { %1113 = vmatprep.subr.bf16.mxu0 %v5559_v24  ;;  %5323 = vmatpush3.bf16.msra.mxu1 %v5572_v31 }
 0x22c   : > { %5324 = vmatprep.subr.bf16.mxu1 %v6099_v13 }
 0x22e   : > { %1114 = vmatpush1.bf16.msra.mxu0 %v5561_v25 }
 0x22f   : > { %1115 = vmatprep.subr.bf16.mxu0 %v5562_v27  ;;  %5325 = vmatpush3.bf16.msra.mxu1 %v5573_v34 }
 0x230   : > { %5326 = vmatprep.subr.bf16.mxu1 %v6099_v13 }
 0x232   : > { %1116 = vmatpush1.bf16.msra.mxu0 %v5564_v29 }
 0x233   : > { %1117 = vmatprep.subr.bf16.mxu0 %v5565_v30  ;;  %5327 = vmatpush3.bf16.msra.mxu1 %v5574_v36 }
 0x234   : > { %5328 = vmatprep.subr.bf16.mxu1 %v6099_v13 }
 0x236   : > { %1118 = vmatpush1.bf16.msra.mxu0 %v5567_v32 }
 0x237   : > { %5358 = vmatprep.subr.bf16.mxu0 %v6099_v13  ;;  %5329 = vmatpush3.bf16.msra.mxu1 %v5575_v37 }
 0x238   : > { %5334 = vmatprep.subr.bf16.mxu1 %v6099_v13 }
 0x239   : > { %1136 = vmatmul.mubr.bf16.vlgmr.msra.gmra.mrb[0].mxu0 %v925_v35 }
 0x23a   : > { %5360 = vmatprep.mubr.msk.bf16.mxu0 %vm6100_vm2, %v6099_v13  ;;  %5331 = vmatmul.mubr.bf16.vlgmr.msra.gmra.mrb[0].mxu1 %v925_v35 }
 0x23b   : > { %5336 = vmatprep.mubr.msk.bf16.mxu1 %vm6100_vm2, %v6099_v13 }
 0x30c   : > { %v1137_v45 = vpop.f32.mrb[0].mxu0 }
 0x30d   : > { %v1138_v46 = vadd.f32 %v1137_v45, %v963_v43  ;;  %v1139_v47 = vpop.f32.mrb[1].mxu0  ;;  %v1178_v57 = vpop.f32.mrb[0].mxu1 }
 0x30e   : > { %v1140_v48 = vadd.f32 %v1139_v47, %v967_v44  ;;  %v1141_v49 = vpop.f32.mrb[2].mxu0  ;;  %v1179_v58 = vadd.f32 %v1178_v57, %v971_v56  ;;  %v5332_v59 = vpop.f32.mrb[1].mxu1 }
 0x30f   : > { %v1184_v50 = vmul.f32 0.17677669, %v1138_v46  ;;  %v1142_v51 = vpop.f32.mrb[3].mxu0  ;;  %v1181_v60 = vpop.f32.mrb[2].mxu1 }
 0x310   : > { %v1186_v52 = vpack.c.bf16 %v1140_v48, %v1140_v48  ;;  %v6674_v61 = vpack.c.bf16 %v1179_v58, %v1179_v58  ;;  %v5333_v62 = vpop.f32.mrb[3].mxu1 }
 0x311   : > { %v1185_v53 = vpack.c.bf16 %v1184_v50, %v1184_v50 }
 0x312   : > { %v1193_v54 = vsel %vm1188_vm3, %v1186_v52, 0  ;;  %v1248_v63 = vsel %vm1246_vm4, %v6674_v61, 0 }
 0x313   : > { %5335 = vmatpush3.bf16.xpose.msra.mxu1 %v1193_v54  ;;  %1297 = vrot.lane.b32.xlu1 %v1185_v53, %s6101_s21 }
 0x314   : > { %5340 = vmatprep.subr.bf16.mxu1 %v6099_v13 }
 0x317   : > { %1417 = vrot.lane.b32.xlu1 %v1186_v52, %s6102_s19 }
 0x31a   : > { %5337 = vmatmul.mubr.msk.bf16.vlgmr.msra.gmra.mrb[4].mxu1 %vm1188_vm3, %v1185_v53 }
 0x31b   : > { %1415 = vrot.lane.b32.xlu1 %v1185_v53, %s6102_s19  ;;  %5342 = vmatprep.mubr.msk.bf16.mxu1 %vm6100_vm2, %v6099_v13 }
 0x31c   : > { %5341 = vmatpush3.bf16.msra.mxu1 %v1248_v63 }
 0x31d   : > { %5346 = vmatprep.subr.bf16.mxu1 %v6099_v13 }
 0x31f   : > { %1533 = vrot.lane.b32.xlu1 %v1186_v52, %s6103_s24 }
 0x323   : > { %1531 = vrot.lane.b32.xlu1 %v1185_v53, %s6103_s24 }
 0x385   : > { %v1298_v0 = vpop.permute.xlu1 %1297 }
 0x389   : > { %v1418_v1 = vpop.permute.xlu1 %1417 }
 0x38a   : > { %v1423_v2 = vsel %vm1188_vm3, %v1418_v1, 0 }
 0x38b   : > { %5359 = vmatpush3.bf16.xpose.msra.mxu0 %v1423_v2 }
 0x38c   : > { %5370 = vmatprep.subr.bf16.mxu0 %v6099_v13 }
 0x38d   : > { %v1416_v3 = vpop.permute.xlu1 %1415 }
 0x391   : > { %v1534_v4 = vpop.permute.xlu1 %1533 }
 0x392   : > { %v1539_v5 = vsel %vm1188_vm3, %v1534_v4, 0  ;;  %5361 = vmatmul.mubr.msk.bf16.vlgmr.msra.gmra.mrb[4].mxu0 %vm1188_vm3, %v1416_v3 }
 0x393   : > { %5371 = vmatpush3.bf16.xpose.msra.mxu0 %v1539_v5  ;;  %5372 = vmatprep.mubr.msk.bf16.mxu0 %vm6100_vm2, %v6099_v13 }
 0x394   : > { %5382 = vmatprep.subr.bf16.mxu0 %v6099_v13 }
 0x395   : > { %v1532_v6 = vpop.permute.xlu1 %1531 }
 0x39a   : > { %5373 = vmatmul.mubr.msk.bf16.vlgmr.msra.gmra.mrb[8].mxu0 %vm1188_vm3, %v1532_v6  ;;  %v5576_v6 = vld [vmem:[%s6555_s23] sm:$0xff]  }
 0x39b   : > { %5398 = vmatprep.mubr.msk.bf16.mxu0 %vm6100_vm2, %v6099_v13  ;;  %5383 = vmatpush3.bf16.msra.mxu0 %v5576_v6  ;;  %v1830_v6 = vld [vmem:[%s6559_s5 + $0x140] sm:$0xff] }
 0x39c   : > { %5384 = vmatprep.subr.bf16.mxu0 %v6099_v13 }
 0x3ed   : > { %v1229_v7 = vpop.f32.mrb[4].mxu1 }
 0x3ee   : > { %v5338_v8 = vpop.f32.mrb[5].mxu1  ;;  %v1236_v9 = vsel %vm1235_vm5, %v1229_v7, -inf }
 0x3ef   : > { %1237 = vmax.xlane.f32.xlu0 %v1236_v9  ;;  %v1232_v10 = vpop.f32.mrb[6].mxu1 }
 0x3f0   : > { %v5339_v11 = vpop.f32.mrb[7].mxu1 }
 0x405   : > { %1300 = vrot.lane.b32.xlu0 %v1186_v52, %s6101_s21 }
 0x465   : > { %v1459_v14 = vpop.f32.mrb[4].mxu0 }
 0x466   : > { %v5362_v15 = vpop.f32.mrb[5].mxu0  ;;  %v1465_v16 = vsel %vm1235_vm5, %v1459_v14, -inf }
 0x467   : > { %v1462_v17 = vpop.f32.mrb[6].mxu0  ;;  %1466 = vmax.xlane.f32.xlu0 %v1465_v16  ;;  %v5578_v15 = vld [vmem:[%s6555_s23 + $0x10] sm:$0xff]   ;;  %v5579_v16 = vld [vmem:[%s6555_s23 + $0x18] sm:$0xff]  }
 0x468   : > { %v5363_v18 = vpop.f32.mrb[7].mxu0 }
 0x469   : > { %v5580_v18 = vld [vmem:[%s6555_s23 + $0x20] sm:$0xff]  }
 0x46d   : > { %v1575_v19 = vpop.f32.mrb[8].mxu0 }
 0x46e   : > { %v5374_v20 = vpop.f32.mrb[9].mxu0  ;;  %v1581_v21 = vsel %vm1235_vm5, %v1575_v19, -inf }
 0x46f   : > { %1582 = vmax.xlane.f32.xlu1 %v1581_v21  ;;  %v1578_v22 = vpop.f32.mrb[10].mxu0  ;;  %v5581_v21 = vld [vmem:[%s6555_s23 + $0x28] sm:$0xff]  }
 0x470   : > { %v5375_v23 = vpop.f32.mrb[11].mxu0 }
 0x47c   : > { %v1238_v24 = vpop.xlane.xlu0 %1237 }
 0x47d   : > { %v1239_v25 = vsub.f32 %v1229_v7, %v1238_v24  ;;  %1356 = vrot.lane.b32.xlu0 %v6674_v61, %s6101_s21  ;;  %v5577_v7 = vld [vmem:[%s6555_s23 + $0x8] sm:$0xff]  }
 0x47e   : > { %5385 = vmatpush3.bf16.msra.mxu0 %v5577_v7  ;;  %v1823_v7 = vld [vmem:[%s6559_s5 + $0x108] sm:$0xff] }
 0x47f   : > { %v1240_v26 = vmul.f32 1.442695, %v1239_v25  ;;  %5386 = vmatprep.subr.bf16.mxu0 %v6099_v13 }
 0x480   : > { %v1301_v28 = vpop.permute.xlu0 %1300 }
 0x481   : > { %5712 = vpow2.f32 %v1240_v26  ;;  %v1306_v30 = vsel %vm1188_vm3, %v1301_v28, 0  ;;  %v5582_v26 = vld [vmem:[%s6555_s23 + $0x30] sm:$0xff]  }
 0x482   : > { %5387 = vmatpush3.bf16.msra.mxu0 %v5578_v15 }
 0x483   : > { %5388 = vmatprep.subr.bf16.mxu0 %v6099_v13 }
 0x486   : > { %5389 = vmatpush3.bf16.msra.mxu0 %v5579_v16 }
 0x487   : > { %5390 = vmatprep.subr.bf16.mxu0 %v6099_v13 }
 0x48a   : > { %5391 = vmatpush3.bf16.msra.mxu0 %v5580_v18 }
 0x48b   : > { %v5713_v27 = vpop.eup %5712  ;;  %5392 = vmatprep.subr.bf16.mxu0 %v6099_v13 }
 0x48c   : > { %v1242_v29 = vpack.c.bf16 %v5713_v27, %v5713_v27  ;;  %v1290_v2 = vsel %vm1235_vm5, %v5713_v27, 0.0 }
 0x48e   : > { %5343 = vmatmul.mubr.msk.bf16.vlgmr.msra.gmra.mrb[8].mxu1 %vm1235_vm5, %v1242_v29  ;;  %5393 = vmatpush3.bf16.msra.mxu0 %v5581_v21  ;;  %v5583_v29 = vld [vmem:[%s6555_s23 + $0x38] sm:$0xff]   ;;  %v1838_v21 = vld [vmem:[%s6559_s5 + $0x180] sm:$0xff] }
 0x48f   : > { %5347 = vmatpush3.bf16.xpose.msra.mxu1 %v1306_v30  ;;  %5348 = vmatprep.mubr.msk.bf16.mxu1 %vm6100_vm2, %v6099_v13 }
 0x490   : > { %5352 = vmatprep.subr.bf16.mxu1 %v6099_v13  ;;  %5394 = vmatprep.subr.bf16.mxu0 %v6099_v13 }
 0x492   : > { %5395 = vmatpush3.bf16.msra.mxu0 %v5582_v26 }
 0x493   : > { %5396 = vmatprep.subr.bf16.mxu0 %v6099_v13 }
 0x496   : > { %5349 = vmatmul.mubr.msk.bf16.vlgmr.msra.gmra.mrb[12].mxu1 %vm1188_vm3, %v1298_v0  ;;  %5397 = vmatpush3.bf16.msra.mxu0 %v5583_v29  ;;  %v1854_v29 = vld [vmem:[%s6559_s5 + $0x200] sm:$0xff] }
 0x497   : > { %5354 = vmatprep.mubr.msk.bf16.mxu1 %vm6100_vm2, %v6099_v13 }
 0x4f4   : > { %v1467_v31 = vpop.xlane.xlu0 %1466 }
 0x4f5   : > { %v1468_v32 = vsub.f32 %v1459_v14, %v1467_v31 }
 0x4f7   : > { %v1469_v48 = vmul.f32 1.442695, %v1468_v32 }
 0x4f8   : > { %v1357_v34 = vpop.permute.xlu0 %1356 }
 0x4f9   : > { %v1362_v35 = vsel %vm1246_vm4, %v1357_v34, 0  ;;  %5714 = vpow2.f32 %v1469_v48  ;;  %v4800_v48 = vld [vmem:[%s7245_s7] ss:$0 sm:$0xff] }
 0x4fa   : > { %5353 = vmatpush3.bf16.msra.mxu1 %v1362_v35 }
 0x4fb   : > { %5364 = vmatprep.subr.bf16.mxu1 %v6099_v13 }
 0x4fc   : > { %v1583_v51 = vpop.xlane.xlu1 %1582 }
 0x4fd   : > { %v1584_v52 = vsub.f32 %v1575_v19, %v1583_v51 }
 0x4ff   : > { %v1585_v56 = vmul.f32 1.442695, %v1584_v52 }
 0x503   : > { %v5715_v49 = vpop.eup %5714 }
 0x504   : > { %v1520_v50 = vsel %vm1235_vm5, %v5715_v49, 0.0  ;;  %v1471_v3 = vpack.c.bf16 %v5715_v49, %v5715_v49 }
 0x561   : > { %v1284_v36 = vpop.f32.mrb[8].mxu1 }
 0x562   : > { %v5344_v37 = vpop.f32.mrb[9].mxu1 }
 0x563   : > { %v1287_v38 = vpop.f32.mrb[10].mxu1 }
 0x564   : > { %v5345_v41 = vpop.f32.mrb[11].mxu1 }
 0x569   : > { %v1342_v43 = vpop.f32.mrb[12].mxu1 }
 0x56a   : > { %v5350_v44 = vpop.f32.mrb[13].mxu1  ;;  %v1348_v45 = vsel %vm1235_vm5, %v1342_v43, -inf }
 0x56b   : > { %1349 = vmax.xlane.f32.xlu1 %v1348_v45  ;;  %v1345_v46 = vpop.f32.mrb[14].mxu1 }
 0x56c   : > { %v5351_v47 = vpop.f32.mrb[15].mxu1 }
 0x57c   : > { %1472 = vrot.lane.b32.xlu1 %v6674_v61, %s6102_s19 }
 0x580   : > { %1588 = vrot.lane.b32.xlu1 %v6674_v61, %s6103_s24 }
 0x5a4   : > { %1521 = vadd.xlane.f32.xlu1 %v1520_v50 }
 0x5f8   : > { %v1350_v53 = vpop.xlane.xlu1 %1349 }
 0x5f9   : > { %v1351_v54 = vsub.f32 %v1342_v43, %v1350_v53 }
 0x5fb   : > { %v1352_v57 = vmul.f32 1.442695, %v1351_v54 }
 0x5fc   : > { %v1473_v59 = vpop.permute.xlu1 %1472 }
 0x5fd   : > { %5716 = vpow2.f32 %v1352_v57  ;;  %v1478_v63 = vsel %vm1246_vm4, %v1473_v59, 0  ;;  %v1798_v57 = vld [vmem:[%s6559_s5 + $0x40] sm:$0xff] }
 0x5fe   : > { %5718 = vpow2.f32 %v1585_v56  ;;  %v1790_v56 = vld [vmem:[%s6559_s5] sm:$0xff] }
 0x5ff   : > { %v4811_v59 = vcombine.low %v1790_v56, %v1798_v57 }
 0x600   : > { %v1589_v1 = vpop.permute.xlu1 %1588 }
 0x601   : > { %v1594_v4 = vsel %vm1246_vm4, %v1589_v1, 0 }
 0x607   : > { %v5717_v58 = vpop.eup %5716 }
 0x608   : > { %v1404_v60 = vsel %vm1235_vm5, %v5717_v58, 0.0  ;;  %v1354_v62 = vpack.c.bf16 %v5717_v58, %v5717_v58  ;;  %v5719_v61 = vpop.eup %5718  ;;  %v1791_v58 = vld [vmem:[%s6559_s5 + $0x8] sm:$0xff] }
 0x609   : > { %1405 = vadd.xlane.f32.xlu0 %v1404_v60  ;;  %v1636_v0 = vsel %vm1235_vm5, %v5719_v61, 0.0  ;;  %v1587_v5 = vpack.c.bf16 %v5719_v61, %v5719_v61  ;;  %v4812_v60 = vcombine.high %v1790_v56, %v1798_v57  ;;  %v1806_v61 = vld [vmem:[%s6559_s5 + $0x80] sm:$0xff] }
 0x60a   : > { %5355 = vmatmul.mubr.msk.bf16.vlgmr.msra.gmra.mrb[16].mxu1 %vm1235_vm5, %v1354_v62  ;;  %v1799_v62 = vld [vmem:[%s6559_s5 + $0x48] sm:$0xff]  ;;  %v1902_v57 = vld [vmem:[%s6559_s5 + $0x380] sm:$0xff] }
 0x60b   : > { %5365 = vmatpush3.bf16.msra.mxu1 %v1478_v63  ;;  %5366 = vmatprep.mubr.msk.bf16.mxu1 %vm6100_vm2, %v6099_v13  ;;  %v1814_v63 = vld [vmem:[%s6559_s5 + $0xc0] sm:$0xff]  ;;  %v4814_v1 = vcombine.high %v1791_v58, %v1799_v62 }
 0x60c   : > { %5376 = vmatprep.subr.bf16.mxu1 %v6099_v13 }
 0x60d   : > { %1637 = vadd.xlane.f32.xlu0 %v1636_v0  ;;  %v4813_v0 = vcombine.low %v1791_v58, %v1799_v62  ;;  %2683 = vmatprep.subr.bf16.mxu0 %v4814_v1  ;;  %v1910_v58 = vld [vmem:[%s6559_s5 + $0x3c0] sm:$0xff]  ;;  %v1911_v62 = vld [vmem:[%s6559_s5 + $0x3c8] sm:$0xff]  ;;  %v1792_v1 = vld [vmem:[%s6559_s5 + $0x10] sm:$0xff] }
 0x611   : > { %1291 = vadd.xlane.f32.xlu0 %v1290_v2  ;;  %v4828_v2 = vcombine.high %v1806_v61, %v1814_v63 }
 0x612   : > { %5367 = vmatmul.mubr.msk.bf16.vlgmr.msra.gmra.mrb[20].mxu1 %vm1235_vm5, %v1471_v3  ;;  %v1807_v3 = vld [vmem:[%s6559_s5 + $0x88] sm:$0xff] }
 0x613   : > { %5377 = vmatpush3.bf16.msra.mxu1 %v1594_v4  ;;  %5378 = vmatprep.mubr.msk.bf16.mxu1 %vm6100_vm2, %v6099_v13  ;;  %v1815_v4 = vld [vmem:[%s6559_s5 + $0xc8] sm:$0xff] }
 0x614   : > { %2642 = vmatprep.subr.bf16.mxu1 %v4812_v60  ;;  %v4924_v60 = vcombine.high %v1902_v57, %v1910_v58 }
 0x61a   : > { %5379 = vmatmul.mubr.msk.bf16.vlgmr.msra.gmra.mrb[24].mxu1 %vm1235_vm5, %v1587_v5  ;;  %v1822_v5 = vld [vmem:[%s6559_s5 + $0x100] sm:$0xff] }
 0x61b   : > { %2674 = vmatprep.mubr.bf16.mxu1 %v6098_v12  ;;  %2643 = vmatpush1.bf16.msra.mxu1 %v4811_v59  ;;  %v4843_v15 = vcombine.low %v1822_v5, %v1830_v6  ;;  %v1903_v59 = vld [vmem:[%s6559_s5 + $0x388] sm:$0xff] }
 0x61c   : > { %2644 = vmatprep.subr.bf16.mxu1 %v4828_v2  ;;  %v1800_v2 = vld [vmem:[%s6559_s5 + $0x50] sm:$0xff] }
 0x631   : > { %v1522_v17 = vpop.xlane.xlu1 %1521 }
 0x696   : > { %v1406_v8 = vpop.xlane.xlu0 %1405 }
 0x69a   : > { %v1638_v9 = vpop.xlane.xlu0 %1637 }
 0x69e   : > { %v1292_v10 = vpop.xlane.xlu0 %1291 }
 0x69f   : > { %5720 = vrcp.f32 %v1292_v10  ;;  %v4829_v10 = vcombine.low %v1807_v3, %v1815_v4 }
 0x6a0   : > { %5722 = vrcp.f32 %v1406_v8  ;;  %v1831_v8 = vld [vmem:[%s6559_s5 + $0x148] sm:$0xff] }
 0x6a1   : > { %5724 = vrcp.f32 %v1522_v17  ;;  %v4845_v16 = vcombine.low %v1823_v7, %v1831_v8 }
 0x6a2   : > { %5726 = vrcp.f32 %v1638_v9  ;;  %v4827_v9 = vcombine.low %v1806_v61, %v1814_v63  ;;  %v4923_v61 = vcombine.low %v1902_v57, %v1910_v58  ;;  %v4925_v63 = vcombine.low %v1903_v59, %v1911_v62  ;;  %v1881_v57 = vld [vmem:[%s6559_s5 + $0x2d8] sm:$0xff] }
 0x6a4   : > { %2645 = vmatpush1.bf16.msra.mxu1 %v4827_v9 }
 0x6a9   : > { %v5721_v11 = vpop.eup %5720 }
 0x6aa   : > { %v1294_v14 = vmul.f32 %v5721_v11, %v1284_v36  ;;  %v5723_v19 = vpop.eup %5722  ;;  %v4844_v11 = vcombine.high %v1822_v5, %v1830_v6  ;;  %v4816_v5 = vcombine.high %v1792_v1, %v1800_v2 }
 0x6ab   : > { %v5725_v27 = vpop.eup %5724 }
 0x6ac   : > { %1295 = vst.msk [vmem:[#allocation3] sm:$0xff] %vm1188_vm3, %v1294_v14  ;;  %v5727_v35 = vpop.eup %5726  ;;  %v4846_v14 = vcombine.high %v1823_v7, %v1831_v8  ;;  %2646 = vmatprep.subr.bf16.mxu1 %v4844_v11 }
 0x6ad   : > { %2647 = vmatpush1.bf16.msra.mxu1 %v4843_v15 }
 0x6dd   : > { %v1398_v20 = vpop.f32.mrb[16].mxu1 }
 0x6de   : > { %v1408_v22 = vmul.f32 %v5723_v19, %v1398_v20  ;;  %v5356_v23 = vpop.f32.mrb[17].mxu1 }
 0x6df   : > { %v1401_v24 = vpop.f32.mrb[18].mxu1  ;;  %v1839_v23 = vld [vmem:[%s6559_s5 + $0x188] sm:$0xff] }
 0x6e0   : > { %1410 = vrot.lane.b32.xlu1 %v1408_v22, %s6103_s24  ;;  %v5357_v25 = vpop.f32.mrb[19].mxu1  ;;  %v1846_v22 = vld [vmem:[%s6559_s5 + $0x1c0] sm:$0xff] }
 0x6e1   : > { %v4860_v24 = vcombine.high %v1838_v21, %v1846_v22  ;;  %v1847_v25 = vld [vmem:[%s6559_s5 + $0x1c8] sm:$0xff]  ;;  %v4859_v26 = vcombine.low %v1838_v21, %v1846_v22  ;;  %v1809_v21 = vld [vmem:[%s6559_s5 + $0x98] sm:$0xff] }
 0x6e2   : > { %v1817_v22 = vld [vmem:[%s6559_s5 + $0xd8] sm:$0xff] }
 0x6e3   : > { %2648 = vmatprep.subr.bf16.mxu1 %v4860_v24 }
 0x6e4   : > { %2649 = vmatpush1.bf16.msra.mxu1 %v4859_v26  ;;  %v4834_v26 = vcombine.high %v1809_v21, %v1817_v22 }
 0x6e5   : > { %v1514_v28 = vpop.f32.mrb[20].mxu1 }
 0x6e6   : > { %v1524_v30 = vmul.f32 %v5725_v27, %v1514_v28  ;;  %v5368_v31 = vpop.f32.mrb[21].mxu1  ;;  %v4861_v27 = vcombine.low %v1839_v23, %v1847_v25  ;;  %v4862_v28 = vcombine.high %v1839_v23, %v1847_v25 }
 0x6e7   : > { %v1517_v32 = vpop.f32.mrb[22].mxu1  ;;  %v1855_v31 = vld [vmem:[%s6559_s5 + $0x208] sm:$0xff] }
 0x6e8   : > { %1526 = vrot.lane.b32.xlu0 %v1524_v30, %s6102_s19  ;;  %v5369_v34 = vpop.f32.mrb[23].mxu1  ;;  %v1862_v30 = vld [vmem:[%s6559_s5 + $0x240] sm:$0xff] }
 0x6e9   : > { %v4876_v32 = vcombine.high %v1854_v29, %v1862_v30  ;;  %v1863_v34 = vld [vmem:[%s6559_s5 + $0x248] sm:$0xff] }
 0x6eb   : > { %2650 = vmatprep.subr.bf16.mxu1 %v4876_v32 }
 0x6ed   : > { %v1630_v36 = vpop.f32.mrb[24].mxu1 }
 0x6ee   : > { %v1640_v37 = vmul.f32 %v5727_v35, %v1630_v36  ;;  %v5380_v38 = vpop.f32.mrb[25].mxu1  ;;  %v4875_v35 = vcombine.low %v1854_v29, %v1862_v30  ;;  %v4877_v36 = vcombine.low %v1855_v31, %v1863_v34  ;;  %v1833_v29 = vld [vmem:[%s6559_s5 + $0x158] sm:$0xff] }
 0x6ef   : > { %v1633_v41 = vpop.f32.mrb[26].mxu1  ;;  %v1870_v38 = vld [vmem:[%s6559_s5 + $0x280] sm:$0xff] }
 0x6f0   : > { %1642 = vrot.lane.b32.xlu1 %v1640_v37, %s6101_s21  ;;  %v5381_v43 = vpop.f32.mrb[27].mxu1  ;;  %v4878_v37 = vcombine.high %v1855_v31, %v1863_v34  ;;  %2651 = vmatpush1.bf16.msra.mxu1 %v4875_v35  ;;  %v1878_v41 = vld [vmem:[%s6559_s5 + $0x2c0] sm:$0xff]  ;;  %v4833_v31 = vcombine.low %v1809_v21, %v1817_v22  ;;  %v1840_v35 = vld [vmem:[%s6559_s5 + $0x190] sm:$0xff] }
 0x6f1   : > { %v1871_v43 = vld [vmem:[%s6559_s5 + $0x288] sm:$0xff] }
 0x752   : > { %v1411_v44 = vpop.permute.xlu1 %1410 }
 0x753   : > { %1414 = vst.msk [vmem:[#allocation3] sm:$0xff] %vm1413_vm6, %v1411_v44  ;;  %v4892_v44 = vcombine.high %v1870_v38, %v1878_v41 }
 0x755   : > { %2652 = vmatprep.subr.bf16.mxu1 %v4892_v44 }
 0x75a   : > { %v1527_v45 = vpop.permute.xlu0 %1526 }
 0x75b   : > { %1530 = vst.msk [vmem:[#allocation3] sm:$0xff] %vm1529_vm7, %v1527_v45  ;;  %v1879_v45 = vld [vmem:[%s6559_s5 + $0x2c8] sm:$0xff] }
 0x762   : > { %v1643_v13 = vpop.permute.xlu1 %1642 }
 0x763   : > { %1646 = vst.msk [vmem:[#allocation3] sm:$0xff] %vm1645_vm8, %v1643_v13  ;;  %v4891_v13 = vcombine.low %v1870_v38, %v1878_v41  ;;  %v1849_v38 = vld [vmem:[%s6559_s5 + $0x1d8] sm:$0xff] }
 0x765   : > { %2653 = vmatpush1.bf16.msra.mxu1 %v4891_v13  ;;  %v1856_v13 = vld [vmem:[%s6559_s5 + $0x210] sm:$0xff] }
 0x76a   : > { %v1647_v46 = vld [vmem:[#allocation3] sm:$0xff] }
 0x76b   : > { %v1648_v47 = vpack.c.bf16 %v1647_v46, %v1647_v46  ;;  %v4893_v46 = vcombine.low %v1871_v43, %v1879_v45 }
 0x76d   : > { %5399 = vmatmul.mubr.bf16.vlgmr.msra.gmra.mrb[12].mxu0 %v1648_v47  ;;  %v4894_v47 = vcombine.high %v1871_v43, %v1879_v45 }
 0x76e   : > { %2715 = vmatprep.mubr.bf16.mxu0 %v6098_v12  ;;  %2684 = vmatpush1.bf16.msra.mxu0 %v4813_v0  ;;  %v4926_v0 = vcombine.high %v1903_v59, %v1911_v62 }
 0x840   : > { %v1754_v49 = vpop.f32.mrb[12].mxu0 }
 0x841   : > { %v1755_v50 = vadd.f32 %v4800_v48, %v1754_v49  ;;  %v5400_v51 = vpop.f32.mrb[13].mxu0  ;;  %v1886_v48 = vld [vmem:[%s6559_s5 + $0x300] sm:$0xff] }
 0x842   : > { %v1757_v52 = vpop.f32.mrb[14].mxu0  ;;  %v1894_v49 = vld [vmem:[%s6559_s5 + $0x340] sm:$0xff] }
 0x843   : > { %v5401_v53 = vpop.f32.mrb[15].mxu0  ;;  %v1760_v54 = vadd.f32 %v1755_v50, %v6630_v33  ;;  %v4830_v33 = vcombine.high %v1807_v3, %v1815_v4  ;;  %v1887_v50 = vld [vmem:[%s6559_s5 + $0x308] sm:$0xff]  ;;  %v4908_v51 = vcombine.high %v1886_v48, %v1894_v49  ;;  %v1793_v3 = vld [vmem:[%s6559_s5 + $0x18] sm:$0xff]  ;;  %v4815_v4 = vcombine.low %v1792_v1, %v1800_v2 }
 0x844   : > { %v1895_v52 = vld [vmem:[%s6559_s5 + $0x348] sm:$0xff]  ;;  %v4907_v53 = vcombine.low %v1886_v48, %v1894_v49  ;;  %v1865_v48 = vld [vmem:[%s6559_s5 + $0x258] sm:$0xff] }
 0x845   : > { %1763 = vadd.xlane.f32.xlu1 %v1760_v54  ;;  %2685 = vmatprep.subr.bf16.mxu0 %v4830_v33  ;;  %v4910_v56 = vcombine.high %v1887_v50, %v1895_v52  ;;  %v1801_v33 = vld [vmem:[%s6559_s5 + $0x58] sm:$0xff] }
 0x846   : > { %2686 = vmatpush1.bf16.msra.mxu0 %v4829_v10  ;;  %2654 = vmatprep.subr.bf16.mxu1 %v4908_v51  ;;  %v4817_v6 = vcombine.low %v1793_v3, %v1801_v33  ;;  %v4818_v7 = vcombine.high %v1793_v3, %v1801_v33  ;;  %v1897_v1 = vld [vmem:[%s6559_s5 + $0x358] sm:$0xff]  ;;  %v1904_v33 = vld [vmem:[%s6559_s5 + $0x390] sm:$0xff] }
 0x847   : > { %2687 = vmatprep.subr.bf16.mxu0 %v4846_v14  ;;  %2655 = vmatpush1.bf16.msra.mxu1 %v4907_v53  ;;  %v4809_v14 = vld [vmem:[%s846_s2] ss:$0 sm:$0xff]  ;;  %v1872_v53 = vld [vmem:[%s6559_s5 + $0x290] sm:$0xff]  ;;  %s7250_s2 = scalar_lea.vmem [#allocation12], %s6544_s8 }
 0x848   : > { %2656 = vmatprep.subr.bf16.mxu1 %v4924_v60 }
 0x84a   : > { %2688 = vmatpush1.bf16.msra.mxu0 %v4845_v16  ;;  %v4810_v16 = vld [vmem:[%s849_s3] ss:$0 sm:$0xff] }
 0x84b   : > { %2689 = vmatprep.subr.bf16.mxu0 %v4862_v28  ;;  %2657 = vmatpush1.bf16.msra.mxu1 %v4923_v61  ;;  %v1825_v28 = vld [vmem:[%s6559_s5 + $0x118] sm:$0xff]  ;;  %v1888_v61 = vld [vmem:[%s6559_s5 + $0x310] sm:$0xff] }
 0x84c   : > { %2724 = vmatprep.subr.bf16.mxu1 %v4816_v5  ;;  %v4850_v34 = vcombine.high %v1825_v28, %v1833_v29  ;;  %v4849_v43 = vcombine.low %v1825_v28, %v1833_v29  ;;  %v1819_v28 = vld [vmem:[%s6559_s5 + $0xe8] sm:$0xff] }
 0x84e   : > { %2690 = vmatpush1.bf16.msra.mxu0 %v4861_v27  ;;  %v1832_v27 = vld [vmem:[%s6559_s5 + $0x150] sm:$0xff] }
 0x84f   : > { %2691 = vmatprep.subr.bf16.mxu0 %v4878_v37  ;;  %v1841_v37 = vld [vmem:[%s6559_s5 + $0x198] sm:$0xff] }
 0x850   : > { %v4866_v45 = vcombine.high %v1841_v37, %v1849_v38 }
 0x852   : > { %2692 = vmatpush1.bf16.msra.mxu0 %v4877_v36  ;;  %v1848_v36 = vld [vmem:[%s6559_s5 + $0x1d0] sm:$0xff] }
 0x853   : > { %2693 = vmatprep.subr.bf16.mxu0 %v4894_v47  ;;  %v4864_v44 = vcombine.high %v1840_v35, %v1848_v36  ;;  %v1857_v47 = vld [vmem:[%s6559_s5 + $0x218] sm:$0xff]  ;;  %v4863_v49 = vcombine.low %v1840_v35, %v1848_v36  ;;  %v1834_v35 = vld [vmem:[%s6559_s5 + $0x160] sm:$0xff]  ;;  %v1827_v36 = vld [vmem:[%s6559_s5 + $0x128] sm:$0xff] }
 0x854   : > { %v4881_v59 = vcombine.low %v1857_v47, %v1865_v48 }
 0x856   : > { %2694 = vmatpush1.bf16.msra.mxu0 %v4893_v46  ;;  %v1864_v46 = vld [vmem:[%s6559_s5 + $0x250] sm:$0xff] }
 0x857   : > { %2695 = vmatprep.subr.bf16.mxu0 %v4910_v56  ;;  %v4880_v51 = vcombine.high %v1856_v13, %v1864_v46  ;;  %v1873_v56 = vld [vmem:[%s6559_s5 + $0x298] sm:$0xff]  ;;  %v4879_v58 = vcombine.low %v1856_v13, %v1864_v46  ;;  %v1850_v13 = vld [vmem:[%s6559_s5 + $0x1e0] sm:$0xff]  ;;  %v1843_v46 = vld [vmem:[%s6559_s5 + $0x1a8] sm:$0xff] }
 0x858   : > { %v4898_v62 = vcombine.high %v1873_v56, %v1881_v57  ;;  %v4897_v3 = vcombine.low %v1873_v56, %v1881_v57  ;;  %v1867_v56 = vld [vmem:[%s6559_s5 + $0x268] sm:$0xff] }
 0x8d2   : > { %v1764_v17 = vpop.xlane.xlu1 %1763 }
 0x8d3   : > { %v1766_v18 = vmul.f32 0.0078125, %v1764_v17 }
 0x8d5   : > { %v6763_v19 = vsub.f32 %v1760_v54, %v1766_v18  ;;  %v4909_v54 = vcombine.low %v1887_v50, %v1895_v52  ;;  %v1808_v18 = vld [vmem:[%s6559_s5 + $0x90] sm:$0xff]  ;;  %v4865_v50 = vcombine.low %v1841_v37, %v1849_v38  ;;  %v4882_v52 = vcombine.high %v1857_v47, %v1865_v48  ;;  %v1835_v37 = vld [vmem:[%s6559_s5 + $0x168] sm:$0xff] }
 0x8d6   : > { %v1851_v47 = vld [vmem:[%s6559_s5 + $0x1e8] sm:$0xff] }
 0x8d7   : > { %v1768_v20 = vmul.f32 %v6763_v19, %v6763_v19  ;;  %2696 = vmatpush1.bf16.msra.mxu0 %v4909_v54  ;;  %v1880_v54 = vld [vmem:[%s6559_s5 + $0x2d0] sm:$0xff] }
 0x8d8   : > { %2697 = vmatprep.subr.bf16.mxu0 %v4926_v0  ;;  %v4896_v60 = vcombine.high %v1872_v53, %v1880_v54  ;;  %v1889_v0 = vld [vmem:[%s6559_s5 + $0x318] sm:$0xff]  ;;  %v4895_v2 = vcombine.low %v1872_v53, %v1880_v54  ;;  %v1866_v53 = vld [vmem:[%s6559_s5 + $0x260] sm:$0xff]  ;;  %v1859_v54 = vld [vmem:[%s6559_s5 + $0x228] sm:$0xff] }
 0x8d9   : > { %1769 = vadd.xlane.f32.xlu0 %v1768_v20  ;;  %v1816_v20 = vld [vmem:[%s6559_s5 + $0xd0] sm:$0xff]  ;;  %v4914_v5 = vcombine.high %v1889_v0, %v1897_v1 }
 0x8da   : > { %v4832_v25 = vcombine.high %v1808_v18, %v1816_v20  ;;  %v4831_v30 = vcombine.low %v1808_v18, %v1816_v20  ;;  %v1803_v18 = vld [vmem:[%s6559_s5 + $0x68] sm:$0xff] }
 0x8db   : > { %2698 = vmatpush1.bf16.msra.mxu0 %v4925_v63  ;;  %v1896_v63 = vld [vmem:[%s6559_s5 + $0x350] sm:$0xff] }
 0x8dc   : > { %2765 = vmatprep.subr.bf16.mxu0 %v4818_v7  ;;  %v1905_v7 = vld [vmem:[%s6559_s5 + $0x398] sm:$0xff] }
 0x966   : > { %v1770_v8 = vpop.xlane.xlu0 %1769 }
 0x967   : > { %v1771_v9 = vmul.f32 0.0078125, %v1770_v8  ;;  %v1913_v8 = vld [vmem:[%s6559_s5 + $0x3d8] sm:$0xff] }
 0x968   : > { %v4929_v21 = vcombine.low %v1905_v7, %v1913_v8 }
 0x969   : > { %v1772_v10 = vadd.f32 1e-05, %v1771_v9  ;;  %v4911_v9 = vcombine.low %v1888_v61, %v1896_v63 }
 0x96b   : > { %5728 = vrsqrt.f32 %v1772_v10  ;;  %v4913_v10 = vcombine.low %v1889_v0, %v1897_v1  ;;  %v1883_v0 = vld [vmem:[%s6559_s5 + $0x2e8] sm:$0xff] }
 0x975   : > { %v5729_v11 = vpop.eup %5728 }
 0x976   : > { %v1774_v15 = vmul.f32 %v5729_v11, %v6763_v19  ;;  %v1824_v19 = vld [vmem:[%s6559_s5 + $0x110] sm:$0xff] }
 0x977   : > { %v4848_v32 = vcombine.high %v1824_v19, %v1832_v27  ;;  %v4847_v41 = vcombine.low %v1824_v19, %v1832_v27  ;;  %v1818_v19 = vld [vmem:[%s6559_s5 + $0xe0] sm:$0xff]  ;;  %v1811_v27 = vld [vmem:[%s6559_s5 + $0xa8] sm:$0xff] }
 0x978   : > { %v1781_v17 = vmul.f32 %v4809_v14, %v1774_v15  ;;  %v4930_v14 = vcombine.high %v1905_v7, %v1913_v8  ;;  %v1794_v15 = vld [vmem:[%s6559_s5 + $0x20] sm:$0xff]  ;;  %v1899_v7 = vld [vmem:[%s6559_s5 + $0x368] sm:$0xff] }
 0x97a   : > { %v6806_v23 = vadd.f32 %v4810_v16, %v1781_v17  ;;  %v1802_v16 = vld [vmem:[%s6559_s5 + $0x60] sm:$0xff]  ;;  %v1795_v17 = vld [vmem:[%s6559_s5 + $0x28] sm:$0xff] }
 0x97b   : > { %v4820_v22 = vcombine.high %v1794_v15, %v1802_v16  ;;  %v4819_v29 = vcombine.low %v1794_v15, %v1802_v16  ;;  %v1914_v15 = vld [vmem:[%s6559_s5 + $0x3e0] sm:$0xff]  ;;  %v1907_v16 = vld [vmem:[%s6559_s5 + $0x3a8] sm:$0xff] }
 0x97c   : > { %v6810_v24 = vpack.c.bf16 %v6806_v23, %v6806_v23 }
 0x97e   : > { %2675 = vmatmul.mubr.bf16.vlgmr.msra.gmra.mrb[28].mxu1 %v6810_v24  ;;  %2716 = vmatmul.mubr.bf16.vlgmr.msra.gmra.mrb[16].mxu0 %v6810_v24 }
 0x97f   : > { %2725 = vmatpush1.bf16.msra.mxu1 %v4815_v4  ;;  %2766 = vmatpush1.bf16.msra.mxu0 %v4817_v6  ;;  %v4912_v4 = vcombine.high %v1888_v61, %v1896_v63  ;;  %v1912_v6 = vld [vmem:[%s6559_s5 + $0x3d0] sm:$0xff]  ;;  %v1882_v61 = vld [vmem:[%s6559_s5 + $0x2e0] sm:$0xff]  ;;  %v1875_v63 = vld [vmem:[%s6559_s5 + $0x2a8] sm:$0xff] }
 0x980   : > { %2726 = vmatprep.subr.bf16.mxu1 %v4832_v25  ;;  %2767 = vmatprep.subr.bf16.mxu0 %v4834_v26  ;;  %v4928_v11 = vcombine.high %v1904_v33, %v1912_v6  ;;  %v4927_v20 = vcombine.low %v1904_v33, %v1912_v6  ;;  %v4822_v25 = vcombine.high %v1795_v17, %v1803_v18  ;;  %v1810_v26 = vld [vmem:[%s6559_s5 + $0xa0] sm:$0xff]  ;;  %v1891_v6 = vld [vmem:[%s6559_s5 + $0x328] sm:$0xff] }
 0x981   : > { %2756 = vmatprep.mubr.bf16.mxu1 %v6098_v12  ;;  %2797 = vmatprep.mubr.bf16.mxu0 %v6098_v12  ;;  %v4835_v38 = vcombine.low %v1810_v26, %v1818_v19  ;;  %v1898_v33 = vld [vmem:[%s6559_s5 + $0x360] sm:$0xff] }
 0x983   : > { %2727 = vmatpush1.bf16.msra.mxu1 %v4831_v30  ;;  %2768 = vmatpush1.bf16.msra.mxu0 %v4833_v31  ;;  %v4821_v30 = vcombine.low %v1795_v17, %v1803_v18  ;;  %v4836_v31 = vcombine.high %v1810_v26, %v1818_v19  ;;  %v1915_v17 = vld [vmem:[%s6559_s5 + $0x3e8] sm:$0xff]  ;;  %v1804_v26 = vld [vmem:[%s6559_s5 + $0x70] sm:$0xff]  ;;  %v1797_v19 = vld [vmem:[%s6559_s5 + $0x38] sm:$0xff] }
 0x984   : > { %2728 = vmatprep.subr.bf16.mxu1 %v4848_v32  ;;  %2769 = vmatprep.subr.bf16.mxu0 %v4850_v34  ;;  %v4838_v32 = vcombine.high %v1811_v27, %v1819_v28  ;;  %v1826_v34 = vld [vmem:[%s6559_s5 + $0x120] sm:$0xff] }
 0x985   : > { %v4851_v48 = vcombine.low %v1826_v34, %v1834_v35 }
 0x987   : > { %2729 = vmatpush1.bf16.msra.mxu1 %v4847_v41  ;;  %2770 = vmatpush1.bf16.msra.mxu0 %v4849_v43  ;;  %v4837_v41 = vcombine.low %v1811_v27, %v1819_v28  ;;  %v4852_v43 = vcombine.high %v1826_v34, %v1834_v35  ;;  %v1805_v27 = vld [vmem:[%s6559_s5 + $0x78] sm:$0xff]  ;;  %v1820_v34 = vld [vmem:[%s6559_s5 + $0xf0] sm:$0xff] }
 0x988   : > { %2730 = vmatprep.subr.bf16.mxu1 %v4864_v44  ;;  %2771 = vmatprep.subr.bf16.mxu0 %v4866_v45  ;;  %v4854_v44 = vcombine.high %v1827_v36, %v1835_v37  ;;  %v1842_v45 = vld [vmem:[%s6559_s5 + $0x1a0] sm:$0xff]  ;;  %v1813_v35 = vld [vmem:[%s6559_s5 + $0xb8] sm:$0xff] }
 0x989   : > { %v4867_v57 = vcombine.low %v1842_v45, %v1850_v13 }
 0x98b   : > { %2731 = vmatpush1.bf16.msra.mxu1 %v4863_v49  ;;  %2772 = vmatpush1.bf16.msra.mxu0 %v4865_v50  ;;  %v4853_v49 = vcombine.low %v1827_v36, %v1835_v37  ;;  %v4868_v50 = vcombine.high %v1842_v45, %v1850_v13  ;;  %v1821_v36 = vld [vmem:[%s6559_s5 + $0xf8] sm:$0xff]  ;;  %v1836_v45 = vld [vmem:[%s6559_s5 + $0x170] sm:$0xff] }
 0x98c   : > { %2732 = vmatprep.subr.bf16.mxu1 %v4880_v51  ;;  %2773 = vmatprep.subr.bf16.mxu0 %v4882_v52  ;;  %v4870_v51 = vcombine.high %v1843_v46, %v1851_v47  ;;  %v1858_v52 = vld [vmem:[%s6559_s5 + $0x220] sm:$0xff]  ;;  %v1829_v13 = vld [vmem:[%s6559_s5 + $0x138] sm:$0xff] }
 0x98d   : > { %v4883_v1 = vcombine.low %v1858_v52, %v1866_v53 }
 0x98f   : > { %2733 = vmatpush1.bf16.msra.mxu1 %v4879_v58  ;;  %2774 = vmatpush1.bf16.msra.mxu0 %v4881_v59  ;;  %v4869_v58 = vcombine.low %v1843_v46, %v1851_v47  ;;  %v4884_v59 = vcombine.high %v1858_v52, %v1866_v53  ;;  %v1837_v46 = vld [vmem:[%s6559_s5 + $0x178] sm:$0xff]  ;;  %v1852_v52 = vld [vmem:[%s6559_s5 + $0x1f0] sm:$0xff] }
 0x990   : > { %2734 = vmatprep.subr.bf16.mxu1 %v4896_v60  ;;  %2775 = vmatprep.subr.bf16.mxu0 %v4898_v62  ;;  %v4886_v60 = vcombine.high %v1859_v54, %v1867_v56  ;;  %v1874_v62 = vld [vmem:[%s6559_s5 + $0x2a0] sm:$0xff]  ;;  %v1845_v53 = vld [vmem:[%s6559_s5 + $0x1b8] sm:$0xff] }
 0x991   : > { %v4899_v8 = vcombine.low %v1874_v62, %v1882_v61 }
 0x993   : > { %2735 = vmatpush1.bf16.msra.mxu1 %v4895_v2  ;;  %2776 = vmatpush1.bf16.msra.mxu0 %v4897_v3  ;;  %v4885_v2 = vcombine.low %v1859_v54, %v1867_v56  ;;  %v4900_v3 = vcombine.high %v1874_v62, %v1882_v61  ;;  %v1853_v54 = vld [vmem:[%s6559_s5 + $0x1f8] sm:$0xff]  ;;  %v1868_v62 = vld [vmem:[%s6559_s5 + $0x270] sm:$0xff] }
 0x994   : > { %2736 = vmatprep.subr.bf16.mxu1 %v4912_v4  ;;  %2777 = vmatprep.subr.bf16.mxu0 %v4914_v5  ;;  %v4902_v4 = vcombine.high %v1875_v63, %v1883_v0  ;;  %v1890_v5 = vld [vmem:[%s6559_s5 + $0x320] sm:$0xff]  ;;  %v1861_v61 = vld [vmem:[%s6559_s5 + $0x238] sm:$0xff] }
 0x995   : > { %v4915_v18 = vcombine.low %v1890_v5, %v1898_v33 }
 0x997   : > { %2737 = vmatpush1.bf16.msra.mxu1 %v4911_v9  ;;  %2778 = vmatpush1.bf16.msra.mxu0 %v4913_v10  ;;  %v4901_v9 = vcombine.low %v1875_v63, %v1883_v0  ;;  %v4916_v10 = vcombine.high %v1890_v5, %v1898_v33  ;;  %v1869_v63 = vld [vmem:[%s6559_s5 + $0x278] sm:$0xff] }
 0x998   : > { %2738 = vmatprep.subr.bf16.mxu1 %v4928_v11  ;;  %2779 = vmatprep.subr.bf16.mxu0 %v4930_v14  ;;  %v4918_v11 = vcombine.high %v1891_v6, %v1899_v7  ;;  %v1906_v14 = vld [vmem:[%s6559_s5 + $0x3a0] sm:$0xff]  ;;  %v1877_v5 = vld [vmem:[%s6559_s5 + $0x2b8] sm:$0xff] }
 0x999   : > { %v4931_v28 = vcombine.low %v1906_v14, %v1914_v15  ;;  %v1885_v33 = vld [vmem:[%s6559_s5 + $0x2f8] sm:$0xff] }
 0x99b   : > { %2739 = vmatpush1.bf16.msra.mxu1 %v4927_v20  ;;  %2780 = vmatpush1.bf16.msra.mxu0 %v4929_v21  ;;  %v4917_v20 = vcombine.low %v1891_v6, %v1899_v7  ;;  %v4932_v21 = vcombine.high %v1906_v14, %v1914_v15  ;;  %v4889_v7 = vcombine.low %v1861_v61, %v1869_v63  ;;  %v1893_v14 = vld [vmem:[%s6559_s5 + $0x338] sm:$0xff] }
 0x99c   : > { %2806 = vmatprep.subr.bf16.mxu1 %v4820_v22  ;;  %2847 = vmatprep.subr.bf16.mxu0 %v4822_v25  ;;  %v4934_v22 = vcombine.high %v1907_v16, %v1915_v17  ;;  %v1796_v25 = vld [vmem:[%s6559_s5 + $0x30] sm:$0xff]  ;;  %v1901_v15 = vld [vmem:[%s6559_s5 + $0x378] sm:$0xff] }
 0x99d   : > { %v4823_v37 = vcombine.low %v1796_v25, %v1804_v26 }
 0x99e   : > { %2757 = vmatmul.mubr.bf16.vlgmr.msra.gmra.mrb[32].mxu1 %v6810_v24  ;;  %2798 = vmatmul.mubr.bf16.vlgmr.msra.gmra.mrb[20].mxu0 %v6810_v24 }
 0x99f   : > { %2807 = vmatpush1.bf16.msra.mxu1 %v4819_v29  ;;  %2848 = vmatpush1.bf16.msra.mxu0 %v4821_v30  ;;  %v4933_v29 = vcombine.low %v1907_v16, %v1915_v17  ;;  %v4824_v30 = vcombine.high %v1796_v25, %v1804_v26  ;;  %v4905_v17 = vcombine.low %v1877_v5, %v1885_v33  ;;  %v1909_v25 = vld [vmem:[%s6559_s5 + $0x3b8] sm:$0xff] }
 0x9a0   : > { %2808 = vmatprep.subr.bf16.mxu1 %v4836_v31  ;;  %2849 = vmatprep.subr.bf16.mxu0 %v4838_v32  ;;  %v4826_v31 = vcombine.high %v1797_v19, %v1805_v27  ;;  %v1812_v32 = vld [vmem:[%s6559_s5 + $0xb0] sm:$0xff]  ;;  %v1917_v26 = vld [vmem:[%s6559_s5 + $0x3f8] sm:$0xff] }
 0x9a1   : > { %2838 = vmatprep.mubr.bf16.mxu1 %v6098_v12  ;;  %2879 = vmatprep.mubr.bf16.mxu0 %v6098_v12  ;;  %v4839_v47 = vcombine.low %v1812_v32, %v1820_v34 }
 0x9a3   : > { %2809 = vmatpush1.bf16.msra.mxu1 %v4835_v38  ;;  %2850 = vmatpush1.bf16.msra.mxu0 %v4837_v41  ;;  %v4825_v38 = vcombine.low %v1797_v19, %v1805_v27  ;;  %v4840_v41 = vcombine.high %v1812_v32, %v1820_v34  ;;  %v4921_v27 = vcombine.low %v1893_v14, %v1901_v15  ;;  %v5584_v32 = vld [vmem:[%s6561_s10 + $0x40] sm:$0xff]  }
 0x9a4   : > { %2810 = vmatprep.subr.bf16.mxu1 %v4852_v43  ;;  %2851 = vmatprep.subr.bf16.mxu0 %v4854_v44  ;;  %v4842_v43 = vcombine.high %v1813_v35, %v1821_v36  ;;  %v1828_v44 = vld [vmem:[%s6559_s5 + $0x130] sm:$0xff]  ;;  %v5585_v34 = vld [vmem:[%s6561_s10 + $0xc0] sm:$0xff]  }
 0x9a5   : > { %v4855_v56 = vcombine.low %v1828_v44, %v1836_v45 }
 0x9a7   : > { %2811 = vmatpush1.bf16.msra.mxu1 %v4851_v48  ;;  %2852 = vmatpush1.bf16.msra.mxu0 %v4853_v49  ;;  %v4841_v48 = vcombine.low %v1813_v35, %v1821_v36  ;;  %v4856_v49 = vcombine.high %v1828_v44, %v1836_v45  ;;  %v5586_v35 = vld [vmem:[%s6561_s10] sm:$0xff]   ;;  %v5592_v44 = vld [vmem:[%s6561_s10 + $0x50] sm:$0xff]  }
 0x9a8   : > { %2812 = vmatprep.subr.bf16.mxu1 %v4868_v50  ;;  %2853 = vmatprep.subr.bf16.mxu0 %v4870_v51  ;;  %v4858_v50 = vcombine.high %v1829_v13, %v1837_v46  ;;  %v1844_v51 = vld [vmem:[%s6559_s5 + $0x1b0] sm:$0xff]  ;;  %v5587_v36 = vld [vmem:[%s6561_s10 + $0x80] sm:$0xff]  }
 0x9a9   : > { %v4871_v0 = vcombine.low %v1844_v51, %v1852_v52  ;;  %v5593_v45 = vld [vmem:[%s6561_s10 + $0xd0] sm:$0xff]  }
 0x9ab   : > { %2813 = vmatpush1.bf16.msra.mxu1 %v4867_v57  ;;  %2854 = vmatpush1.bf16.msra.mxu0 %v4869_v58  ;;  %v4857_v57 = vcombine.low %v1829_v13, %v1837_v46  ;;  %v4872_v58 = vcombine.high %v1844_v51, %v1852_v52  ;;  %v5594_v13 = vld [vmem:[%s6561_s10 + $0x10] sm:$0xff]   ;;  %v5601_v51 = vld [vmem:[%s6561_s10 + $0xe0] sm:$0xff]  }
 0x9ac   : > { %2814 = vmatprep.subr.bf16.mxu1 %v4884_v59  ;;  %2855 = vmatprep.subr.bf16.mxu0 %v4886_v60  ;;  %v4874_v59 = vcombine.high %v1845_v53, %v1853_v54  ;;  %v1860_v60 = vld [vmem:[%s6559_s5 + $0x230] sm:$0xff]  ;;  %v5602_v52 = vld [vmem:[%s6561_s10 + $0x20] sm:$0xff]  }
 0x9ad   : > { %v4887_v6 = vcombine.low %v1860_v60, %v1868_v62  ;;  %v5595_v46 = vld [vmem:[%s6561_s10 + $0x90] sm:$0xff]  }
 0x9af   : > { %2815 = vmatpush1.bf16.msra.mxu1 %v4883_v1  ;;  %2856 = vmatpush1.bf16.msra.mxu0 %v4885_v2  ;;  %v4888_v1 = vcombine.high %v1860_v60, %v1868_v62  ;;  %v4890_v2 = vcombine.high %v1861_v61, %v1869_v63  ;;  %v5609_v60 = vld [vmem:[%s6561_s10 + $0xf0] sm:$0xff]   ;;  %v5612_v63 = vld [vmem:[%s6561_s10 + $0x78] sm:$0xff]  }
 0x9b0   : > { %2816 = vmatprep.subr.bf16.mxu1 %v4900_v3  ;;  %2857 = vmatprep.subr.bf16.mxu0 %v4902_v4  ;;  %v1876_v3 = vld [vmem:[%s6559_s5 + $0x2b0] sm:$0xff] }
 0x9b1   : > { %v1884_v4 = vld [vmem:[%s6559_s5 + $0x2f0] sm:$0xff] }
 0x9b2   : > { %v4903_v16 = vcombine.low %v1876_v3, %v1884_v4  ;;  %v5610_v62 = vld [vmem:[%s6561_s10 + $0x30] sm:$0xff]  }
 0x9b3   : > { %2817 = vmatpush1.bf16.msra.mxu1 %v4899_v8  ;;  %2858 = vmatpush1.bf16.msra.mxu0 %v4901_v9  ;;  %v4904_v8 = vcombine.high %v1876_v3, %v1884_v4  ;;  %v4906_v9 = vcombine.high %v1877_v5, %v1885_v33  ;;  %v5611_v61 = vld [vmem:[%s6561_s10 + $0xb0] sm:$0xff]   ;;  %v5617_v3 = vld [vmem:[%s6561_s10 + $0x1c0] sm:$0xff]   ;;  %v1936_v5 = vsub.s32 3, %v6649_v39 }
 0x9b4   : > { %2818 = vmatprep.subr.bf16.mxu1 %v4916_v10  ;;  %2859 = vmatprep.subr.bf16.mxu0 %v4918_v11  ;;  %v1892_v10 = vld [vmem:[%s6559_s5 + $0x330] sm:$0xff]  ;;  %v6949_v4 = vld [vmem:[%s6593_s13] sm:$0xff] }
 0x9b5   : > { %v1900_v11 = vld [vmem:[%s6559_s5 + $0x370] sm:$0xff]  ;;  %v1925_v33 = vrot.slane %v6949_v4, %v6652_v40 }
 0x9b6   : > { %v4919_v19 = vcombine.low %v1892_v10, %v1900_v11 }
 0x9b7   : > { %2819 = vmatpush1.bf16.msra.mxu1 %v4915_v18  ;;  %2860 = vmatpush1.bf16.msra.mxu0 %v4917_v20  ;;  %v4920_v18 = vcombine.high %v1892_v10, %v1900_v11  ;;  %v4922_v20 = vcombine.high %v1893_v14, %v1901_v15 }
 0x9b8   : > { %2820 = vmatprep.subr.bf16.mxu1 %v4932_v21  ;;  %2861 = vmatprep.subr.bf16.mxu0 %v4934_v22  ;;  %v1908_v21 = vld [vmem:[%s6559_s5 + $0x3b0] sm:$0xff] }
 0x9b9   : > { %v1916_v22 = vld [vmem:[%s6559_s5 + $0x3f0] sm:$0xff] }
 0x9bb   : > { %2821 = vmatpush1.bf16.msra.mxu1 %v4931_v28  ;;  %2862 = vmatpush1.bf16.msra.mxu0 %v4933_v29  ;;  %v4936_v28 = vcombine.high %v1908_v21, %v1916_v22  ;;  %v4938_v29 = vcombine.high %v1909_v25, %v1917_v26 }
 0x9bc   : > { %2888 = vmatprep.subr.bf16.mxu1 %v4824_v30  ;;  %2929 = vmatprep.subr.bf16.mxu0 %v4826_v31  ;;  %v4935_v30 = vcombine.low %v1908_v21, %v1916_v22  ;;  %v4937_v31 = vcombine.low %v1909_v25, %v1917_v26 }
 0x9be   : > { %2839 = vmatmul.mubr.bf16.vlgmr.msra.gmra.mrb[36].mxu1 %v6810_v24  ;;  %2880 = vmatmul.mubr.bf16.vlgmr.msra.gmra.mrb[24].mxu0 %v6810_v24 }
 0x9bf   : > { %2889 = vmatpush1.bf16.msra.mxu1 %v4823_v37  ;;  %2930 = vmatpush1.bf16.msra.mxu0 %v4825_v38  ;;  %v5588_v37 = vld [vmem:[%s6561_s10 + $0x48] sm:$0xff]  }
 0x9c0   : > { %2890 = vmatprep.subr.bf16.mxu1 %v4840_v41  ;;  %2931 = vmatprep.subr.bf16.mxu0 %v4842_v43  ;;  %v5589_v38 = vld [vmem:[%s6561_s10 + $0xc8] sm:$0xff]  }
 0x9c1   : > { %2920 = vmatprep.mubr.bf16.mxu1 %v6098_v12  ;;  %2961 = vmatprep.mubr.bf16.mxu0 %v6098_v12  ;;  %v4873_v12 = vcombine.low %v1845_v53, %v1853_v54  ;;  %v5590_v41 = vld [vmem:[%s6561_s10 + $0x8] sm:$0xff]   ;;  %v5603_v53 = vld [vmem:[%s6561_s10 + $0xa0] sm:$0xff]  }
 0x9c2   : > { %v5591_v43 = vld [vmem:[%s6561_s10 + $0x88] sm:$0xff]  }
 0x9c3   : > { %2891 = vmatpush1.bf16.msra.mxu1 %v4839_v47  ;;  %2932 = vmatpush1.bf16.msra.mxu0 %v4841_v48  ;;  %v5597_v47 = vld [vmem:[%s6561_s10 + $0xd8] sm:$0xff]   ;;  %v5604_v54 = vld [vmem:[%s6561_s10 + $0x68] sm:$0xff]  }
 0x9c4   : > { %2892 = vmatprep.subr.bf16.mxu1 %v4856_v49  ;;  %2933 = vmatprep.subr.bf16.mxu0 %v4858_v50  ;;  %v5598_v48 = vld [vmem:[%s6561_s10 + $0x18] sm:$0xff]   ;;  %v5600_v50 = vld [vmem:[%s6561_s10 + $0x60] sm:$0xff]  }
 0x9c5   : > { %v5599_v49 = vld [vmem:[%s6561_s10 + $0x98] sm:$0xff]  }
 0x9c7   : > { %2893 = vmatpush1.bf16.msra.mxu1 %v4855_v56  ;;  %2934 = vmatpush1.bf16.msra.mxu0 %v4857_v57  ;;  %v5605_v56 = vld [vmem:[%s6561_s10 + $0xe8] sm:$0xff]  }
 0x9c8   : > { %2894 = vmatprep.subr.bf16.mxu1 %v4872_v58  ;;  %2935 = vmatprep.subr.bf16.mxu0 %v4874_v59  ;;  %v5606_v57 = vld [vmem:[%s6561_s10 + $0x28] sm:$0xff]   ;;  %v5608_v59 = vld [vmem:[%s6561_s10 + $0x70] sm:$0xff]  }
 0x9c9   : > { %v5607_v58 = vld [vmem:[%s6561_s10 + $0xa8] sm:$0xff]  }
 0x9cb   : > { %2895 = vmatpush1.bf16.msra.mxu1 %v4871_v0  ;;  %2936 = vmatpush1.bf16.msra.mxu0 %v4873_v12  ;;  %v5613_v0 = vld [vmem:[%s6561_s10 + $0xf8] sm:$0xff]  }
 0x9cc   : > { %2896 = vmatprep.subr.bf16.mxu1 %v4888_v1  ;;  %2937 = vmatprep.subr.bf16.mxu0 %v4890_v2  ;;  %v5614_v12 = vld [vmem:[%s6561_s10 + $0x38] sm:$0xff]   ;;  %v5616_v2 = vld [vmem:[%s6561_s10 + $0x140] sm:$0xff]  }
 0x9cd   : > { %v5615_v1 = vld [vmem:[%s6561_s10 + $0xb8] sm:$0xff]  }
 0x9cf   : > { %2897 = vmatpush1.bf16.msra.mxu1 %v4887_v6  ;;  %2938 = vmatpush1.bf16.msra.mxu0 %v4889_v7  ;;  %v1933_v6 = vrot.slane %v6949_v4, %v6671_v55  ;;  %v1929_v7 = vrot.slane %v6949_v4, %v6656_v42 }
 0x9d0   : > { %2898 = vmatprep.subr.bf16.mxu1 %v4904_v8  ;;  %2939 = vmatprep.subr.bf16.mxu0 %v4906_v9  ;;  %v1937_v8 = vrot.slane %v6949_v4, %v1936_v5 }
 0x9d3   : > { %2899 = vmatpush1.bf16.msra.mxu1 %v4903_v16  ;;  %2940 = vmatpush1.bf16.msra.mxu0 %v4905_v17 }
 0x9d4   : > { %2900 = vmatprep.subr.bf16.mxu1 %v4920_v18  ;;  %2941 = vmatprep.subr.bf16.mxu0 %v4922_v20 }
 0x9d7   : > { %2901 = vmatpush1.bf16.msra.mxu1 %v4919_v19  ;;  %2942 = vmatpush1.bf16.msra.mxu0 %v4921_v27 }
 0x9d8   : > { %2902 = vmatprep.subr.bf16.mxu1 %v4936_v28  ;;  %2943 = vmatprep.subr.bf16.mxu0 %v4938_v29 }
 0x9db   : > { %2903 = vmatpush1.bf16.msra.mxu1 %v4935_v30  ;;  %2944 = vmatpush1.bf16.msra.mxu0 %v4937_v31  ;;  %v5618_v31 = vld [vmem:[%s6561_s10 + $0x100] sm:$0xff]  }
 0x9dc   : > { %5123 = vmatprep.subr.bf16.mxu1 %v5584_v32  ;;  %5145 = vmatprep.subr.bf16.mxu0 %v5585_v34  ;;  %v5619_v32 = vld [vmem:[%s6561_s10 + $0x180] sm:$0xff]  }
 0x9de   : > { %2921 = vmatmul.mubr.bf16.vlgmr.msra.gmra.mrb[40].mxu1 %v6810_v24  ;;  %2962 = vmatmul.mubr.bf16.vlgmr.msra.gmra.mrb[28].mxu0 %v6810_v24  ;;  %v5596_v24 = vld [vmem:[%s6561_s10 + $0x58] sm:$0xff]  }
 0x9df   : > { %5124 = vmatpush3.bf16.msra.mxu1 %v5586_v35  ;;  %5146 = vmatpush3.bf16.msra.mxu0 %v5587_v36  ;;  %v5620_v36 = vld [vmem:[%s6561_s10 + $0x148] sm:$0xff]  }
 0x9e0   : > { %5125 = vmatprep.subr.bf16.mxu1 %v5588_v37  ;;  %5147 = vmatprep.subr.bf16.mxu0 %v5589_v38  ;;  %v5621_v37 = vld [vmem:[%s6561_s10 + $0x1c8] sm:$0xff]  }
 0x9e1   : > { %v5622_v38 = vld [vmem:[%s6561_s10 + $0x108] sm:$0xff]  }
 0x9e3   : > { %5126 = vmatpush3.bf16.msra.mxu1 %v5590_v41  ;;  %5148 = vmatpush3.bf16.msra.mxu0 %v5591_v43  ;;  %v5623_v41 = vld [vmem:[%s6561_s10 + $0x188] sm:$0xff]   ;;  %v5624_v43 = vld [vmem:[%s6561_s10 + $0x150] sm:$0xff]  }
 0x9e4   : > { %5127 = vmatprep.subr.bf16.mxu1 %v5592_v44  ;;  %5149 = vmatprep.subr.bf16.mxu0 %v5593_v45  ;;  %v5625_v44 = vld [vmem:[%s6561_s10 + $0x1d0] sm:$0xff]  }
 0x9e5   : > { %v5626_v45 = vld [vmem:[%s6561_s10 + $0x110] sm:$0xff]  }
 0x9e7   : > { %5128 = vmatpush3.bf16.msra.mxu1 %v5594_v13  ;;  %5150 = vmatpush3.bf16.msra.mxu0 %v5595_v46  ;;  %v5627_v13 = vld [vmem:[%s6561_s10 + $0x190] sm:$0xff]   ;;  %v5628_v46 = vld [vmem:[%s6561_s10 + $0x158] sm:$0xff]  }
 0x9e8   : > { %5129 = vmatprep.subr.bf16.mxu1 %v5596_v24  ;;  %5151 = vmatprep.subr.bf16.mxu0 %v5597_v47  ;;  %v5629_v24 = vld [vmem:[%s6561_s10 + $0x1d8] sm:$0xff]  }
 0x9e9   : > { %v5630_v47 = vld [vmem:[%s6561_s10 + $0x118] sm:$0xff]  }
 0x9eb   : > { %5130 = vmatpush3.bf16.msra.mxu1 %v5598_v48  ;;  %5152 = vmatpush3.bf16.msra.mxu0 %v5599_v49  ;;  %v5631_v48 = vld [vmem:[%s6561_s10 + $0x198] sm:$0xff]   ;;  %v5632_v49 = vld [vmem:[%s6561_s10 + $0x160] sm:$0xff]  }
 0x9ec   : > { %5131 = vmatprep.subr.bf16.mxu1 %v5600_v50  ;;  %5153 = vmatprep.subr.bf16.mxu0 %v5601_v51  ;;  %v5633_v50 = vld [vmem:[%s6561_s10 + $0x1e0] sm:$0xff]  }
 0x9ed   : > { %v5634_v51 = vld [vmem:[%s6561_s10 + $0x120] sm:$0xff]  }
 0x9ef   : > { %5132 = vmatpush3.bf16.msra.mxu1 %v5602_v52  ;;  %5154 = vmatpush3.bf16.msra.mxu0 %v5603_v53  ;;  %v5635_v52 = vld [vmem:[%s6561_s10 + $0x1a0] sm:$0xff]   ;;  %v5636_v53 = vld [vmem:[%s6561_s10 + $0x168] sm:$0xff]  }
 0x9f0   : > { %5133 = vmatprep.subr.bf16.mxu1 %v5604_v54  ;;  %5155 = vmatprep.subr.bf16.mxu0 %v5605_v56  ;;  %v5637_v54 = vld [vmem:[%s6561_s10 + $0x1e8] sm:$0xff]   ;;  %v1940_v56 = vsub.s32 4, %v6649_v39 }
 0x9f3   : > { %5134 = vmatpush3.bf16.msra.mxu1 %v5606_v57  ;;  %5156 = vmatpush3.bf16.msra.mxu0 %v5607_v58  ;;  %v1948_v57 = vsub.s32 6, %v6649_v39  ;;  %v5638_v58 = vld [vmem:[%s6561_s10 + $0x128] sm:$0xff]  }
 0x9f4   : > { %5135 = vmatprep.subr.bf16.mxu1 %v5608_v59  ;;  %5157 = vmatprep.subr.bf16.mxu0 %v5609_v60  ;;  %v5639_v59 = vld [vmem:[%s6561_s10 + $0x1a8] sm:$0xff]   ;;  %v1944_v60 = vsub.s32 5, %v6649_v39 }
 0x9f7   : > { %5136 = vmatpush3.bf16.msra.mxu1 %v5610_v62  ;;  %5158 = vmatpush3.bf16.msra.mxu0 %v5611_v61  ;;  %v1952_v62 = vsub.s32 7, %v6649_v39  ;;  %v5640_v61 = vld [vmem:[%s6561_s10 + $0x170] sm:$0xff]  }
 0x9f8   : > { %5137 = vmatprep.subr.bf16.mxu1 %v5612_v63  ;;  %5159 = vmatprep.subr.bf16.mxu0 %v5613_v0  ;;  %v5641_v63 = vld [vmem:[%s6561_s10 + $0x1f0] sm:$0xff]   ;;  %v1941_v0 = vrot.slane %v6949_v4, %v1940_v56 }
 0x9fb   : > { %5138 = vmatpush3.bf16.msra.mxu1 %v5614_v12  ;;  %5160 = vmatpush3.bf16.msra.mxu0 %v5615_v1  ;;  %v1949_v12 = vrot.slane %v6949_v4, %v1948_v57  ;;  %v1945_v1 = vrot.slane %v6949_v4, %v1944_v60 }
 0x9fc   : > { %5167 = vmatprep.subr.bf16.mxu1 %v5616_v2  ;;  %5189 = vmatprep.subr.bf16.mxu0 %v5617_v3  ;;  %v1953_v2 = vrot.slane %v6949_v4, %v1952_v62  ;;  %v5642_v3 = vld [vmem:[%s6561_s10 + $0x130] sm:$0xff]  }
 0xa51   : > { %v2676_v9 = vpop.f32.mrb[28].mxu1  ;;  %v2717_v10 = vpop.f32.mrb[16].mxu0 }
 0xa52   : > { %v2677_v11 = vadd.f32 %v2676_v9, %v1925_v33  ;;  %v2718_v14 = vadd.f32 %v2717_v10, %v1933_v6  ;;  %v2678_v15 = vpop.f32.mrb[29].mxu1  ;;  %v2719_v16 = vpop.f32.mrb[17].mxu0  ;;  %v5643_v33 = vld [vmem:[%s6561_s10 + $0x1b0] sm:$0xff]   ;;  %v5644_v6 = vld [vmem:[%s6561_s10 + $0x178] sm:$0xff]  }
 0xa53   : > { %v2679_v17 = vadd.f32 %v2678_v15, %v1929_v7  ;;  %v2720_v18 = vadd.f32 %v2719_v16, %v1937_v8  ;;  %v2680_v20 = vpop.f32.mrb[30].mxu1  ;;  %v2721_v21 = vpop.f32.mrb[18].mxu0  ;;  %v5645_v7 = vld [vmem:[%s6561_s10 + $0x1f8] sm:$0xff]  }
 0xa54   : > { %v2970_v22 = vmax.f32 %v2677_v11, 0.0  ;;  %v2972_v25 = vmax.f32 %v2718_v14, 0.0  ;;  %v2681_v26 = vpop.f32.mrb[31].mxu1  ;;  %v2722_v19 = vpop.f32.mrb[19].mxu0  ;;  %v5646_v20 = vld [vmem:[%s6561_s10 + $0x138] sm:$0xff]  }
 0xa55   : > { %v2971_v27 = vmax.f32 %v2679_v17, 0.0  ;;  %v2973_v28 = vmax.f32 %v2720_v18, 0.0  ;;  %v5647_v21 = vld [vmem:[%s6561_s10 + $0x1b8] sm:$0xff]  }
 0xa56   : > { %v2986_v34 = vpack.c.bf16 %v2970_v22, %v2970_v22  ;;  %v2988_v35 = vpack.c.bf16 %v2972_v25, %v2972_v25 }
 0xa57   : > { %v2987_v29 = vpack.c.bf16 %v2971_v27, %v2971_v27  ;;  %v2989_v30 = vpack.c.bf16 %v2973_v28, %v2973_v28  ;;  %v5648_v27 = vld [vmem:[%s6561_s10 + $0x240] sm:$0xff]  }
 0xa58   : > { %v5649_v28 = vld [vmem:[%s6561_s10 + $0x2c0] sm:$0xff]  }
 0xa59   : > { %4065 = vmatprep.mubr.bf16.mxu1 %v2987_v29  ;;  %4105 = vmatprep.mubr.bf16.mxu0 %v2989_v30 }
 0xa5a   : > { %4066 = vmatmul.mubr.bf16.vlgmr.msra.gmra.mrb[44].mxu1 %v2986_v34  ;;  %4106 = vmatmul.mubr.bf16.vlgmr.msra.gmra.mrb[32].mxu0 %v2988_v35  ;;  %v5650_v34 = vld [vmem:[%s6561_s10 + $0x200] sm:$0xff]  }
 0xa5b   : > { %5168 = vmatpush3.bf16.msra.mxu1 %v5618_v31  ;;  %5190 = vmatpush3.bf16.msra.mxu0 %v5619_v32  ;;  %v5651_v35 = vld [vmem:[%s6561_s10 + $0x280] sm:$0xff]  }
 0xa5c   : > { %5169 = vmatprep.subr.bf16.mxu1 %v5620_v36  ;;  %5191 = vmatprep.subr.bf16.mxu0 %v5621_v37 }
 0xa5f   : > { %5170 = vmatpush3.bf16.msra.mxu1 %v5622_v38  ;;  %5192 = vmatpush3.bf16.msra.mxu0 %v5623_v41  ;;  %v5652_v38 = vld [vmem:[%s6561_s10 + $0x248] sm:$0xff]  }
 0xa60   : > { %5171 = vmatprep.subr.bf16.mxu1 %v5624_v43  ;;  %5193 = vmatprep.subr.bf16.mxu0 %v5625_v44  ;;  %v5653_v41 = vld [vmem:[%s6561_s10 + $0x2c8] sm:$0xff]  }
 0xa61   : > { %v5654_v43 = vld [vmem:[%s6561_s10 + $0x208] sm:$0xff]  }
 0xa62   : > { %v5655_v44 = vld [vmem:[%s6561_s10 + $0x288] sm:$0xff]  }
 0xa63   : > { %5172 = vmatpush3.bf16.msra.mxu1 %v5626_v45  ;;  %5194 = vmatpush3.bf16.msra.mxu0 %v5627_v13  ;;  %v5656_v45 = vld [vmem:[%s6561_s10 + $0x250] sm:$0xff]  }
 0xa64   : > { %5173 = vmatprep.subr.bf16.mxu1 %v5628_v46  ;;  %5195 = vmatprep.subr.bf16.mxu0 %v5629_v24  ;;  %v5657_v13 = vld [vmem:[%s6561_s10 + $0x2d0] sm:$0xff]  }
 0xa65   : > { %v5658_v46 = vld [vmem:[%s6561_s10 + $0x210] sm:$0xff]  }
 0xa66   : > { %v5659_v24 = vld [vmem:[%s6561_s10 + $0x290] sm:$0xff]  }
 0xa67   : > { %5174 = vmatpush3.bf16.msra.mxu1 %v5630_v47  ;;  %5196 = vmatpush3.bf16.msra.mxu0 %v5631_v48  ;;  %v5660_v47 = vld [vmem:[%s6561_s10 + $0x258] sm:$0xff]  }
 0xa68   : > { %5175 = vmatprep.subr.bf16.mxu1 %v5632_v49  ;;  %5197 = vmatprep.subr.bf16.mxu0 %v5633_v50  ;;  %v5661_v48 = vld [vmem:[%s6561_s10 + $0x2d8] sm:$0xff]  }
 0xa69   : > { %v5662_v49 = vld [vmem:[%s6561_s10 + $0x218] sm:$0xff]  }
 0xa6a   : > { %v5663_v50 = vld [vmem:[%s6561_s10 + $0x298] sm:$0xff]  }
 0xa6b   : > { %5176 = vmatpush3.bf16.msra.mxu1 %v5634_v51  ;;  %5198 = vmatpush3.bf16.msra.mxu0 %v5635_v52  ;;  %v5664_v51 = vld [vmem:[%s6561_s10 + $0x260] sm:$0xff]  }
 0xa6c   : > { %5177 = vmatprep.subr.bf16.mxu1 %v5636_v53  ;;  %5199 = vmatprep.subr.bf16.mxu0 %v5637_v54  ;;  %v5665_v52 = vld [vmem:[%s6561_s10 + $0x2e0] sm:$0xff]  }
 0xa6d   : > { %v5666_v53 = vld [vmem:[%s6561_s10 + $0x220] sm:$0xff]  }
 0xa6e   : > { %v5667_v54 = vld [vmem:[%s6561_s10 + $0x2a0] sm:$0xff]  }
 0xa6f   : > { %5178 = vmatpush3.bf16.msra.mxu1 %v5638_v58  ;;  %5200 = vmatpush3.bf16.msra.mxu0 %v5639_v59  ;;  %v5668_v58 = vld [vmem:[%s6561_s10 + $0x268] sm:$0xff]  }
 0xa70   : > { %5179 = vmatprep.subr.bf16.mxu1 %v5640_v61  ;;  %5201 = vmatprep.subr.bf16.mxu0 %v5641_v63  ;;  %v5669_v59 = vld [vmem:[%s6561_s10 + $0x2e8] sm:$0xff]  }
 0xa71   : > { %v2758_v8 = vpop.f32.mrb[32].mxu1  ;;  %v2799_v9 = vpop.f32.mrb[20].mxu0  ;;  %v5670_v61 = vld [vmem:[%s6561_s10 + $0x228] sm:$0xff]  }
 0xa72   : > { %v2759_v10 = vadd.f32 %v2758_v8, %v1941_v0  ;;  %v2800_v11 = vadd.f32 %v2799_v9, %v1949_v12  ;;  %v2760_v14 = vpop.f32.mrb[33].mxu1  ;;  %v2801_v15 = vpop.f32.mrb[21].mxu0  ;;  %v5671_v63 = vld [vmem:[%s6561_s10 + $0x2a8] sm:$0xff]   ;;  %v5672_v12 = vld [vmem:[%s6561_s10 + $0x270] sm:$0xff]   ;;  %v5676_v9 = vld [vmem:[%s6561_s10 + $0x278] sm:$0xff]  }
 0xa73   : > { %v2761_v16 = vadd.f32 %v2760_v14, %v1945_v1  ;;  %v2802_v17 = vadd.f32 %v2801_v15, %v1953_v2  ;;  %v2762_v18 = vpop.f32.mrb[34].mxu1  ;;  %v2803_v4 = vpop.f32.mrb[22].mxu0  ;;  %5180 = vmatpush3.bf16.msra.mxu1 %v5642_v3  ;;  %5202 = vmatpush3.bf16.msra.mxu0 %v5643_v33  ;;  %v7032_v0 = vld [vmem:[%s6593_s13 + $0x8] sm:$0xff]  ;;  %v5673_v1 = vld [vmem:[%s6561_s10 + $0x2f0] sm:$0xff]  }
 0xa74   : > { %v2974_v22 = vmax.f32 %v2759_v10, 0.0  ;;  %v2976_v25 = vmax.f32 %v2800_v11, 0.0  ;;  %v2763_v26 = vpop.f32.mrb[35].mxu1  ;;  %v2804_v19 = vpop.f32.mrb[23].mxu0  ;;  %5181 = vmatprep.subr.bf16.mxu1 %v5644_v6  ;;  %5203 = vmatprep.subr.bf16.mxu0 %v5645_v7  ;;  %v1957_v2 = vrot.slane %v7032_v0, %v6652_v40  ;;  %v1965_v3 = vrot.slane %v7032_v0, %v6671_v55  ;;  %v5674_v7 = vld [vmem:[%s6561_s10 + $0x230] sm:$0xff]   ;;  %v5677_v40 = vld [vmem:[%s6561_s10 + $0x2f8] sm:$0xff]  }
 0xa75   : > { %v2975_v29 = vmax.f32 %v2761_v16, 0.0  ;;  %v2977_v30 = vmax.f32 %v2802_v17, 0.0  ;;  %v1961_v33 = vrot.slane %v7032_v0, %v6656_v42  ;;  %v1969_v6 = vrot.slane %v7032_v0, %v1936_v5  ;;  %v5675_v8 = vld [vmem:[%s6561_s10 + $0x2b0] sm:$0xff]   ;;  %v5678_v4 = vld [vmem:[%s6561_s10 + $0x238] sm:$0xff]   ;;  %v5680_v19 = vld [vmem:[%s6561_s10 + $0x340] sm:$0xff]  }
 0xa76   : > { %v2990_v36 = vpack.c.bf16 %v2974_v22, %v2974_v22  ;;  %v2992_v37 = vpack.c.bf16 %v2976_v25, %v2976_v25 }
 0xa77   : > { %v2991_v31 = vpack.c.bf16 %v2975_v29, %v2975_v29  ;;  %v2993_v32 = vpack.c.bf16 %v2977_v30, %v2977_v30  ;;  %5182 = vmatpush3.bf16.msra.mxu1 %v5646_v20  ;;  %5204 = vmatpush3.bf16.msra.mxu0 %v5647_v21  ;;  %v5679_v20 = vld [vmem:[%s6561_s10 + $0x2b8] sm:$0xff]  }
 0xa78   : > { %5211 = vmatprep.subr.bf16.mxu1 %v5648_v27  ;;  %5233 = vmatprep.subr.bf16.mxu0 %v5649_v28  ;;  %v5681_v27 = vld [vmem:[%s6561_s10 + $0x3c0] sm:$0xff]  }
 0xa79   : > { %4145 = vmatprep.mubr.bf16.mxu1 %v2991_v31  ;;  %4185 = vmatprep.mubr.bf16.mxu0 %v2993_v32  ;;  %v5682_v32 = vld [vmem:[%s6561_s10 + $0x300] sm:$0xff]  }
 0xa7a   : > { %4146 = vmatmul.mubr.bf16.vlgmr.msra.gmra.mrb[48].mxu1 %v2990_v36  ;;  %4186 = vmatmul.mubr.bf16.vlgmr.msra.gmra.mrb[36].mxu0 %v2992_v37  ;;  %v5684_v37 = vld [vmem:[%s6561_s10 + $0x348] sm:$0xff]  }
 0xa7b   : > { %5212 = vmatpush3.bf16.msra.mxu1 %v5650_v34  ;;  %5234 = vmatpush3.bf16.msra.mxu0 %v5651_v35  ;;  %v5683_v34 = vld [vmem:[%s6561_s10 + $0x380] sm:$0xff]  }
 0xa7c   : > { %5213 = vmatprep.subr.bf16.mxu1 %v5652_v38  ;;  %5235 = vmatprep.subr.bf16.mxu0 %v5653_v41  ;;  %v5685_v38 = vld [vmem:[%s6561_s10 + $0x3c8] sm:$0xff]  }
 0xa7d   : > { %v5686_v41 = vld [vmem:[%s6561_s10 + $0x308] sm:$0xff]  }
 0xa7f   : > { %5214 = vmatpush3.bf16.msra.mxu1 %v5654_v43  ;;  %5236 = vmatpush3.bf16.msra.mxu0 %v5655_v44  ;;  %v5687_v43 = vld [vmem:[%s6561_s10 + $0x388] sm:$0xff]   ;;  %v5688_v44 = vld [vmem:[%s6561_s10 + $0x350] sm:$0xff]  }
 0xa80   : > { %5215 = vmatprep.subr.bf16.mxu1 %v5656_v45  ;;  %5237 = vmatprep.subr.bf16.mxu0 %v5657_v13  ;;  %v5689_v45 = vld [vmem:[%s6561_s10 + $0x3d0] sm:$0xff]  }
 0xa81   : > { %v5690_v13 = vld [vmem:[%s6561_s10 + $0x310] sm:$0xff]  }
 0xa83   : > { %5216 = vmatpush3.bf16.msra.mxu1 %v5658_v46  ;;  %5238 = vmatpush3.bf16.msra.mxu0 %v5659_v24  ;;  %v5691_v46 = vld [vmem:[%s6561_s10 + $0x390] sm:$0xff]   ;;  %v5692_v24 = vld [vmem:[%s6561_s10 + $0x358] sm:$0xff]  }
 0xa84   : > { %5217 = vmatprep.subr.bf16.mxu1 %v5660_v47  ;;  %5239 = vmatprep.subr.bf16.mxu0 %v5661_v48  ;;  %v5693_v47 = vld [vmem:[%s6561_s10 + $0x3d8] sm:$0xff]  }
 0xa85   : > { %v5694_v48 = vld [vmem:[%s6561_s10 + $0x318] sm:$0xff]  }
 0xa87   : > { %5218 = vmatpush3.bf16.msra.mxu1 %v5662_v49  ;;  %5240 = vmatpush3.bf16.msra.mxu0 %v5663_v50  ;;  %v5695_v49 = vld [vmem:[%s6561_s10 + $0x398] sm:$0xff]   ;;  %v5696_v50 = vld [vmem:[%s6561_s10 + $0x360] sm:$0xff]  }
 0xa88   : > { %5219 = vmatprep.subr.bf16.mxu1 %v5664_v51  ;;  %5241 = vmatprep.subr.bf16.mxu0 %v5665_v52  ;;  %v5697_v51 = vld [vmem:[%s6561_s10 + $0x3e0] sm:$0xff]  }
 0xa89   : > { %v5698_v52 = vld [vmem:[%s6561_s10 + $0x320] sm:$0xff]  }
 0xa8b   : > { %5220 = vmatpush3.bf16.msra.mxu1 %v5666_v53  ;;  %5242 = vmatpush3.bf16.msra.mxu0 %v5667_v54  ;;  %v5699_v53 = vld [vmem:[%s6561_s10 + $0x3a0] sm:$0xff]   ;;  %v5700_v54 = vld [vmem:[%s6561_s10 + $0x368] sm:$0xff]  }
 0xa8c   : > { %5221 = vmatprep.subr.bf16.mxu1 %v5668_v58  ;;  %5243 = vmatprep.subr.bf16.mxu0 %v5669_v59  ;;  %v5701_v58 = vld [vmem:[%s6561_s10 + $0x3e8] sm:$0xff]  }
 0xa8d   : > { %v5702_v59 = vld [vmem:[%s6561_s10 + $0x328] sm:$0xff]  }
 0xa8f   : > { %5222 = vmatpush3.bf16.msra.mxu1 %v5670_v61  ;;  %5244 = vmatpush3.bf16.msra.mxu0 %v5671_v63  ;;  %v5703_v61 = vld [vmem:[%s6561_s10 + $0x3a8] sm:$0xff]   ;;  %v5704_v63 = vld [vmem:[%s6561_s10 + $0x370] sm:$0xff]  }
 0xa90   : > { %5223 = vmatprep.subr.bf16.mxu1 %v5672_v12  ;;  %5245 = vmatprep.subr.bf16.mxu0 %v5673_v1  ;;  %v5705_v12 = vld [vmem:[%s6561_s10 + $0x3f0] sm:$0xff]   ;;  %v1973_v1 = vrot.slane %v7032_v0, %v1940_v56  ;;  %v5708_v56 = vld [vmem:[%s6561_s10 + $0x378] sm:$0xff]  }
 0xa91   : > { %v2840_v10 = vpop.f32.mrb[36].mxu1  ;;  %v2881_v11 = vpop.f32.mrb[24].mxu0 }
 0xa92   : > { %v2841_v55 = vadd.f32 %v2840_v10, %v1957_v2  ;;  %v2882_v14 = vadd.f32 %v2881_v11, %v1965_v3  ;;  %v2842_v15 = vpop.f32.mrb[37].mxu1  ;;  %v2883_v16 = vpop.f32.mrb[25].mxu0  ;;  %v1981_v2 = vrot.slane %v7032_v0, %v1948_v57  ;;  %v1977_v3 = vrot.slane %v7032_v0, %v1944_v60 }
 0xa93   : > { %v2843_v42 = vadd.f32 %v2842_v15, %v1961_v33  ;;  %v2884_v17 = vadd.f32 %v2883_v16, %v1969_v6  ;;  %v2844_v18 = vpop.f32.mrb[38].mxu1  ;;  %v2885_v5 = vpop.f32.mrb[26].mxu0  ;;  %5224 = vmatpush3.bf16.msra.mxu1 %v5674_v7  ;;  %5246 = vmatpush3.bf16.msra.mxu0 %v5675_v8  ;;  %v1985_v33 = vrot.slane %v7032_v0, %v1952_v62  ;;  %v5706_v6 = vld [vmem:[%s6561_s10 + $0x330] sm:$0xff]   ;;  %v5709_v8 = vld [vmem:[%s6561_s10 + $0x3f8] sm:$0xff]  }
 0xa94   : > { %v2978_v21 = vmax.f32 %v2841_v55, 0.0  ;;  %v2980_v22 = vmax.f32 %v2882_v14, 0.0  ;;  %v2845_v25 = vpop.f32.mrb[39].mxu1  ;;  %v2886_v26 = vpop.f32.mrb[27].mxu0  ;;  %5225 = vmatprep.subr.bf16.mxu1 %v5676_v9  ;;  %5247 = vmatprep.subr.bf16.mxu0 %v5677_v40  ;;  %v5707_v7 = vld [vmem:[%s6561_s10 + $0x3b0] sm:$0xff]   ;;  %v5710_v62 = vld [vmem:[%s6561_s10 + $0x338] sm:$0xff]  }
 0xa95   : > { %v2979_v28 = vmax.f32 %v2843_v42, 0.0  ;;  %v2981_v29 = vmax.f32 %v2884_v17, 0.0  ;;  %v5711_v0 = vld [vmem:[%s6561_s10 + $0x3b8] sm:$0xff]  }
 0xa96   : > { %v2994_v35 = vpack.c.bf16 %v2978_v21, %v2978_v21  ;;  %v2996_v36 = vpack.c.bf16 %v2980_v22, %v2980_v22 }
 0xa97   : > { %v2995_v30 = vpack.c.bf16 %v2979_v28, %v2979_v28  ;;  %v2997_v31 = vpack.c.bf16 %v2981_v29, %v2981_v29  ;;  %5226 = vmatpush3.bf16.msra.mxu1 %v5678_v4  ;;  %5248 = vmatpush3.bf16.msra.mxu0 %v5679_v20 }
 0xa98   : > { %5255 = vmatprep.subr.bf16.mxu1 %v5680_v19  ;;  %5277 = vmatprep.subr.bf16.mxu0 %v5681_v27  ;;  %v4939_v27 = vld [vmem:[%s856_s26] ss:$0 sm:$0xff] }
 0xa99   : > { %4225 = vmatprep.mubr.bf16.mxu1 %v2995_v30  ;;  %4265 = vmatprep.mubr.bf16.mxu0 %v2997_v31 }
 0xa9a   : > { %4226 = vmatmul.mubr.bf16.vlgmr.msra.gmra.mrb[52].mxu1 %v2994_v35  ;;  %4266 = vmatmul.mubr.bf16.vlgmr.msra.gmra.mrb[40].mxu0 %v2996_v36 }
 0xa9b   : > { %5256 = vmatpush3.bf16.msra.mxu1 %v5682_v32  ;;  %5278 = vmatpush3.bf16.msra.mxu0 %v5683_v34 }
 0xa9c   : > { %5257 = vmatprep.subr.bf16.mxu1 %v5684_v37  ;;  %5279 = vmatprep.subr.bf16.mxu0 %v5685_v38 }
 0xa9f   : > { %5258 = vmatpush3.bf16.msra.mxu1 %v5686_v41  ;;  %5280 = vmatpush3.bf16.msra.mxu0 %v5687_v43 }
 0xaa0   : > { %5259 = vmatprep.subr.bf16.mxu1 %v5688_v44  ;;  %5281 = vmatprep.subr.bf16.mxu0 %v5689_v45 }
 0xaa3   : > { %5260 = vmatpush3.bf16.msra.mxu1 %v5690_v13  ;;  %5282 = vmatpush3.bf16.msra.mxu0 %v5691_v46 }
 0xaa4   : > { %5261 = vmatprep.subr.bf16.mxu1 %v5692_v24  ;;  %5283 = vmatprep.subr.bf16.mxu0 %v5693_v47 }
 0xaa7   : > { %5262 = vmatpush3.bf16.msra.mxu1 %v5694_v48  ;;  %5284 = vmatpush3.bf16.msra.mxu0 %v5695_v49 }
 0xaa8   : > { %5263 = vmatprep.subr.bf16.mxu1 %v5696_v50  ;;  %5285 = vmatprep.subr.bf16.mxu0 %v5697_v51 }
 0xaab   : > { %5264 = vmatpush3.bf16.msra.mxu1 %v5698_v52  ;;  %5286 = vmatpush3.bf16.msra.mxu0 %v5699_v53 }
 0xaac   : > { %5265 = vmatprep.subr.bf16.mxu1 %v5700_v54  ;;  %5287 = vmatprep.subr.bf16.mxu0 %v5701_v58 }
 0xaaf   : > { %5266 = vmatpush3.bf16.msra.mxu1 %v5702_v59  ;;  %5288 = vmatpush3.bf16.msra.mxu0 %v5703_v61 }
 0xab0   : > { %5267 = vmatprep.subr.bf16.mxu1 %v5704_v63  ;;  %5289 = vmatprep.subr.bf16.mxu0 %v5705_v12 }
 0xab1   : > { %v2922_v9 = vpop.f32.mrb[40].mxu1  ;;  %v2963_v57 = vpop.f32.mrb[28].mxu0 }
 0xab2   : > { %v2923_v40 = vadd.f32 %v2922_v9, %v1973_v1  ;;  %v2964_v10 = vadd.f32 %v2963_v57, %v1981_v2  ;;  %v2924_v11 = vpop.f32.mrb[41].mxu1  ;;  %v2965_v55 = vpop.f32.mrb[29].mxu0 }
 0xab3   : > { %v2925_v14 = vadd.f32 %v2924_v11, %v1977_v3  ;;  %v2966_v60 = vadd.f32 %v2965_v55, %v1985_v33  ;;  %v2926_v15 = vpop.f32.mrb[42].mxu1  ;;  %v2967_v39 = vpop.f32.mrb[30].mxu0  ;;  %5268 = vmatpush3.bf16.msra.mxu1 %v5706_v6  ;;  %5290 = vmatpush3.bf16.msra.mxu0 %v5707_v7 }
 0xab4   : > { %v2982_v16 = vmax.f32 %v2923_v40, 0.0  ;;  %v2984_v42 = vmax.f32 %v2964_v10, 0.0  ;;  %v2927_v17 = vpop.f32.mrb[43].mxu1  ;;  %v2968_v18 = vpop.f32.mrb[31].mxu0  ;;  %5269 = vmatprep.subr.bf16.mxu1 %v5708_v56  ;;  %5291 = vmatprep.subr.bf16.mxu0 %v5709_v8 }
 0xab5   : > { %v2983_v5 = vmax.f32 %v2925_v14, 0.0  ;;  %v2985_v4 = vmax.f32 %v2966_v60, 0.0 }
 0xab6   : > { %v2998_v22 = vpack.c.bf16 %v2982_v16, %v2982_v16  ;;  %v3000_v25 = vpack.c.bf16 %v2984_v42, %v2984_v42 }
 0xab7   : > { %v2999_v20 = vpack.c.bf16 %v2983_v5, %v2983_v5  ;;  %v3001_v21 = vpack.c.bf16 %v2985_v4, %v2985_v4  ;;  %5270 = vmatpush3.bf16.msra.mxu1 %v5710_v62  ;;  %5292 = vmatpush3.bf16.msra.mxu0 %v5711_v0  ;;  %v5068_v4 = vld [vmem:[%s7249_s1] ss:$0 sm:$0xff] }
 0xab9   : > { %4305 = vmatprep.mubr.bf16.mxu1 %v2999_v20  ;;  %4345 = vmatprep.mubr.bf16.mxu0 %v3001_v21  ;;  %v5069_v21 = vld [vmem:[%s7250_s2] ss:$0 sm:$0xff] }
 0xaba   : > { %4306 = vmatmul.mubr.bf16.vlgmr.msra.gmra.mrb[56].mxu1 %v2998_v22  ;;  %4346 = vmatmul.mubr.bf16.vlgmr.msra.gmra.mrb[44].mxu0 %v3000_v25 }
 0xb2d   : > { %v5139_v26 = vpop.f32.mrb[44].mxu1  ;;  %v5161_v19 = vpop.f32.mrb[32].mxu0 }
 0xb2e   : > { %v5140_v28 = vpop.f32.mrb[45].mxu1  ;;  %v5162_v29 = vpop.f32.mrb[33].mxu0 }
 0xb2f   : > { %v5141_v30 = vadd.f32 %v5140_v28, %v5139_v26  ;;  %v5163_v31 = vadd.f32 %v5162_v29, %v5161_v19  ;;  %v5142_v32 = vpop.f32.mrb[46].mxu1  ;;  %v5164_v34 = vpop.f32.mrb[34].mxu0  ;;  %v6104_v26 = vmov (!%p5070_p10), 0.0   ;;  %v5733_v19 = vld [vmem:[#allocation15 + $0x8] sm:$0xff] (!%p5070_p10)   ;;  %v5735_v28 = vld [vmem:[#allocation15 + $0x18] sm:$0xff] (!%p5070_p10)   ;;  %v5736_v29 = vld [vmem:[#allocation15 + $0x20] sm:$0xff] (!%p5070_p10)  }
 0xb30   : > { %v5143_v35 = vpop.f32.mrb[47].mxu1  ;;  %v5165_v36 = vpop.f32.mrb[35].mxu0  ;;  %5402 = vmatprep.subr.bf16.mxu0 (!%p5070_p10), %v6104_v26  ;;  %5418 = vmatprep.mubr.msk.bf16.mxu0 (!%p5070_p10), %vm6105_vm9, %v6104_v26  ;;  %v5739_v32 = vld [vmem:[#allocation15 + $0x38] sm:$0xff] (!%p5070_p10)  }
 0xb31   : > { %v4068_v37 = vadd.f32 %v5141_v30, %v4939_v27  ;;  %v5734_v27 = vld [vmem:[#allocation15 + $0x10] sm:$0xff] (!%p5070_p10)   ;;  %v5737_v30 = vld [vmem:[#allocation15 + $0x28] sm:$0xff] (!%p5070_p10)   ;;  %v5071_v35 = vld [vmem:[%s7251_s29] ss:$0 sm:$0xff] (!%p5070_p10) }
 0xb33   : > { %v4108_v38 = vadd.f32 %v5163_v31, %v4068_v37  ;;  %v5738_v31 = vld [vmem:[#allocation15 + $0x30] sm:$0xff] (!%p5070_p10)  }
 0xb4d   : > { %v5183_v41 = vpop.f32.mrb[48].mxu1  ;;  %v5205_v43 = vpop.f32.mrb[36].mxu0 }
 0xb4e   : > { %v5184_v44 = vpop.f32.mrb[49].mxu1  ;;  %v5206_v45 = vpop.f32.mrb[37].mxu0 }
 0xb4f   : > { %v5185_v13 = vadd.f32 %v5184_v44, %v5183_v41  ;;  %v5207_v46 = vadd.f32 %v5206_v45, %v5205_v43  ;;  %v5186_v24 = vpop.f32.mrb[50].mxu1  ;;  %v5208_v47 = vpop.f32.mrb[38].mxu0 }
 0xb50   : > { %v5187_v48 = vpop.f32.mrb[51].mxu1  ;;  %v5209_v49 = vpop.f32.mrb[39].mxu0 }
 0xb51   : > { %v4148_v50 = vadd.f32 %v5185_v13, %v4108_v38 }
 0xb53   : > { %v4188_v51 = vadd.f32 %v5207_v46, %v4148_v50 }
 0xb6d   : > { %v5227_v52 = vpop.f32.mrb[52].mxu1  ;;  %v5249_v53 = vpop.f32.mrb[40].mxu0 }
 0xb6e   : > { %v5228_v54 = vpop.f32.mrb[53].mxu1  ;;  %v5250_v58 = vpop.f32.mrb[41].mxu0 }
 0xb6f   : > { %v5229_v59 = vadd.f32 %v5228_v54, %v5227_v52  ;;  %v5251_v61 = vadd.f32 %v5250_v58, %v5249_v53  ;;  %v5230_v63 = vpop.f32.mrb[54].mxu1  ;;  %v5252_v12 = vpop.f32.mrb[42].mxu0 }
 0xb70   : > { %v5231_v1 = vpop.f32.mrb[55].mxu1  ;;  %v5253_v2 = vpop.f32.mrb[43].mxu0 }
 0xb71   : > { %v4228_v3 = vadd.f32 %v5229_v59, %v4188_v51 }
 0xb73   : > { %v4268_v33 = vadd.f32 %v5251_v61, %v4228_v3 }
 0xb8d   : > { %v5271_v6 = vpop.f32.mrb[56].mxu1  ;;  %v5293_v7 = vpop.f32.mrb[44].mxu0 }
 0xb8e   : > { %v5272_v56 = vpop.f32.mrb[57].mxu1  ;;  %v5294_v8 = vpop.f32.mrb[45].mxu0 }
 0xb8f   : > { %v5273_v9 = vadd.f32 %v5272_v56, %v5271_v6  ;;  %v5295_v57 = vadd.f32 %v5294_v8, %v5293_v7  ;;  %v5274_v40 = vpop.f32.mrb[58].mxu1  ;;  %v5296_v10 = vpop.f32.mrb[46].mxu0 }
 0xb90   : > { %v5275_v11 = vpop.f32.mrb[59].mxu1  ;;  %v5297_v55 = vpop.f32.mrb[47].mxu0 }
 0xb91   : > { %v4308_v14 = vadd.f32 %v5273_v9, %v4268_v33 }
 0xb93   : > { %v4348_v60 = vadd.f32 %v5295_v57, %v4308_v14 }
 0xb95   : > { %v4353_v15 = vadd.f32 %v4348_v60, %v6806_v23  ;;  %v5732_v23 = vld [vmem:[#allocation15] sm:$0xff] (!%p5070_p10)  }
 0xb96   : > { %5403 = vmatpush3.bf16.msra.mxu0 (!%p5070_p10), %v5732_v23 }
 0xb97   : > { %4356 = vadd.xlane.f32.xlu0 %v4353_v15  ;;  %5404 = vmatprep.subr.bf16.mxu0 (!%p5070_p10), %v6104_v26 }
 0xb9a   : > { %5405 = vmatpush3.bf16.msra.mxu0 (!%p5070_p10), %v5733_v19 }
 0xb9b   : > { %5406 = vmatprep.subr.bf16.mxu0 (!%p5070_p10), %v6104_v26 }
 0xb9e   : > { %5407 = vmatpush3.bf16.msra.mxu0 (!%p5070_p10), %v5734_v27 }
 0xb9f   : > { %5408 = vmatprep.subr.bf16.mxu0 (!%p5070_p10), %v6104_v26 }
 0xba2   : > { %5409 = vmatpush3.bf16.msra.mxu0 (!%p5070_p10), %v5735_v28 }
 0xba3   : > { %5410 = vmatprep.subr.bf16.mxu0 (!%p5070_p10), %v6104_v26 }
 0xba6   : > { %5411 = vmatpush3.bf16.msra.mxu0 (!%p5070_p10), %v5736_v29 }
 0xba7   : > { %5412 = vmatprep.subr.bf16.mxu0 (!%p5070_p10), %v6104_v26 }
 0xbaa   : > { %5413 = vmatpush3.bf16.msra.mxu0 (!%p5070_p10), %v5737_v30 }
 0xbab   : > { %5414 = vmatprep.subr.bf16.mxu0 (!%p5070_p10), %v6104_v26 }
 0xbae   : > { %5415 = vmatpush3.bf16.msra.mxu0 (!%p5070_p10), %v5738_v31 }
 0xbaf   : > { %5416 = vmatprep.subr.bf16.mxu0 (!%p5070_p10), %v6104_v26 }
 0xbb2   : > { %5417 = vmatpush3.bf16.msra.mxu0 (!%p5070_p10), %v5739_v32 }
 0xc24   : > { %v4357_v39 = vpop.xlane.xlu0 %4356 }
 0xc25   : > { %v4358_v62 = vmul.f32 0.0078125, %v4357_v39 }
 0xc27   : > { %v4359_v0 = vsub.f32 %v4353_v15, %v4358_v62 }
 0xc29   : > { %v4360_v16 = vmul.f32 %v4359_v0, %v4359_v0 }
 0xc2b   : > { %4361 = vadd.xlane.f32.xlu1 %v4360_v16 }
 0xcb8   : > { %v4362_v42 = vpop.xlane.xlu1 %4361 }
 0xcb9   : > { %v4363_v17 = vmul.f32 0.0078125, %v4362_v42 }
 0xcbb   : > { %v4364_v18 = vadd.f32 1e-05, %v4363_v17 }
 0xcbd   : > { %5730 = vrsqrt.f32 %v4364_v18 }
 0xcc7   : > { %v5731_v5 = vpop.eup %5730 }
 0xcc8   : > { %v4366_v20 = vmul.f32 %v5731_v5, %v4359_v0  ;;  %4385 = sbr.rel (%p5070_p10) target bundleno = 3495 (0xda7), region = 132 }
 0xcca   : > { %v4373_v22 = vmul.f32 %v5068_v4, %v4366_v20 }
 0xccc   : > { %v4380_v25 = vadd.f32 %v5069_v21, %v4373_v22 }
 0xcce   : > { %4381 = vst [vmem:[#allocation2] sm:$0xff] %v4380_v25  ;;  %v4386_v34 = vpack.c.bf16 (!%p5070_p10), %v4380_v25, %v4380_v25 }
 0xcd0   : > { %5419 = vmatmul.mubr.bf16.vlgmr.msra.gmra.mrb[0].mxu0 %v4386_v34 }
 0xda3   : > { %v4492_v36 = vpop.f32.mrb[0].mxu0 }
 0xda4   : > { %v4493_v37 = vadd.f32 %v5071_v35, %v4492_v36  ;;  %v5420_v38 = vpop.f32.mrb[1].mxu0 }
 0xda5   : > { %v4495_v41 = vpop.f32.mrb[2].mxu0 }
 0xda6   : > { %4498 = vst [vmem:[#allocation16] sm:$0xff] %v4493_v37  ;;  %v5421_v43 = vpop.f32.mrb[3].mxu0 }
 0xda7 PF: > { %p5490_p2 = scmp.eq.s32.totalorder %s6216_s28, 1  ;;  %s6106_s17 = smov [#allocation16]  }
 0xda8   : > { %s4506_s16 = sshll.u32 %s6106_s17, 4  ;;  %s4507_s16 = int_to_ptr.vmem [resolvable:$true] %s4506_s16 }
 0xda9   : > { %s6004_s4 = scalar_lea.vmem %s4507_s16, 128  ;;  %p6011_p5 = scmp.lt.s32.totalorder %s4507_s16, %s4507_s16 }
 0xdaa   : > { %p6005_p7 = scmp.ne.s32.totalorder %s4507_s16, %s6004_s4  ;;  %p6012_p8 = scmp.lt.s32.totalorder %s6004_s4, %s6004_s4 }
 0xdac   : > { %p6006_p0 = pnand %p6005_p7, %p5490_p2  ;;  %p6013_p11 = por %p6012_p8, %p6011_p5 }
 0xdae   : > { %p6007_p9 = pneg %p6006_p0 }
 0xdb0   : > { %p6014_p1 = pnand %p6013_p11, %p6007_p9 }
 0xdb2   : > { %6017 = shalt.err (!%p6014_p1)
}
 0xdb3   : > { %s7252_s11 = sld [smem:[#allocation40_spill]] }
 0xdb9   : > { %s6018_s9 = scalar_lea.hbm %s7252_s11, 128 }
 0xdba   : > { %p6019_p3 = scmp.ne.s32.totalorder %s7252_s11, %s6018_s9  ;;  %p6024_p6 = scmp.lt.u32.totalorder %s6018_s9, %s7252_s11 }
 0xdbc   : > { %p6020_p13 = pnand %p6019_p3, %p5490_p2 }
 0xdbe   : > { %p6021_p4 = pneg %p6020_p13 }
 0xdc0   : > { %p6026_p12 = pnand %p6024_p6, %p6021_p4 }
 0xdc2   : > { %6029 = shalt.err (!%p6026_p12)
}
 0xdc3   : > { %5451 = dma.vmem_to_hbm [thread:$0]  (%p5490_p2), %s4507_s16, 128, %s7252_s11, [#allocation6]  }
 0xdc4   : > { %6063 = dma.done.wait (%p5490_p2), [#allocation6], 128  }
 0xdc5   : > { %6065 = vsyncadd (%p5490_p2), [#allocation6], 4294967168 }
 0xdc6 PF: > { %s7253_s27 = sld [smem:[#allocation23_spill]]  ;;  %s7254_s30 = sld [smem:[#allocation22_spill]] }
 0xdc7   : > { %s7255_s26 = sld [smem:[#allocation24_spill]]  ;;  %s7256_s24 = smov %s6072_s25 }
 0xdcc   : > { %p27_p10 = scmp.ge.s32.totalorder %s7253_s27, 4   ;;  %s7257_s25 = smov %s7254_s30 }
 0xdce   :  { %29 = sbr.rel (!%p27_p10) target bundleno = 21 (0x15), region = 217 }
 0xdd5   :  { %4519 = vsyncpa [#allocation5], 1 }
 0xdd6   :  { %4521 = vsyncpa [#allocation5 + $0x1], 1 }
 0xdd7   :  { %4522 = vsyncpa [#allocation8], 1 }
 0xdd8   :  { %4523 = vsyncpa [#allocation6], 1 }
 0xdd9   :  { %4525 = vsyncpa [#allocation6 + $0x1], 1 }

</bundles_post_ra>
